<compile_context>
chip_gen: v6e
topology: v6e:2x2x1
jax: 0.10.0
libtpu: 0.0.40
codegen_flags: <defaults>
</compile_context>

<pallas_src>
import math
from functools import partial

import jax
import jax.numpy as jnp
from jax.experimental import pallas as pl
from jax.experimental.pallas import tpu as pltpu


_VMEM_LIMIT = 32 * 1024 * 1024   # within scoped defaults on v5e/v6e/v7x


# ------------------------------ tiling helpers ------------------------------

def _round_up(x, m):
    return ((x + m - 1) // m) * m


def _pick_tile(d, cands=(512, 256, 128)):
    for t in cands:
        if d % t == 0:
            return t
    return d


def _tile_rows(M, cap=256):
    """Sublane axis: pad to multiple of 8; tile up to `cap` rows."""
    if M <= cap:
        Mp = _round_up(M, 8)
        return Mp, Mp
    Mp = _round_up(M, cap)
    return Mp, cap


def _tile_cols(D, full_cap=512):
    """Lane axis: keep whole if small, else pad to 128-multiple and tile."""
    if D <= full_cap:
        return D, D
    Dp = _round_up(D, 128)
    return Dp, _pick_tile(Dp)


# ----------------------------- Pallas kernels -------------------------------

def _linear_kernel(x_ref, w_ref, b_ref, o_ref, acc_ref, *, act):
    @pl.when(pl.program_id(2) == 0)
    def _():
        acc_ref[...] = jnp.zeros_like(acc_ref)

    acc_ref[...] += jnp.dot(x_ref[...].astype(jnp.bfloat16),
                            w_ref[...].astype(jnp.bfloat16),
                            preferred_element_type=jnp.float32)

    @pl.when(pl.program_id(2) == pl.num_programs(2) - 1)
    def _():
        y = acc_ref[...] + b_ref[...].astype(jnp.float32)
        if act == "relu":
            y = jnp.maximum(y, 0.0)
        elif act == "gelu":   # exact GELU (PyTorch nn.GELU default)
            y = 0.5 * y * (1.0 + jax.lax.erf(y * (1.0 / math.sqrt(2.0))))
        o_ref[...] = y.astype(o_ref.dtype)


def linear(x, w, b, act="none", out_dtype=jnp.bfloat16):
    """Tiled x:(M,K) @ w:(K,N) + b with fused activation epilogue."""
    M, K = x.shape
    N = w.shape[1]
    Mp, tm = _tile_rows(M)
    Kp, tk = _tile_cols(K)
    Np, tn = _tile_cols(N)

    xp = jnp.pad(x, ((0, Mp - M), (0, Kp - K))) if (Mp, Kp) != (M, K) else x
    wp = jnp.pad(w, ((0, Kp - K), (0, Np - N))) if (Kp, Np) != (K, N) else w
    bp = b.reshape(1, N)
    if Np != N:
        bp = jnp.pad(bp, ((0, 0), (0, Np - N)))

    grid = (Mp // tm, Np // tn, Kp // tk)
    flops = 2 * Mp * Np * Kp
    bytes_accessed = (Mp * Kp + Kp * Np) * 2 + Mp * Np * jnp.dtype(out_dtype).itemsize

    out = pl.pallas_call(
        partial(_linear_kernel, act=act),
        out_shape=jax.ShapeDtypeStruct((Mp, Np), out_dtype),
        grid=grid,
        in_specs=[pl.BlockSpec((tm, tk), lambda i, j, k: (i, k)),
                  pl.BlockSpec((tk, tn), lambda i, j, k: (k, j)),
                  pl.BlockSpec((1, tn), lambda i, j, k: (0, j))],
        out_specs=pl.BlockSpec((tm, tn), lambda i, j, k: (i, j)),
        scratch_shapes=[pltpu.VMEM((tm, tn), jnp.float32)],
        compiler_params=pltpu.CompilerParams(
            dimension_semantics=("parallel", "parallel", "arbitrary"),
            vmem_limit_bytes=_VMEM_LIMIT),
        cost_estimate=pl.CostEstimate(flops=flops, transcendentals=0,
                                      bytes_accessed=bytes_accessed),
    )(xp, wp, bp)
    if (Mp, Np) != (M, N):
        out = out[:M, :N]
    return out


def _linear_add_ln_kernel(x_ref, w_ref, b_ref, r_ref, g_ref, bb_ref,
                          o_ref, acc_ref, *, eps):
    @pl.when(pl.program_id(1) == 0)
    def _():
        acc_ref[...] = jnp.zeros_like(acc_ref)

    acc_ref[...] += jnp.dot(x_ref[...].astype(jnp.bfloat16),
                            w_ref[...].astype(jnp.bfloat16),
                            preferred_element_type=jnp.float32)

    @pl.when(pl.program_id(1) == pl.num_programs(1) - 1)
    def _():
        y = (acc_ref[...] + b_ref[...].astype(jnp.float32)
             + r_ref[...].astype(jnp.float32))
        mean = jnp.mean(y, axis=-1, keepdims=True)
        yc = y - mean
        var = jnp.mean(yc * yc, axis=-1, keepdims=True)
        yn = yc * jax.lax.rsqrt(var + eps)
        o_ref[...] = (yn * g_ref[...].astype(jnp.float32)
                      + bb_ref[...].astype(jnp.float32)).astype(o_ref.dtype)


def linear_add_ln(x, w, b, res, gamma, beta, eps=1e-5, out_dtype=jnp.bfloat16):
    """Fused: LayerNorm((x @ w + b) + res). LN over N, so N kept whole."""
    M, K = x.shape
    N = w.shape[1]
    Mp, tm = _tile_rows(M)
    Kp, tk = _tile_cols(K)

    xp = jnp.pad(x, ((0, Mp - M), (0, Kp - K))) if (Mp, Kp) != (M, K) else x
    wp = jnp.pad(w, ((0, Kp - K), (0, 0))) if Kp != K else w
    rp = jnp.pad(res, ((0, Mp - M), (0, 0))) if Mp != M else res

    grid = (Mp // tm, Kp // tk)
    out = pl.pallas_call(
        partial(_linear_add_ln_kernel, eps=eps),
        out_shape=jax.ShapeDtypeStruct((Mp, N), out_dtype),
        grid=grid,
        in_specs=[pl.BlockSpec((tm, tk), lambda i, k: (i, k)),
                  pl.BlockSpec((tk, N), lambda i, k: (k, 0)),
                  pl.BlockSpec((1, N), lambda i, k: (0, 0)),
                  pl.BlockSpec((tm, N), lambda i, k: (i, 0)),
                  pl.BlockSpec((1, N), lambda i, k: (0, 0)),
                  pl.BlockSpec((1, N), lambda i, k: (0, 0))],
        out_specs=pl.BlockSpec((tm, N), lambda i, k: (i, 0)),
        scratch_shapes=[pltpu.VMEM((tm, N), jnp.float32)],
        compiler_params=pltpu.CompilerParams(
            dimension_semantics=("parallel", "arbitrary"),
            vmem_limit_bytes=_VMEM_LIMIT),
    )(xp, wp, b.reshape(1, N), rp, gamma.reshape(1, N), beta.reshape(1, N))
    return out[:M] if Mp != M else out


def _ln_linear_kernel(x_ref, g_ref, bb_ref, w_ref, b_ref, o_ref, *, eps, act):
    x = x_ref[...].astype(jnp.float32)
    mean = jnp.mean(x, axis=-1, keepdims=True)
    xc = x - mean
    var = jnp.mean(xc * xc, axis=-1, keepdims=True)
    xn = xc * jax.lax.rsqrt(var + eps)
    xn = xn * g_ref[...].astype(jnp.float32) + bb_ref[...].astype(jnp.float32)
    y = jnp.dot(xn.astype(jnp.bfloat16), w_ref[...].astype(jnp.bfloat16),
                preferred_element_type=jnp.float32) + b_ref[...].astype(jnp.float32)
    if act == "gelu":
        y = 0.5 * y * (1.0 + jax.lax.erf(y * (1.0 / math.sqrt(2.0))))
    elif act == "relu":
        y = jnp.maximum(y, 0.0)
    o_ref[...] = y.astype(o_ref.dtype)


def ln_linear(x, gamma, beta, w, b, act="none", eps=1e-5, out_dtype=jnp.bfloat16):
    """Fused head: Linear(LayerNorm(x)) + activation. K (=LN dim) kept whole."""
    M, K = x.shape
    N = w.shape[1]
    Mp, tm = _tile_rows(M)
    Np, tn = _tile_cols(N)

    xp = jnp.pad(x, ((0, Mp - M), (0, 0))) if Mp != M else x
    wp = jnp.pad(w, ((0, 0), (0, Np - N))) if Np != N else w
    bp = b.reshape(1, N)
    if Np != N:
        bp = jnp.pad(bp, ((0, 0), (0, Np - N)))

    grid = (Mp // tm, Np // tn)
    out = pl.pallas_call(
        partial(_ln_linear_kernel, eps=eps, act=act),
        out_shape=jax.ShapeDtypeStruct((Mp, Np), out_dtype),
        grid=grid,
        in_specs=[pl.BlockSpec((tm, K), lambda i, j: (i, 0)),
                  pl.BlockSpec((1, K), lambda i, j: (0, 0)),
                  pl.BlockSpec((1, K), lambda i, j: (0, 0)),
                  pl.BlockSpec((K, tn), lambda i, j: (0, j)),
                  pl.BlockSpec((1, tn), lambda i, j: (0, j))],
        out_specs=pl.BlockSpec((tm, tn), lambda i, j: (i, j)),
        compiler_params=pltpu.CompilerParams(
            dimension_semantics=("parallel", "parallel"),
            vmem_limit_bytes=_VMEM_LIMIT),
    )(xp, gamma.reshape(1, K), beta.reshape(1, K), wp, bp)
    if (Mp, Np) != (M, N):
        out = out[:M, :N]
    return out


def _attn_kernel(q_ref, k_ref, v_ref, o_ref, *, scale, s_valid):
    q = q_ref[0]                       # (H, Sp, Dh) bf16
    k = k_ref[0]
    v = v_ref[0]
    # contract Dh directly (no k.T transpose); f32 accumulation on MXU
    s = jnp.einsum('hqd,hkd->hqk', q, k,
                   preferred_element_type=jnp.float32) * scale
    key_idx = jax.lax.broadcasted_iota(jnp.int32, s.shape, 2)
    s = jnp.where(key_idx < s_valid, s, -1e30)     # mask padded keys
    m = jnp.max(s, axis=-1, keepdims=True)
    p = jnp.exp(s - m)
    l = jnp.sum(p, axis=-1, keepdims=True)
    o = jnp.einsum('hqk,hkd->hqd', p.astype(v.dtype), v,
                   preferred_element_type=jnp.float32)
    o_ref[0] = (o * pl.reciprocal(l, approx=True)).astype(o_ref.dtype)


def attention(q, k, v, s_valid):
    """q,k,v: (B, H, Sp, Dh). All heads of one batch handled per grid step."""
    B, H, Sp, Dh = q.shape
    spec = pl.BlockSpec((1, H, Sp, Dh), lambda b: (b, 0, 0, 0))
    return pl.pallas_call(
        partial(_attn_kernel, scale=1.0 / math.sqrt(Dh), s_valid=s_valid),
        out_shape=jax.ShapeDtypeStruct((B, H, Sp, Dh), q.dtype),
        grid=(B,),
        in_specs=[spec, spec, spec],
        out_specs=spec,
        compiler_params=pltpu.CompilerParams(
            dimension_semantics=("parallel",),
            vmem_limit_bytes=_VMEM_LIMIT),
    )(q, k, v)


# ------------------------------- model glue ---------------------------------

LABELS = ['gun', 'knife', 'broken glass', 'blood stains', 'footprints',
          'bullet casing', 'explosives', 'rope', 'handcuffs', 'drugs',
          'documents', 'fingerprints', 'money', 'jewelry']


def patchify(x, p):
    """NCHW image -> (B, num_patches, C*p*p), feature order (c, dy, dx)
    matching Conv2d(kernel=stride=p) weight flattening."""
    B, C, H, W = x.shape
    x = x.reshape(B, C, H // p, p, W // p, p)
    x = x.transpose(0, 2, 4, 1, 3, 5)            # (B, h, w, C, p, p)
    return x.reshape(B, (H // p) * (W // p), C * p * p)


def init_params(key, cfg):
    E = cfg["embed_dim"]
    C, p = cfg["in_channels"], cfg["patch_size"]
    nP = (cfg["img_size"] // p) ** 2
    F = cfg["ffn_dim"]
    Hd = cfg["mlp_hidden"]
    nC = cfg["num_classes"]
    nCp = _round_up(max(nC, 128), 128)           # lane-pad classifier output

    ks = iter(jax.random.split(key, 8 + 4 * cfg["depth"]))

    def w(shape):   # bf16 weights for MXU-native matmuls
        return (0.02 * jax.random.normal(next(ks), shape, dtype=jnp.float32)
                ).astype(jnp.bfloat16)

    head_w2 = 0.02 * jax.random.normal(next(ks), (Hd, nC), dtype=jnp.float32)
    head_w2 = jnp.pad(head_w2, ((0, 0), (0, nCp - nC))).astype(jnp.bfloat16)

    params = {
        "patch_w": w((C * p * p, E)), "patch_b": jnp.zeros((E,), jnp.float32),
        "cls_token": jax.random.normal(next(ks), (1, 1, E), dtype=jnp.float32),
        "pos_embed": 0.02 * jax.random.normal(next(ks), (1, nP + 1, E),
                                              dtype=jnp.float32),
        "head_ln_g": jnp.ones((E,), jnp.float32),
        "head_ln_b": jnp.zeros((E,), jnp.float32),
        "head_w1": w((E, Hd)), "head_b1": jnp.zeros((Hd,), jnp.float32),
        "head_w2": head_w2, "head_b2": jnp.zeros((nCp,), jnp.float32),
        "layers": [],
    }
    for _ in range(cfg["depth"]):
        params["layers"].append({
            "w_qkv": w((E, 3 * E)), "b_qkv": jnp.zeros((3 * E,), jnp.float32),
            "w_out": w((E, E)),     "b_out": jnp.zeros((E,), jnp.float32),
            "ln1_g": jnp.ones((E,), jnp.float32), "ln1_b": jnp.zeros((E,), jnp.float32),
            "w_ff1": w((E, F)), "b_ff1": jnp.zeros((F,), jnp.float32),
            "w_ff2": w((F, E)), "b_ff2": jnp.zeros((E,), jnp.float32),
            "ln2_g": jnp.ones((E,), jnp.float32), "ln2_b": jnp.zeros((E,), jnp.float32),
        })
    return params


def vit_forward(params, x, cfg):
    B = x.shape[0]
    E, H, p = cfg["embed_dim"], cfg["num_heads"], cfg["patch_size"]
    nC = cfg["num_classes"]
    Dh = E // H

    # --- patch embedding (Conv2d k=s=p == per-patch linear projection) ---
    patches = patchify(x, p).astype(jnp.bfloat16)           # (B, nP, C*p*p)
    nP = patches.shape[1]
    tok = linear(patches.reshape(B * nP, -1), params["patch_w"], params["patch_b"])
    tok = tok.reshape(B, nP, E).astype(jnp.float32)

    cls = jnp.broadcast_to(params["cls_token"], (B, 1, E))
    seq = jnp.concatenate([cls, tok], axis=1)               # (B, S, E)
    S = seq.shape[1]
    seq = seq + params["pos_embed"][:, :S, :]

    # pad sequence to a sublane-dense length; padded keys masked in attention
    Sp = _round_up(S, 8)
    seq = jnp.pad(seq, ((0, 0), (0, Sp - S), (0, 0))).astype(jnp.bfloat16)
    x2 = seq.reshape(B * Sp, E)

    # --- transformer encoder (post-LN, ReLU FFN, eval-mode dropout=identity) ---
    for lp in params["layers"]:
        qkv = linear(x2, lp["w_qkv"], lp["b_qkv"])          # (B*Sp, 3E) bf16
        qkv = qkv.reshape(B, Sp, 3, H, Dh).transpose(2, 0, 3, 1, 4)  # (3,B,H,Sp,Dh)
        a = attention(qkv[0], qkv[1], qkv[2], s_valid=S)    # (B, H, Sp, Dh)
        a = a.transpose(0, 2, 1, 3).reshape(B * Sp, E)
        # fused out-proj + residual + LN1
        x2 = linear_add_ln(a, lp["w_out"], lp["b_out"], x2, lp["ln1_g"], lp["ln1_b"])
        h = linear(x2, lp["w_ff1"], lp["b_ff1"], act="relu")
        # fused ff2 + residual + LN2
        x2 = linear_add_ln(h, lp["w_ff2"], lp["b_ff2"], x2, lp["ln2_g"], lp["ln2_b"])

    # --- MLP head on the CLS token (fused LN + Linear + GELU, then linear) ---
    cls_feat = x2.reshape(B, Sp, E)[:, 0, :]                # (B, E)
    z = ln_linear(cls_feat, params["head_ln_g"], params["head_ln_b"],
                  params["head_w1"], params["head_b1"], act="gelu")
    logits = linear(z, params["head_w2"], params["head_b2"],
                    out_dtype=jnp.float32)                  # (B, 128) padded
    return logits[:, :nC]


def detect_evidence(logits):
    # host-side dict thresholding, mirrors the PyTorch forward's return value
    detected = {}
    scores = jax.device_get(logits[0])
    for i, s in enumerate(scores):
        if float(s) > 0.5:
            detected[LABELS[i]] = float(s)
    return detected


# ----------------------------------- main -----------------------------------

if __name__ == "__main__":
    cfg = dict(img_size=16, patch_size=4, in_channels=3, embed_dim=32,
               num_heads=4, depth=2, num_classes=14,
               ffn_dim=1024, mlp_hidden=1024)

    key = jax.random.PRNGKey(0)
    kp, kx = jax.random.split(key)
    params = init_params(kp, cfg)
    x = jax.random.normal(kx, (2, cfg["in_channels"], cfg["img_size"],
                               cfg["img_size"]), dtype=jnp.float32)

    fwd = jax.jit(partial(vit_forward, cfg=cfg))
    logits = fwd(params, x)
    jax.block_until_ready(logits)
    _ = detect_evidence(logits)   # replicate the dict-returning forward
    print("KERNEL_OK")
</pallas_src>

<mosaic_0001>
module attributes {stable_mosaic.version = 11 : i64} {
  func.func @_linear_kernel(%arg0: i32, %arg1: i32, %arg2: i32, %arg3: memref<32x48xbf16, #tpu.memory_space<vmem>>, %arg4: memref<48x32xbf16, #tpu.memory_space<vmem>>, %arg5: memref<1x32xf32, #tpu.memory_space<vmem>>, %arg6: memref<32x32xbf16, #tpu.memory_space<vmem>>, %arg7: memref<32x32xf32, #tpu.memory_space<vmem>>) attributes {dimension_semantics = [#tpu.dimension_semantics<parallel>, #tpu.dimension_semantics<parallel>, #tpu.dimension_semantics<arbitrary>], iteration_bounds = array<i64: 1, 1, 1>, scalar_prefetch = 0 : i64, scratch_operands = 1 : i64, tpu.core_type = #tpu.core_type<tc>, window_params = [{transform_indices = @transform_0, window_bounds = array<i64: 32, 48>}, {transform_indices = @transform_1, window_bounds = array<i64: 48, 32>}, {transform_indices = @transform_2, window_bounds = array<i64: 1, 32>}, {transform_indices = @transform_3, window_bounds = array<i64: 32, 32>}]} {
    %c0_i32 = arith.constant 0 : i32
    %0 = arith.cmpi eq, %arg2, %c0_i32 : i32
    %1 = arith.extui %0 : i1 to i32
    %c0_i32_0 = arith.constant 0 : i32
    %2 = arith.cmpi ne, %1, %c0_i32_0 : i32
    scf.if %2 {
      %cst_10 = arith.constant 0.000000e+00 : f32
      %12 = vector.broadcast %cst_10 : f32 to vector<32x32xf32>
      %c0_11 = arith.constant 0 : index
      %c0_12 = arith.constant 0 : index
      %13 = vector.load %arg7[%c0_11, %c0_12] : memref<32x32xf32, #tpu.memory_space<vmem>>, vector<32x32xf32>
      tpu.vector_store %arg7[%c0_11, %c0_12], %12 {strides = array<i32>} : memref<32x32xf32, #tpu.memory_space<vmem>>, vector<32x32xf32>,
    } else {
    }
    %c0 = arith.constant 0 : index
    %c0_1 = arith.constant 0 : index
    %3 = vector.load %arg7[%c0, %c0_1] : memref<32x32xf32, #tpu.memory_space<vmem>>, vector<32x32xf32>
    %c0_2 = arith.constant 0 : index
    %c0_3 = arith.constant 0 : index
    %4 = vector.load %arg3[%c0_2, %c0_3] : memref<32x48xbf16, #tpu.memory_space<vmem>>, vector<32x48xbf16>
    %c0_4 = arith.constant 0 : index
    %c0_5 = arith.constant 0 : index
    %5 = vector.load %arg4[%c0_4, %c0_5] : memref<48x32xbf16, #tpu.memory_space<vmem>>, vector<48x32xbf16>
    %cst = arith.constant dense<0.000000e+00> : vector<32x32xf32>
    %6 = tpu.matmul %4, %5, %cst {dimension_numbers = #tpu.dot_dimension_numbers<[1], [0], [0], [1], [0, 0, 1, 1], [], []>} : vector<32x48xbf16>, vector<48x32xbf16>, vector<32x32xf32> -> vector<32x32xf32>
    %7 = arith.addf %3, %6 : vector<32x32xf32>
    %c0_6 = arith.constant 0 : index
    %c0_7 = arith.constant 0 : index
    %8 = vector.load %arg7[%c0_6, %c0_7] : memref<32x32xf32, #tpu.memory_space<vmem>>, vector<32x32xf32>
    tpu.vector_store %arg7[%c0_6, %c0_7], %7 {strides = array<i32>} : memref<32x32xf32, #tpu.memory_space<vmem>>, vector<32x32xf32>,
    %c0_i32_8 = arith.constant 0 : i32
    %9 = arith.cmpi eq, %arg2, %c0_i32_8 : i32
    %10 = arith.extui %9 : i1 to i32
    %c0_i32_9 = arith.constant 0 : i32
    %11 = arith.cmpi ne, %10, %c0_i32_9 : i32
    scf.if %11 {
      %c0_10 = arith.constant 0 : index
      %c0_11 = arith.constant 0 : index
      %12 = vector.load %arg7[%c0_10, %c0_11] : memref<32x32xf32, #tpu.memory_space<vmem>>, vector<32x32xf32>
      %c0_12 = arith.constant 0 : index
      %c0_13 = arith.constant 0 : index
      %13 = vector.load %arg5[%c0_12, %c0_13] : memref<1x32xf32, #tpu.memory_space<vmem>>, vector<1x32xf32>
      %14 = vector.broadcast %13 : vector<1x32xf32> to vector<32x32xf32>
      %15 = arith.addf %12, %14 : vector<32x32xf32>
      %16 = arith.truncf %15 : vector<32x32xf32> to vector<32x32xbf16>
      %c0_14 = arith.constant 0 : index
      %c0_15 = arith.constant 0 : index
      %17 = vector.load %arg6[%c0_14, %c0_15] : memref<32x32xbf16, #tpu.memory_space<vmem>>, vector<32x32xbf16>
      tpu.vector_store %arg6[%c0_14, %c0_15], %16 {strides = array<i32>} : memref<32x32xbf16, #tpu.memory_space<vmem>>, vector<32x32xbf16>,
    } else {
    }
    return
  }
  func.func @transform_0(%arg0: i32, %arg1: i32, %arg2: i32) -> (i32, i32) {
    %c0_i32 = arith.constant 0 : i32
    return %arg0, %arg2 : i32, i32
  }
  func.func @transform_1(%arg0: i32, %arg1: i32, %arg2: i32) -> (i32, i32) {
    %c0_i32 = arith.constant 0 : i32
    return %arg2, %arg1 : i32, i32
  }
  func.func @transform_2(%arg0: i32, %arg1: i32, %arg2: i32) -> (i32, i32) {
    %c0_i32 = arith.constant 0 : i32
    %c0_i32_0 = arith.constant 0 : i32
    return %c0_i32, %arg1 : i32, i32
  }
  func.func @transform_3(%arg0: i32, %arg1: i32, %arg2: i32) -> (i32, i32) {
    %c0_i32 = arith.constant 0 : i32
    return %arg0, %arg1 : i32, i32
  }
}

module attributes {stable_mosaic.version = 11 : i64} {
  func.func @_linear_kernel(%arg0: i32, %arg1: i32, %arg2: i32, %arg3: memref<48x32xbf16, #tpu.memory_space<vmem>>, %arg4: memref<32x96xbf16, #tpu.memory_space<vmem>>, %arg5: memref<1x96xf32, #tpu.memory_space<vmem>>, %arg6: memref<48x96xbf16, #tpu.memory_space<vmem>>, %arg7: memref<48x96xf32, #tpu.memory_space<vmem>>) attributes {dimension_semantics = [#tpu.dimension_semantics<parallel>, #tpu.dimension_semantics<parallel>, #tpu.dimension_semantics<arbitrary>], iteration_bounds = array<i64: 1, 1, 1>, scalar_prefetch = 0 : i64, scratch_operands = 1 : i64, tpu.core_type = #tpu.core_type<tc>, window_params = [{transform_indices = @transform_0, window_bounds = array<i64: 48, 32>}, {transform_indices = @transform_1, window_bounds = array<i64: 32, 96>}, {transform_indices = @transform_2, window_bounds = array<i64: 1, 96>}, {transform_indices = @transform_3, window_bounds = array<i64: 48, 96>}]} {
    %c0_i32 = arith.constant 0 : i32
    %0 = arith.cmpi eq, %arg2, %c0_i32 : i32
    %1 = arith.extui %0 : i1 to i32
    %c0_i32_0 = arith.constant 0 : i32
    %2 = arith.cmpi ne, %1, %c0_i32_0 : i32
    scf.if %2 {
      %cst_10 = arith.constant 0.000000e+00 : f32
      %12 = vector.broadcast %cst_10 : f32 to vector<48x96xf32>
      %c0_11 = arith.constant 0 : index
      %c0_12 = arith.constant 0 : index
      %13 = vector.load %arg7[%c0_11, %c0_12] : memref<48x96xf32, #tpu.memory_space<vmem>>, vector<48x96xf32>
      tpu.vector_store %arg7[%c0_11, %c0_12], %12 {strides = array<i32>} : memref<48x96xf32, #tpu.memory_space<vmem>>, vector<48x96xf32>,
    } else {
    }
    %c0 = arith.constant 0 : index
    %c0_1 = arith.constant 0 : index
    %3 = vector.load %arg7[%c0, %c0_1] : memref<48x96xf32, #tpu.memory_space<vmem>>, vector<48x96xf32>
    %c0_2 = arith.constant 0 : index
    %c0_3 = arith.constant 0 : index
    %4 = vector.load %arg3[%c0_2, %c0_3] : memref<48x32xbf16, #tpu.memory_space<vmem>>, vector<48x32xbf16>
    %c0_4 = arith.constant 0 : index
    %c0_5 = arith.constant 0 : index
    %5 = vector.load %arg4[%c0_4, %c0_5] : memref<32x96xbf16, #tpu.memory_space<vmem>>, vector<32x96xbf16>
    %cst = arith.constant dense<0.000000e+00> : vector<48x96xf32>
    %6 = tpu.matmul %4, %5, %cst {dimension_numbers = #tpu.dot_dimension_numbers<[1], [0], [0], [1], [0, 0, 1, 1], [], []>} : vector<48x32xbf16>, vector<32x96xbf16>, vector<48x96xf32> -> vector<48x96xf32>
    %7 = arith.addf %3, %6 : vector<48x96xf32>
    %c0_6 = arith.constant 0 : index
    %c0_7 = arith.constant 0 : index
    %8 = vector.load %arg7[%c0_6, %c0_7] : memref<48x96xf32, #tpu.memory_space<vmem>>, vector<48x96xf32>
    tpu.vector_store %arg7[%c0_6, %c0_7], %7 {strides = array<i32>} : memref<48x96xf32, #tpu.memory_space<vmem>>, vector<48x96xf32>,
    %c0_i32_8 = arith.constant 0 : i32
    %9 = arith.cmpi eq, %arg2, %c0_i32_8 : i32
    %10 = arith.extui %9 : i1 to i32
    %c0_i32_9 = arith.constant 0 : i32
    %11 = arith.cmpi ne, %10, %c0_i32_9 : i32
    scf.if %11 {
      %c0_10 = arith.constant 0 : index
      %c0_11 = arith.constant 0 : index
      %12 = vector.load %arg7[%c0_10, %c0_11] : memref<48x96xf32, #tpu.memory_space<vmem>>, vector<48x96xf32>
      %c0_12 = arith.constant 0 : index
      %c0_13 = arith.constant 0 : index
      %13 = vector.load %arg5[%c0_12, %c0_13] : memref<1x96xf32, #tpu.memory_space<vmem>>, vector<1x96xf32>
      %14 = vector.broadcast %13 : vector<1x96xf32> to vector<48x96xf32>
      %15 = arith.addf %12, %14 : vector<48x96xf32>
      %16 = arith.truncf %15 : vector<48x96xf32> to vector<48x96xbf16>
      %c0_14 = arith.constant 0 : index
      %c0_15 = arith.constant 0 : index
      %17 = vector.load %arg6[%c0_14, %c0_15] : memref<48x96xbf16, #tpu.memory_space<vmem>>, vector<48x96xbf16>
      tpu.vector_store %arg6[%c0_14, %c0_15], %16 {strides = array<i32>} : memref<48x96xbf16, #tpu.memory_space<vmem>>, vector<48x96xbf16>,
    } else {
    }
    return
  }
  func.func @transform_0(%arg0: i32, %arg1: i32, %arg2: i32) -> (i32, i32) {
    %c0_i32 = arith.constant 0 : i32
    return %arg0, %arg2 : i32, i32
  }
  func.func @transform_1(%arg0: i32, %arg1: i32, %arg2: i32) -> (i32, i32) {
    %c0_i32 = arith.constant 0 : i32
    return %arg2, %arg1 : i32, i32
  }
  func.func @transform_2(%arg0: i32, %arg1: i32, %arg2: i32) -> (i32, i32) {
    %c0_i32 = arith.constant 0 : i32
    %c0_i32_0 = arith.constant 0 : i32
    return %c0_i32, %arg1 : i32, i32
  }
  func.func @transform_3(%arg0: i32, %arg1: i32, %arg2: i32) -> (i32, i32) {
    %c0_i32 = arith.constant 0 : i32
    return %arg0, %arg1 : i32, i32
  }
}

module attributes {stable_mosaic.version = 11 : i64} {
  func.func @_attn_kernel(%arg0: i32, %arg1: memref<1x4x24x8xbf16, #tpu.memory_space<vmem>>, %arg2: memref<1x4x24x8xbf16, #tpu.memory_space<vmem>>, %arg3: memref<1x4x24x8xbf16, #tpu.memory_space<vmem>>, %arg4: memref<1x4x24x8xbf16, #tpu.memory_space<vmem>>) attributes {dimension_semantics = [#tpu.dimension_semantics<parallel>], iteration_bounds = array<i64: 2>, scalar_prefetch = 0 : i64, scratch_operands = 0 : i64, tpu.core_type = #tpu.core_type<tc>, window_params = [{transform_indices = @transform_0, window_bounds = array<i64: 1, 4, 24, 8>}, {transform_indices = @transform_1, window_bounds = array<i64: 1, 4, 24, 8>}, {transform_indices = @transform_2, window_bounds = array<i64: 1, 4, 24, 8>}, {transform_indices = @transform_3, window_bounds = array<i64: 1, 4, 24, 8>}]} {
    %c0 = arith.constant 0 : index
    %c0_0 = arith.constant 0 : index
    %c0_1 = arith.constant 0 : index
    %c0_2 = arith.constant 0 : index
    %0 = vector.load %arg1[%c0, %c0_0, %c0_1, %c0_2] : memref<1x4x24x8xbf16, #tpu.memory_space<vmem>>, vector<1x4x24x8xbf16>
    %1 = vector.shape_cast %0 : vector<1x4x24x8xbf16> to vector<4x24x8xbf16>
    %c0_3 = arith.constant 0 : index
    %c0_4 = arith.constant 0 : index
    %c0_5 = arith.constant 0 : index
    %c0_6 = arith.constant 0 : index
    %2 = vector.load %arg2[%c0_3, %c0_4, %c0_5, %c0_6] : memref<1x4x24x8xbf16, #tpu.memory_space<vmem>>, vector<1x4x24x8xbf16>
    %3 = vector.shape_cast %2 : vector<1x4x24x8xbf16> to vector<4x24x8xbf16>
    %c0_7 = arith.constant 0 : index
    %c0_8 = arith.constant 0 : index
    %c0_9 = arith.constant 0 : index
    %c0_10 = arith.constant 0 : index
    %4 = vector.load %arg3[%c0_7, %c0_8, %c0_9, %c0_10] : memref<1x4x24x8xbf16, #tpu.memory_space<vmem>>, vector<1x4x24x8xbf16>
    %5 = vector.shape_cast %4 : vector<1x4x24x8xbf16> to vector<4x24x8xbf16>
    "tpu.trace_start"() <{level = 10 : i32, message = "hqd,hkd->hqk"}> : () -> ()
    %cst = arith.constant dense<0.000000e+00> : vector<4x24x24xf32>
    %6 = tpu.matmul %1, %3, %cst {dimension_numbers = #tpu.dot_dimension_numbers<[2], [2], [1], [1], [0, 0, 0, 1, 1, 1], [0], [0]>} : vector<4x24x8xbf16>, vector<4x24x8xbf16>, vector<4x24x24xf32> -> vector<4x24x24xf32>
    "tpu.trace_stop"() : () -> ()
    %cst_11 = arith.constant 0.353553385 : f32
    %7 = vector.broadcast %cst_11 : f32 to vector<4x24x24xf32>
    %8 = arith.mulf %6, %7 : vector<4x24x24xf32>
    %9 = tpu.iota {dimensions = array<i32: 2>} : vector<4x24x24xi32>
    %c17_i32 = arith.constant 17 : i32
    %10 = vector.broadcast %c17_i32 : i32 to vector<4x24x24xi32>
    %11 = arith.cmpi slt, %9, %10 : vector<4x24x24xi32>
    %cst_12 = arith.constant -1.000000e+30 : f32
    %12 = vector.broadcast %cst_12 : f32 to vector<4x24x24xf32>
    %13 = arith.select %11, %8, %12 : vector<4x24x24xi1>, vector<4x24x24xf32>
    %cst_13 = arith.constant dense<0xFF800000> : vector<4x24xf32>
    %14 = vector.multi_reduction <maximumf>, %13, %cst_13 [2] : vector<4x24x24xf32> to vector<4x24xf32>
    %15 = vector.shape_cast %14 : vector<4x24xf32> to vector<4x24x1xf32>
    %16 = vector.broadcast %15 : vector<4x24x1xf32> to vector<4x24x24xf32>
    %17 = arith.subf %13, %16 : vector<4x24x24xf32>
    %18 = math.exp %17 : vector<4x24x24xf32>
    %cst_14 = arith.constant dense<0.000000e+00> : vector<4x24xf32>
    %19 = vector.multi_reduction <add>, %18, %cst_14 [2] : vector<4x24x24xf32> to vector<4x24xf32>
    %20 = vector.shape_cast %19 : vector<4x24xf32> to vector<4x24x1xf32>
    %21 = arith.truncf %18 : vector<4x24x24xf32> to vector<4x24x24xbf16>
    "tpu.trace_start"() <{level = 10 : i32, message = "hqk,hkd->hqd"}> : () -> ()
    %cst_15 = arith.constant dense<0.000000e+00> : vector<4x24x8xf32>
    %22 = tpu.matmul %21, %5, %cst_15 {dimension_numbers = #tpu.dot_dimension_numbers<[2], [1], [1], [2], [0, 0, 0, 1, 1, 2], [0], [0]>} : vector<4x24x24xbf16>, vector<4x24x8xbf16>, vector<4x24x8xf32> -> vector<4x24x8xf32>
    "tpu.trace_stop"() : () -> ()
    %23 = tpu.reciprocal %20 {approx = true} : vector<4x24x1xf32> -> vector<4x24x1xf32>
    %24 = vector.broadcast %23 : vector<4x24x1xf32> to vector<4x24x8xf32>
    %25 = arith.mulf %22, %24 : vector<4x24x8xf32>
    %26 = arith.truncf %25 : vector<4x24x8xf32> to vector<4x24x8xbf16>
    %c0_16 = arith.constant 0 : index
    %c0_17 = arith.constant 0 : index
    %c0_18 = arith.constant 0 : index
    %c0_19 = arith.constant 0 : index
    %27 = vector.load %arg4[%c0_16, %c0_17, %c0_18, %c0_19] : memref<1x4x24x8xbf16, #tpu.memory_space<vmem>>, vector<1x4x24x8xbf16>
    %28 = vector.shape_cast %27 : vector<1x4x24x8xbf16> to vector<4x24x8xbf16>
    %29 = vector.shape_cast %26 : vector<4x24x8xbf16> to vector<1x4x24x8xbf16>
    tpu.vector_store %arg4[%c0_16, %c0_17, %c0_18, %c0_19], %29 {strides = array<i32>} : memref<1x4x24x8xbf16, #tpu.memory_space<vmem>>, vector<1x4x24x8xbf16>,
    return
  }
  func.func @transform_0(%arg0: i32) -> (i32, i32, i32, i32) {
    %c0_i32 = arith.constant 0 : i32
    %c0_i32_0 = arith.constant 0 : i32
    %c0_i32_1 = arith.constant 0 : i32
    %c0_i32_2 = arith.constant 0 : i32
    return %arg0, %c0_i32, %c0_i32_0, %c0_i32_1 : i32, i32, i32, i32
  }
  func.func @transform_1(%arg0: i32) -> (i32, i32, i32, i32) {
    %c0_i32 = arith.constant 0 : i32
    %c0_i32_0 = arith.constant 0 : i32
    %c0_i32_1 = arith.constant 0 : i32
    %c0_i32_2 = arith.constant 0 : i32
    return %arg0, %c0_i32, %c0_i32_0, %c0_i32_1 : i32, i32, i32, i32
  }
  func.func @transform_2(%arg0: i32) -> (i32, i32, i32, i32) {
    %c0_i32 = arith.constant 0 : i32
    %c0_i32_0 = arith.constant 0 : i32
    %c0_i32_1 = arith.constant 0 : i32
    %c0_i32_2 = arith.constant 0 : i32
    return %arg0, %c0_i32, %c0_i32_0, %c0_i32_1 : i32, i32, i32, i32
  }
  func.func @transform_3(%arg0: i32) -> (i32, i32, i32, i32) {
    %c0_i32 = arith.constant 0 : i32
    %c0_i32_0 = arith.constant 0 : i32
    %c0_i32_1 = arith.constant 0 : i32
    %c0_i32_2 = arith.constant 0 : i32
    return %arg0, %c0_i32, %c0_i32_0, %c0_i32_1 : i32, i32, i32, i32
  }
}

module attributes {stable_mosaic.version = 11 : i64} {
  func.func @_linear_add_ln_kernel(%arg0: i32, %arg1: i32, %arg2: memref<48x32xbf16, #tpu.memory_space<vmem>>, %arg3: memref<32x32xbf16, #tpu.memory_space<vmem>>, %arg4: memref<1x32xf32, #tpu.memory_space<vmem>>, %arg5: memref<48x32xbf16, #tpu.memory_space<vmem>>, %arg6: memref<1x32xf32, #tpu.memory_space<vmem>>, %arg7: memref<1x32xf32, #tpu.memory_space<vmem>>, %arg8: memref<48x32xbf16, #tpu.memory_space<vmem>>, %arg9: memref<48x32xf32, #tpu.memory_space<vmem>>) attributes {dimension_semantics = [#tpu.dimension_semantics<parallel>, #tpu.dimension_semantics<arbitrary>], iteration_bounds = array<i64: 1, 1>, scalar_prefetch = 0 : i64, scratch_operands = 1 : i64, tpu.core_type = #tpu.core_type<tc>, window_params = [{transform_indices = @transform_0, window_bounds = array<i64: 48, 32>}, {transform_indices = @transform_1, window_bounds = array<i64: 32, 32>}, {pipeline_mode = #tpu.pipeline_mode<synchronous>, transform_indices = @transform_2, window_bounds = array<i64: 1, 32>}, {transform_indices = @transform_3, window_bounds = array<i64: 48, 32>}, {pipeline_mode = #tpu.pipeline_mode<synchronous>, transform_indices = @transform_4, window_bounds = array<i64: 1, 32>}, {pipeline_mode = #tpu.pipeline_mode<synchronous>, transform_indices = @transform_5, window_bounds = array<i64: 1, 32>}, {transform_indices = @transform_6, window_bounds = array<i64: 48, 32>}]} {
    %c0_i32 = arith.constant 0 : i32
    %0 = arith.cmpi eq, %arg1, %c0_i32 : i32
    %1 = arith.extui %0 : i1 to i32
    %c0_i32_0 = arith.constant 0 : i32
    %2 = arith.cmpi ne, %1, %c0_i32_0 : i32
    scf.if %2 {
      %cst_10 = arith.constant 0.000000e+00 : f32
      %12 = vector.broadcast %cst_10 : f32 to vector<48x32xf32>
      %c0_11 = arith.constant 0 : index
      %c0_12 = arith.constant 0 : index
      %13 = vector.load %arg9[%c0_11, %c0_12] : memref<48x32xf32, #tpu.memory_space<vmem>>, vector<48x32xf32>
      tpu.vector_store %arg9[%c0_11, %c0_12], %12 {strides = array<i32>} : memref<48x32xf32, #tpu.memory_space<vmem>>, vector<48x32xf32>,
    } else {
    }
    %c0 = arith.constant 0 : index
    %c0_1 = arith.constant 0 : index
    %3 = vector.load %arg9[%c0, %c0_1] : memref<48x32xf32, #tpu.memory_space<vmem>>, vector<48x32xf32>
    %c0_2 = arith.constant 0 : index
    %c0_3 = arith.constant 0 : index
    %4 = vector.load %arg2[%c0_2, %c0_3] : memref<48x32xbf16, #tpu.memory_space<vmem>>, vector<48x32xbf16>
    %c0_4 = arith.constant 0 : index
    %c0_5 = arith.constant 0 : index
    %5 = vector.load %arg3[%c0_4, %c0_5] : memref<32x32xbf16, #tpu.memory_space<vmem>>, vector<32x32xbf16>
    %cst = arith.constant dense<0.000000e+00> : vector<48x32xf32>
    %6 = tpu.matmul %4, %5, %cst {dimension_numbers = #tpu.dot_dimension_numbers<[1], [0], [0], [1], [0, 0, 1, 1], [], []>} : vector<48x32xbf16>, vector<32x32xbf16>, vector<48x32xf32> -> vector<48x32xf32>
    %7 = arith.addf %3, %6 : vector<48x32xf32>
    %c0_6 = arith.constant 0 : index
    %c0_7 = arith.constant 0 : index
    %8 = vector.load %arg9[%c0_6, %c0_7] : memref<48x32xf32, #tpu.memory_space<vmem>>, vector<48x32xf32>
    tpu.vector_store %arg9[%c0_6, %c0_7], %7 {strides = array<i32>} : memref<48x32xf32, #tpu.memory_space<vmem>>, vector<48x32xf32>,
    %c0_i32_8 = arith.constant 0 : i32
    %9 = arith.cmpi eq, %arg1, %c0_i32_8 : i32
    %10 = arith.extui %9 : i1 to i32
    %c0_i32_9 = arith.constant 0 : i32
    %11 = arith.cmpi ne, %10, %c0_i32_9 : i32
    scf.if %11 {
      %c0_10 = arith.constant 0 : index
      %c0_11 = arith.constant 0 : index
      %12 = vector.load %arg9[%c0_10, %c0_11] : memref<48x32xf32, #tpu.memory_space<vmem>>, vector<48x32xf32>
      %c0_12 = arith.constant 0 : index
      %c0_13 = arith.constant 0 : index
      %13 = vector.load %arg4[%c0_12, %c0_13] : memref<1x32xf32, #tpu.memory_space<vmem>>, vector<1x32xf32>
      %14 = vector.broadcast %13 : vector<1x32xf32> to vector<48x32xf32>
      %15 = arith.addf %12, %14 : vector<48x32xf32>
      %c0_14 = arith.constant 0 : index
      %c0_15 = arith.constant 0 : index
      %16 = vector.load %arg5[%c0_14, %c0_15] : memref<48x32xbf16, #tpu.memory_space<vmem>>, vector<48x32xbf16>
      %17 = arith.extf %16 : vector<48x32xbf16> to vector<48x32xf32>
      %18 = arith.addf %15, %17 : vector<48x32xf32>
      %cst_16 = arith.constant dense<0.000000e+00> : vector<48xf32>
      %19 = vector.multi_reduction <add>, %18, %cst_16 [1] : vector<48x32xf32> to vector<48xf32>
      %20 = vector.shape_cast %19 : vector<48xf32> to vector<48x1xf32>
      %cst_17 = arith.constant 3.200000e+01 : f32
      %21 = vector.broadcast %cst_17 : f32 to vector<48x1xf32>
      %22 = arith.divf %20, %21 : vector<48x1xf32>
      %23 = vector.broadcast %22 : vector<48x1xf32> to vector<48x32xf32>
      %24 = arith.subf %18, %23 : vector<48x32xf32>
      %25 = arith.mulf %24, %24 : vector<48x32xf32>
      %cst_18 = arith.constant dense<0.000000e+00> : vector<48xf32>
      %26 = vector.multi_reduction <add>, %25, %cst_18 [1] : vector<48x32xf32> to vector<48xf32>
      %27 = vector.shape_cast %26 : vector<48xf32> to vector<48x1xf32>
      %cst_19 = arith.constant 3.200000e+01 : f32
      %28 = vector.broadcast %cst_19 : f32 to vector<48x1xf32>
      %29 = arith.divf %27, %28 : vector<48x1xf32>
      %cst_20 = arith.constant 9.99999974E-6 : f32
      %30 = vector.broadcast %cst_20 : f32 to vector<48x1xf32>
      %31 = arith.addf %29, %30 : vector<48x1xf32>
      %32 = math.rsqrt %31 : vector<48x1xf32>
      %33 = vector.broadcast %32 : vector<48x1xf32> to vector<48x32xf32>
      %34 = arith.mulf %24, %33 : vector<48x32xf32>
      %c0_21 = arith.constant 0 : index
      %c0_22 = arith.constant 0 : index
      %35 = vector.load %arg6[%c0_21, %c0_22] : memref<1x32xf32, #tpu.memory_space<vmem>>, vector<1x32xf32>
      %36 = vector.broadcast %35 : vector<1x32xf32> to vector<48x32xf32>
      %37 = arith.mulf %34, %36 : vector<48x32xf32>
      %c0_23 = arith.constant 0 : index
      %c0_24 = arith.constant 0 : index
      %38 = vector.load %arg7[%c0_23, %c0_24] : memref<1x32xf32, #tpu.memory_space<vmem>>, vector<1x32xf32>
      %39 = vector.broadcast %38 : vector<1x32xf32> to vector<48x32xf32>
      %40 = arith.addf %37, %39 : vector<48x32xf32>
      %41 = arith.truncf %40 : vector<48x32xf32> to vector<48x32xbf16>
      %c0_25 = arith.constant 0 : index
      %c0_26 = arith.constant 0 : index
      %42 = vector.load %arg8[%c0_25, %c0_26] : memref<48x32xbf16, #tpu.memory_space<vmem>>, vector<48x32xbf16>
      tpu.vector_store %arg8[%c0_25, %c0_26], %41 {strides = array<i32>} : memref<48x32xbf16, #tpu.memory_space<vmem>>, vector<48x32xbf16>,
    } else {
    }
    return
  }
  func.func @transform_0(%arg0: i32, %arg1: i32) -> (i32, i32) {
    %c0_i32 = arith.constant 0 : i32
    return %arg0, %arg1 : i32, i32
  }
  func.func @transform_1(%arg0: i32, %arg1: i32) -> (i32, i32) {
    %c0_i32 = arith.constant 0 : i32
    %c0_i32_0 = arith.constant 0 : i32
    return %arg1, %c0_i32 : i32, i32
  }
  func.func @transform_2(%arg0: i32, %arg1: i32) -> (i32, i32) {
    %c0_i32 = arith.constant 0 : i32
    %c0_i32_0 = arith.constant 0 : i32
    %c0_i32_1 = arith.constant 0 : i32
    return %c0_i32, %c0_i32_0 : i32, i32
  }
  func.func @transform_3(%arg0: i32, %arg1: i32) -> (i32, i32) {
    %c0_i32 = arith.constant 0 : i32
    %c0_i32_0 = arith.constant 0 : i32
    return %arg0, %c0_i32 : i32, i32
  }
  func.func @transform_4(%arg0: i32, %arg1: i32) -> (i32, i32) {
    %c0_i32 = arith.constant 0 : i32
    %c0_i32_0 = arith.constant 0 : i32
    %c0_i32_1 = arith.constant 0 : i32
    return %c0_i32, %c0_i32_0 : i32, i32
  }
  func.func @transform_5(%arg0: i32, %arg1: i32) -> (i32, i32) {
    %c0_i32 = arith.constant 0 : i32
    %c0_i32_0 = arith.constant 0 : i32
    %c0_i32_1 = arith.constant 0 : i32
    return %c0_i32, %c0_i32_0 : i32, i32
  }
  func.func @transform_6(%arg0: i32, %arg1: i32) -> (i32, i32) {
    %c0_i32 = arith.constant 0 : i32
    %c0_i32_0 = arith.constant 0 : i32
    return %arg0, %c0_i32 : i32, i32
  }
}

module attributes {stable_mosaic.version = 11 : i64} {
  func.func @_linear_kernel(%arg0: i32, %arg1: i32, %arg2: i32, %arg3: memref<48x32xbf16, #tpu.memory_space<vmem>>, %arg4: memref<32x512xbf16, #tpu.memory_space<vmem>>, %arg5: memref<1x512xf32, #tpu.memory_space<vmem>>, %arg6: memref<48x512xbf16, #tpu.memory_space<vmem>>, %arg7: memref<48x512xf32, #tpu.memory_space<vmem>>) attributes {dimension_semantics = [#tpu.dimension_semantics<parallel>, #tpu.dimension_semantics<parallel>, #tpu.dimension_semantics<arbitrary>], iteration_bounds = array<i64: 1, 2, 1>, scalar_prefetch = 0 : i64, scratch_operands = 1 : i64, tpu.core_type = #tpu.core_type<tc>, window_params = [{transform_indices = @transform_0, window_bounds = array<i64: 48, 32>}, {transform_indices = @transform_1, window_bounds = array<i64: 32, 512>}, {transform_indices = @transform_2, window_bounds = array<i64: 1, 512>}, {transform_indices = @transform_3, window_bounds = array<i64: 48, 512>}]} {
    %c0_i32 = arith.constant 0 : i32
    %0 = arith.cmpi eq, %arg2, %c0_i32 : i32
    %1 = arith.extui %0 : i1 to i32
    %c0_i32_0 = arith.constant 0 : i32
    %2 = arith.cmpi ne, %1, %c0_i32_0 : i32
    scf.if %2 {
      %cst_10 = arith.constant 0.000000e+00 : f32
      %12 = vector.broadcast %cst_10 : f32 to vector<48x512xf32>
      %c0_11 = arith.constant 0 : index
      %c0_12 = arith.constant 0 : index
      %13 = vector.load %arg7[%c0_11, %c0_12] : memref<48x512xf32, #tpu.memory_space<vmem>>, vector<48x512xf32>
      tpu.vector_store %arg7[%c0_11, %c0_12], %12 {strides = array<i32>} : memref<48x512xf32, #tpu.memory_space<vmem>>, vector<48x512xf32>,
    } else {
    }
    %c0 = arith.constant 0 : index
    %c0_1 = arith.constant 0 : index
    %3 = vector.load %arg7[%c0, %c0_1] : memref<48x512xf32, #tpu.memory_space<vmem>>, vector<48x512xf32>
    %c0_2 = arith.constant 0 : index
    %c0_3 = arith.constant 0 : index
    %4 = vector.load %arg3[%c0_2, %c0_3] : memref<48x32xbf16, #tpu.memory_space<vmem>>, vector<48x32xbf16>
    %c0_4 = arith.constant 0 : index
    %c0_5 = arith.constant 0 : index
    %5 = vector.load %arg4[%c0_4, %c0_5] : memref<32x512xbf16, #tpu.memory_space<vmem>>, vector<32x512xbf16>
    %cst = arith.constant dense<0.000000e+00> : vector<48x512xf32>
    %6 = tpu.matmul %4, %5, %cst {dimension_numbers = #tpu.dot_dimension_numbers<[1], [0], [0], [1], [0, 0, 1, 1], [], []>} : vector<48x32xbf16>, vector<32x512xbf16>, vector<48x512xf32> -> vector<48x512xf32>
    %7 = arith.addf %3, %6 : vector<48x512xf32>
    %c0_6 = arith.constant 0 : index
    %c0_7 = arith.constant 0 : index
    %8 = vector.load %arg7[%c0_6, %c0_7] : memref<48x512xf32, #tpu.memory_space<vmem>>, vector<48x512xf32>
    tpu.vector_store %arg7[%c0_6, %c0_7], %7 {strides = array<i32>} : memref<48x512xf32, #tpu.memory_space<vmem>>, vector<48x512xf32>,
    %c0_i32_8 = arith.constant 0 : i32
    %9 = arith.cmpi eq, %arg2, %c0_i32_8 : i32
    %10 = arith.extui %9 : i1 to i32
    %c0_i32_9 = arith.constant 0 : i32
    %11 = arith.cmpi ne, %10, %c0_i32_9 : i32
    scf.if %11 {
      %c0_10 = arith.constant 0 : index
      %c0_11 = arith.constant 0 : index
      %12 = vector.load %arg7[%c0_10, %c0_11] : memref<48x512xf32, #tpu.memory_space<vmem>>, vector<48x512xf32>
      %c0_12 = arith.constant 0 : index
      %c0_13 = arith.constant 0 : index
      %13 = vector.load %arg5[%c0_12, %c0_13] : memref<1x512xf32, #tpu.memory_space<vmem>>, vector<1x512xf32>
      %14 = vector.broadcast %13 : vector<1x512xf32> to vector<48x512xf32>
      %15 = arith.addf %12, %14 : vector<48x512xf32>
      %cst_14 = arith.constant 0.000000e+00 : f32
      %16 = vector.broadcast %cst_14 : f32 to vector<48x512xf32>
      %17 = arith.maximumf %15, %16 : vector<48x512xf32>
      %18 = arith.truncf %17 : vector<48x512xf32> to vector<48x512xbf16>
      %c0_15 = arith.constant 0 : index
      %c0_16 = arith.constant 0 : index
      %19 = vector.load %arg6[%c0_15, %c0_16] : memref<48x512xbf16, #tpu.memory_space<vmem>>, vector<48x512xbf16>
      tpu.vector_store %arg6[%c0_15, %c0_16], %18 {strides = array<i32>} : memref<48x512xbf16, #tpu.memory_space<vmem>>, vector<48x512xbf16>,
    } else {
    }
    return
  }
  func.func @transform_0(%arg0: i32, %arg1: i32, %arg2: i32) -> (i32, i32) {
    %c0_i32 = arith.constant 0 : i32
    return %arg0, %arg2 : i32, i32
  }
  func.func @transform_1(%arg0: i32, %arg1: i32, %arg2: i32) -> (i32, i32) {
    %c0_i32 = arith.constant 0 : i32
    return %arg2, %arg1 : i32, i32
  }
  func.func @transform_2(%arg0: i32, %arg1: i32, %arg2: i32) -> (i32, i32) {
    %c0_i32 = arith.constant 0 : i32
    %c0_i32_0 = arith.constant 0 : i32
    return %c0_i32, %arg1 : i32, i32
  }
  func.func @transform_3(%arg0: i32, %arg1: i32, %arg2: i32) -> (i32, i32) {
    %c0_i32 = arith.constant 0 : i32
    return %arg0, %arg1 : i32, i32
  }
}

module attributes {stable_mosaic.version = 11 : i64} {
  func.func @_linear_add_ln_kernel(%arg0: i32, %arg1: i32, %arg2: memref<48x512xbf16, #tpu.memory_space<vmem>>, %arg3: memref<512x32xbf16, #tpu.memory_space<vmem>>, %arg4: memref<1x32xf32, #tpu.memory_space<vmem>>, %arg5: memref<48x32xbf16, #tpu.memory_space<vmem>>, %arg6: memref<1x32xf32, #tpu.memory_space<vmem>>, %arg7: memref<1x32xf32, #tpu.memory_space<vmem>>, %arg8: memref<48x32xbf16, #tpu.memory_space<vmem>>, %arg9: memref<48x32xf32, #tpu.memory_space<vmem>>) attributes {dimension_semantics = [#tpu.dimension_semantics<parallel>, #tpu.dimension_semantics<arbitrary>], iteration_bounds = array<i64: 1, 2>, scalar_prefetch = 0 : i64, scratch_operands = 1 : i64, tpu.core_type = #tpu.core_type<tc>, window_params = [{transform_indices = @transform_0, window_bounds = array<i64: 48, 512>}, {transform_indices = @transform_1, window_bounds = array<i64: 512, 32>}, {pipeline_mode = #tpu.pipeline_mode<synchronous>, transform_indices = @transform_2, window_bounds = array<i64: 1, 32>}, {transform_indices = @transform_3, window_bounds = array<i64: 48, 32>}, {pipeline_mode = #tpu.pipeline_mode<synchronous>, transform_indices = @transform_4, window_bounds = array<i64: 1, 32>}, {pipeline_mode = #tpu.pipeline_mode<synchronous>, transform_indices = @transform_5, window_bounds = array<i64: 1, 32>}, {transform_indices = @transform_6, window_bounds = array<i64: 48, 32>}]} {
    %c0_i32 = arith.constant 0 : i32
    %0 = arith.cmpi eq, %arg1, %c0_i32 : i32
    %1 = arith.extui %0 : i1 to i32
    %c0_i32_0 = arith.constant 0 : i32
    %2 = arith.cmpi ne, %1, %c0_i32_0 : i32
    scf.if %2 {
      %cst_9 = arith.constant 0.000000e+00 : f32
      %12 = vector.broadcast %cst_9 : f32 to vector<48x32xf32>
      %c0_10 = arith.constant 0 : index
      %c0_11 = arith.constant 0 : index
      %13 = vector.load %arg9[%c0_10, %c0_11] : memref<48x32xf32, #tpu.memory_space<vmem>>, vector<48x32xf32>
      tpu.vector_store %arg9[%c0_10, %c0_11], %12 {strides = array<i32>} : memref<48x32xf32, #tpu.memory_space<vmem>>, vector<48x32xf32>,
    } else {
    }
    %c0 = arith.constant 0 : index
    %c0_1 = arith.constant 0 : index
    %3 = vector.load %arg9[%c0, %c0_1] : memref<48x32xf32, #tpu.memory_space<vmem>>, vector<48x32xf32>
    %c0_2 = arith.constant 0 : index
    %c0_3 = arith.constant 0 : index
    %4 = vector.load %arg2[%c0_2, %c0_3] : memref<48x512xbf16, #tpu.memory_space<vmem>>, vector<48x512xbf16>
    %c0_4 = arith.constant 0 : index
    %c0_5 = arith.constant 0 : index
    %5 = vector.load %arg3[%c0_4, %c0_5] : memref<512x32xbf16, #tpu.memory_space<vmem>>, vector<512x32xbf16>
    %cst = arith.constant dense<0.000000e+00> : vector<48x32xf32>
    %6 = tpu.matmul %4, %5, %cst {dimension_numbers = #tpu.dot_dimension_numbers<[1], [0], [0], [1], [0, 0, 1, 1], [], []>} : vector<48x512xbf16>, vector<512x32xbf16>, vector<48x32xf32> -> vector<48x32xf32>
    %7 = arith.addf %3, %6 : vector<48x32xf32>
    %c0_6 = arith.constant 0 : index
    %c0_7 = arith.constant 0 : index
    %8 = vector.load %arg9[%c0_6, %c0_7] : memref<48x32xf32, #tpu.memory_space<vmem>>, vector<48x32xf32>
    tpu.vector_store %arg9[%c0_6, %c0_7], %7 {strides = array<i32>} : memref<48x32xf32, #tpu.memory_space<vmem>>, vector<48x32xf32>,
    %c1_i32 = arith.constant 1 : i32
    %9 = arith.cmpi eq, %arg1, %c1_i32 : i32
    %10 = arith.extui %9 : i1 to i32
    %c0_i32_8 = arith.constant 0 : i32
    %11 = arith.cmpi ne, %10, %c0_i32_8 : i32
    scf.if %11 {
      %c0_9 = arith.constant 0 : index
      %c0_10 = arith.constant 0 : index
      %12 = vector.load %arg9[%c0_9, %c0_10] : memref<48x32xf32, #tpu.memory_space<vmem>>, vector<48x32xf32>
      %c0_11 = arith.constant 0 : index
      %c0_12 = arith.constant 0 : index
      %13 = vector.load %arg4[%c0_11, %c0_12] : memref<1x32xf32, #tpu.memory_space<vmem>>, vector<1x32xf32>
      %14 = vector.broadcast %13 : vector<1x32xf32> to vector<48x32xf32>
      %15 = arith.addf %12, %14 : vector<48x32xf32>
      %c0_13 = arith.constant 0 : index
      %c0_14 = arith.constant 0 : index
      %16 = vector.load %arg5[%c0_13, %c0_14] : memref<48x32xbf16, #tpu.memory_space<vmem>>, vector<48x32xbf16>
      %17 = arith.extf %16 : vector<48x32xbf16> to vector<48x32xf32>
      %18 = arith.addf %15, %17 : vector<48x32xf32>
      %cst_15 = arith.constant dense<0.000000e+00> : vector<48xf32>
      %19 = vector.multi_reduction <add>, %18, %cst_15 [1] : vector<48x32xf32> to vector<48xf32>
      %20 = vector.shape_cast %19 : vector<48xf32> to vector<48x1xf32>
      %cst_16 = arith.constant 3.200000e+01 : f32
      %21 = vector.broadcast %cst_16 : f32 to vector<48x1xf32>
      %22 = arith.divf %20, %21 : vector<48x1xf32>
      %23 = vector.broadcast %22 : vector<48x1xf32> to vector<48x32xf32>
      %24 = arith.subf %18, %23 : vector<48x32xf32>
      %25 = arith.mulf %24, %24 : vector<48x32xf32>
      %cst_17 = arith.constant dense<0.000000e+00> : vector<48xf32>
      %26 = vector.multi_reduction <add>, %25, %cst_17 [1] : vector<48x32xf32> to vector<48xf32>
      %27 = vector.shape_cast %26 : vector<48xf32> to vector<48x1xf32>
      %cst_18 = arith.constant 3.200000e+01 : f32
      %28 = vector.broadcast %cst_18 : f32 to vector<48x1xf32>
      %29 = arith.divf %27, %28 : vector<48x1xf32>
      %cst_19 = arith.constant 9.99999974E-6 : f32
      %30 = vector.broadcast %cst_19 : f32 to vector<48x1xf32>
      %31 = arith.addf %29, %30 : vector<48x1xf32>
      %32 = math.rsqrt %31 : vector<48x1xf32>
      %33 = vector.broadcast %32 : vector<48x1xf32> to vector<48x32xf32>
      %34 = arith.mulf %24, %33 : vector<48x32xf32>
      %c0_20 = arith.constant 0 : index
      %c0_21 = arith.constant 0 : index
      %35 = vector.load %arg6[%c0_20, %c0_21] : memref<1x32xf32, #tpu.memory_space<vmem>>, vector<1x32xf32>
      %36 = vector.broadcast %35 : vector<1x32xf32> to vector<48x32xf32>
      %37 = arith.mulf %34, %36 : vector<48x32xf32>
      %c0_22 = arith.constant 0 : index
      %c0_23 = arith.constant 0 : index
      %38 = vector.load %arg7[%c0_22, %c0_23] : memref<1x32xf32, #tpu.memory_space<vmem>>, vector<1x32xf32>
      %39 = vector.broadcast %38 : vector<1x32xf32> to vector<48x32xf32>
      %40 = arith.addf %37, %39 : vector<48x32xf32>
      %41 = arith.truncf %40 : vector<48x32xf32> to vector<48x32xbf16>
      %c0_24 = arith.constant 0 : index
      %c0_25 = arith.constant 0 : index
      %42 = vector.load %arg8[%c0_24, %c0_25] : memref<48x32xbf16, #tpu.memory_space<vmem>>, vector<48x32xbf16>
      tpu.vector_store %arg8[%c0_24, %c0_25], %41 {strides = array<i32>} : memref<48x32xbf16, #tpu.memory_space<vmem>>, vector<48x32xbf16>,
    } else {
    }
    return
  }
  func.func @transform_0(%arg0: i32, %arg1: i32) -> (i32, i32) {
    %c0_i32 = arith.constant 0 : i32
    return %arg0, %arg1 : i32, i32
  }
  func.func @transform_1(%arg0: i32, %arg1: i32) -> (i32, i32) {
    %c0_i32 = arith.constant 0 : i32
    %c0_i32_0 = arith.constant 0 : i32
    return %arg1, %c0_i32 : i32, i32
  }
  func.func @transform_2(%arg0: i32, %arg1: i32) -> (i32, i32) {
    %c0_i32 = arith.constant 0 : i32
    %c0_i32_0 = arith.constant 0 : i32
    %c0_i32_1 = arith.constant 0 : i32
    return %c0_i32, %c0_i32_0 : i32, i32
  }
  func.func @transform_3(%arg0: i32, %arg1: i32) -> (i32, i32) {
    %c0_i32 = arith.constant 0 : i32
    %c0_i32_0 = arith.constant 0 : i32
    return %arg0, %c0_i32 : i32, i32
  }
  func.func @transform_4(%arg0: i32, %arg1: i32) -> (i32, i32) {
    %c0_i32 = arith.constant 0 : i32
    %c0_i32_0 = arith.constant 0 : i32
    %c0_i32_1 = arith.constant 0 : i32
    return %c0_i32, %c0_i32_0 : i32, i32
  }
  func.func @transform_5(%arg0: i32, %arg1: i32) -> (i32, i32) {
    %c0_i32 = arith.constant 0 : i32
    %c0_i32_0 = arith.constant 0 : i32
    %c0_i32_1 = arith.constant 0 : i32
    return %c0_i32, %c0_i32_0 : i32, i32
  }
  func.func @transform_6(%arg0: i32, %arg1: i32) -> (i32, i32) {
    %c0_i32 = arith.constant 0 : i32
    %c0_i32_0 = arith.constant 0 : i32
    return %arg0, %c0_i32 : i32, i32
  }
}

module attributes {stable_mosaic.version = 11 : i64} {
  func.func @_ln_linear_kernel(%arg0: i32, %arg1: i32, %arg2: memref<8x32xbf16, #tpu.memory_space<vmem>>, %arg3: memref<1x32xf32, #tpu.memory_space<vmem>>, %arg4: memref<1x32xf32, #tpu.memory_space<vmem>>, %arg5: memref<32x512xbf16, #tpu.memory_space<vmem>>, %arg6: memref<1x512xf32, #tpu.memory_space<vmem>>, %arg7: memref<8x512xbf16, #tpu.memory_space<vmem>>) attributes {dimension_semantics = [#tpu.dimension_semantics<parallel>, #tpu.dimension_semantics<parallel>], iteration_bounds = array<i64: 1, 2>, scalar_prefetch = 0 : i64, scratch_operands = 0 : i64, tpu.core_type = #tpu.core_type<tc>, window_params = [{transform_indices = @transform_0, window_bounds = array<i64: 8, 32>}, {pipeline_mode = #tpu.pipeline_mode<synchronous>, transform_indices = @transform_1, window_bounds = array<i64: 1, 32>}, {pipeline_mode = #tpu.pipeline_mode<synchronous>, transform_indices = @transform_2, window_bounds = array<i64: 1, 32>}, {transform_indices = @transform_3, window_bounds = array<i64: 32, 512>}, {transform_indices = @transform_4, window_bounds = array<i64: 1, 512>}, {transform_indices = @transform_5, window_bounds = array<i64: 8, 512>}]} {
    %c0 = arith.constant 0 : index
    %c0_0 = arith.constant 0 : index
    %0 = vector.load %arg2[%c0, %c0_0] : memref<8x32xbf16, #tpu.memory_space<vmem>>, vector<8x32xbf16>
    %1 = arith.extf %0 : vector<8x32xbf16> to vector<8x32xf32>
    %cst = arith.constant dense<0.000000e+00> : vector<8xf32>
    %2 = vector.multi_reduction <add>, %1, %cst [1] : vector<8x32xf32> to vector<8xf32>
    %3 = vector.shape_cast %2 : vector<8xf32> to vector<8x1xf32>
    %cst_1 = arith.constant 3.200000e+01 : f32
    %4 = vector.broadcast %cst_1 : f32 to vector<8x1xf32>
    %5 = arith.divf %3, %4 : vector<8x1xf32>
    %6 = vector.broadcast %5 : vector<8x1xf32> to vector<8x32xf32>
    %7 = arith.subf %1, %6 : vector<8x32xf32>
    %8 = arith.mulf %7, %7 : vector<8x32xf32>
    %cst_2 = arith.constant dense<0.000000e+00> : vector<8xf32>
    %9 = vector.multi_reduction <add>, %8, %cst_2 [1] : vector<8x32xf32> to vector<8xf32>
    %10 = vector.shape_cast %9 : vector<8xf32> to vector<8x1xf32>
    %cst_3 = arith.constant 3.200000e+01 : f32
    %11 = vector.broadcast %cst_3 : f32 to vector<8x1xf32>
    %12 = arith.divf %10, %11 : vector<8x1xf32>
    %cst_4 = arith.constant 9.99999974E-6 : f32
    %13 = vector.broadcast %cst_4 : f32 to vector<8x1xf32>
    %14 = arith.addf %12, %13 : vector<8x1xf32>
    %15 = math.rsqrt %14 : vector<8x1xf32>
    %16 = vector.broadcast %15 : vector<8x1xf32> to vector<8x32xf32>
    %17 = arith.mulf %7, %16 : vector<8x32xf32>
    %c0_5 = arith.constant 0 : index
    %c0_6 = arith.constant 0 : index
    %18 = vector.load %arg3[%c0_5, %c0_6] : memref<1x32xf32, #tpu.memory_space<vmem>>, vector<1x32xf32>
    %19 = vector.broadcast %18 : vector<1x32xf32> to vector<8x32xf32>
    %20 = arith.mulf %17, %19 : vector<8x32xf32>
    %c0_7 = arith.constant 0 : index
    %c0_8 = arith.constant 0 : index
    %21 = vector.load %arg4[%c0_7, %c0_8] : memref<1x32xf32, #tpu.memory_space<vmem>>, vector<1x32xf32>
    %22 = vector.broadcast %21 : vector<1x32xf32> to vector<8x32xf32>
    %23 = arith.addf %20, %22 : vector<8x32xf32>
    %24 = arith.truncf %23 : vector<8x32xf32> to vector<8x32xbf16>
    %c0_9 = arith.constant 0 : index
    %c0_10 = arith.constant 0 : index
    %25 = vector.load %arg5[%c0_9, %c0_10] : memref<32x512xbf16, #tpu.memory_space<vmem>>, vector<32x512xbf16>
    %cst_11 = arith.constant dense<0.000000e+00> : vector<8x512xf32>
    %26 = tpu.matmul %24, %25, %cst_11 {dimension_numbers = #tpu.dot_dimension_numbers<[1], [0], [0], [1], [0, 0, 1, 1], [], []>} : vector<8x32xbf16>, vector<32x512xbf16>, vector<8x512xf32> -> vector<8x512xf32>
    %c0_12 = arith.constant 0 : index
    %c0_13 = arith.constant 0 : index
    %27 = vector.load %arg6[%c0_12, %c0_13] : memref<1x512xf32, #tpu.memory_space<vmem>>, vector<1x512xf32>
    %28 = vector.broadcast %27 : vector<1x512xf32> to vector<8x512xf32>
    %29 = arith.addf %26, %28 : vector<8x512xf32>
    %cst_14 = arith.constant 5.000000e-01 : f32
    %30 = vector.broadcast %cst_14 : f32 to vector<8x512xf32>
    %31 = arith.mulf %30, %29 : vector<8x512xf32>
    %cst_15 = arith.constant 0.707106769 : f32
    %32 = vector.broadcast %cst_15 : f32 to vector<8x512xf32>
    %33 = arith.mulf %29, %32 : vector<8x512xf32>
    %34 = math.erf %33 : vector<8x512xf32>
    %cst_16 = arith.constant 1.000000e+00 : f32
    %35 = vector.broadcast %cst_16 : f32 to vector<8x512xf32>
    %36 = arith.addf %35, %34 : vector<8x512xf32>
    %37 = arith.mulf %31, %36 : vector<8x512xf32>
    %38 = arith.truncf %37 : vector<8x512xf32> to vector<8x512xbf16>
    %c0_17 = arith.constant 0 : index
    %c0_18 = arith.constant 0 : index
    %39 = vector.load %arg7[%c0_17, %c0_18] : memref<8x512xbf16, #tpu.memory_space<vmem>>, vector<8x512xbf16>
    tpu.vector_store %arg7[%c0_17, %c0_18], %38 {strides = array<i32>} : memref<8x512xbf16, #tpu.memory_space<vmem>>, vector<8x512xbf16>,
    return
  }
  func.func @transform_0(%arg0: i32, %arg1: i32) -> (i32, i32) {
    %c0_i32 = arith.constant 0 : i32
    %c0_i32_0 = arith.constant 0 : i32
    return %arg0, %c0_i32 : i32, i32
  }
  func.func @transform_1(%arg0: i32, %arg1: i32) -> (i32, i32) {
    %c0_i32 = arith.constant 0 : i32
    %c0_i32_0 = arith.constant 0 : i32
    %c0_i32_1 = arith.constant 0 : i32
    return %c0_i32, %c0_i32_0 : i32, i32
  }
  func.func @transform_2(%arg0: i32, %arg1: i32) -> (i32, i32) {
    %c0_i32 = arith.constant 0 : i32
    %c0_i32_0 = arith.constant 0 : i32
    %c0_i32_1 = arith.constant 0 : i32
    return %c0_i32, %c0_i32_0 : i32, i32
  }
  func.func @transform_3(%arg0: i32, %arg1: i32) -> (i32, i32) {
    %c0_i32 = arith.constant 0 : i32
    %c0_i32_0 = arith.constant 0 : i32
    return %c0_i32, %arg1 : i32, i32
  }
  func.func @transform_4(%arg0: i32, %arg1: i32) -> (i32, i32) {
    %c0_i32 = arith.constant 0 : i32
    %c0_i32_0 = arith.constant 0 : i32
    return %c0_i32, %arg1 : i32, i32
  }
  func.func @transform_5(%arg0: i32, %arg1: i32) -> (i32, i32) {
    %c0_i32 = arith.constant 0 : i32
    return %arg0, %arg1 : i32, i32
  }
}

module attributes {stable_mosaic.version = 11 : i64} {
  func.func @_linear_kernel(%arg0: i32, %arg1: i32, %arg2: i32, %arg3: memref<8x512xbf16, #tpu.memory_space<vmem>>, %arg4: memref<512x128xbf16, #tpu.memory_space<vmem>>, %arg5: memref<1x128xf32, #tpu.memory_space<vmem>>, %arg6: memref<8x128xf32, #tpu.memory_space<vmem>>, %arg7: memref<8x128xf32, #tpu.memory_space<vmem>>) attributes {dimension_semantics = [#tpu.dimension_semantics<parallel>, #tpu.dimension_semantics<parallel>, #tpu.dimension_semantics<arbitrary>], iteration_bounds = array<i64: 1, 1, 2>, scalar_prefetch = 0 : i64, scratch_operands = 1 : i64, tpu.core_type = #tpu.core_type<tc>, window_params = [{transform_indices = @transform_0, window_bounds = array<i64: 8, 512>}, {transform_indices = @transform_1, window_bounds = array<i64: 512, 128>}, {transform_indices = @transform_2, window_bounds = array<i64: 1, 128>}, {transform_indices = @transform_3, window_bounds = array<i64: 8, 128>}]} {
    %c0_i32 = arith.constant 0 : i32
    %0 = arith.cmpi eq, %arg2, %c0_i32 : i32
    %1 = arith.extui %0 : i1 to i32
    %c0_i32_0 = arith.constant 0 : i32
    %2 = arith.cmpi ne, %1, %c0_i32_0 : i32
    scf.if %2 {
      %cst_9 = arith.constant 0.000000e+00 : f32
      %12 = vector.broadcast %cst_9 : f32 to vector<8x128xf32>
      %c0_10 = arith.constant 0 : index
      %c0_11 = arith.constant 0 : index
      %13 = vector.load %arg7[%c0_10, %c0_11] : memref<8x128xf32, #tpu.memory_space<vmem>>, vector<8x128xf32>
      tpu.vector_store %arg7[%c0_10, %c0_11], %12 {strides = array<i32>} : memref<8x128xf32, #tpu.memory_space<vmem>>, vector<8x128xf32>,
    } else {
    }
    %c0 = arith.constant 0 : index
    %c0_1 = arith.constant 0 : index
    %3 = vector.load %arg7[%c0, %c0_1] : memref<8x128xf32, #tpu.memory_space<vmem>>, vector<8x128xf32>
    %c0_2 = arith.constant 0 : index
    %c0_3 = arith.constant 0 : index
    %4 = vector.load %arg3[%c0_2, %c0_3] : memref<8x512xbf16, #tpu.memory_space<vmem>>, vector<8x512xbf16>
    %c0_4 = arith.constant 0 : index
    %c0_5 = arith.constant 0 : index
    %5 = vector.load %arg4[%c0_4, %c0_5] : memref<512x128xbf16, #tpu.memory_space<vmem>>, vector<512x128xbf16>
    %cst = arith.constant dense<0.000000e+00> : vector<8x128xf32>
    %6 = tpu.matmul %4, %5, %cst {dimension_numbers = #tpu.dot_dimension_numbers<[1], [0], [0], [1], [0, 0, 1, 1], [], []>} : vector<8x512xbf16>, vector<512x128xbf16>, vector<8x128xf32> -> vector<8x128xf32>
    %7 = arith.addf %3, %6 : vector<8x128xf32>
    %c0_6 = arith.constant 0 : index
    %c0_7 = arith.constant 0 : index
    %8 = vector.load %arg7[%c0_6, %c0_7] : memref<8x128xf32, #tpu.memory_space<vmem>>, vector<8x128xf32>
    tpu.vector_store %arg7[%c0_6, %c0_7], %7 {strides = array<i32>} : memref<8x128xf32, #tpu.memory_space<vmem>>, vector<8x128xf32>,
    %c1_i32 = arith.constant 1 : i32
    %9 = arith.cmpi eq, %arg2, %c1_i32 : i32
    %10 = arith.extui %9 : i1 to i32
    %c0_i32_8 = arith.constant 0 : i32
    %11 = arith.cmpi ne, %10, %c0_i32_8 : i32
    scf.if %11 {
      %c0_9 = arith.constant 0 : index
      %c0_10 = arith.constant 0 : index
      %12 = vector.load %arg7[%c0_9, %c0_10] : memref<8x128xf32, #tpu.memory_space<vmem>>, vector<8x128xf32>
      %c0_11 = arith.constant 0 : index
      %c0_12 = arith.constant 0 : index
      %13 = vector.load %arg5[%c0_11, %c0_12] : memref<1x128xf32, #tpu.memory_space<vmem>>, vector<1x128xf32>
      %14 = vector.broadcast %13 : vector<1x128xf32> to vector<8x128xf32>
      %15 = arith.addf %12, %14 : vector<8x128xf32>
      %c0_13 = arith.constant 0 : index
      %c0_14 = arith.constant 0 : index
      %16 = vector.load %arg6[%c0_13, %c0_14] : memref<8x128xf32, #tpu.memory_space<vmem>>, vector<8x128xf32>
      tpu.vector_store %arg6[%c0_13, %c0_14], %15 {strides = array<i32>} : memref<8x128xf32, #tpu.memory_space<vmem>>, vector<8x128xf32>,
    } else {
    }
    return
  }
  func.func @transform_0(%arg0: i32, %arg1: i32, %arg2: i32) -> (i32, i32) {
    %c0_i32 = arith.constant 0 : i32
    return %arg0, %arg2 : i32, i32
  }
  func.func @transform_1(%arg0: i32, %arg1: i32, %arg2: i32) -> (i32, i32) {
    %c0_i32 = arith.constant 0 : i32
    return %arg2, %arg1 : i32, i32
  }
  func.func @transform_2(%arg0: i32, %arg1: i32, %arg2: i32) -> (i32, i32) {
    %c0_i32 = arith.constant 0 : i32
    %c0_i32_0 = arith.constant 0 : i32
    return %c0_i32, %arg1 : i32, i32
  }
  func.func @transform_3(%arg0: i32, %arg1: i32, %arg2: i32) -> (i32, i32) {
    %c0_i32 = arith.constant 0 : i32
    return %arg0, %arg1 : i32, i32
  }
}

</mosaic_0001>

<bundles_post_ra>
// kernel: vit_forward.14
= control target key start
LH: loop header
LB: loop body
LE: loop exit
PB: predicated region body
PF: predicated region fallthrough
CT: control target
= control target key end

     0   :  { %vm19_vm0 = vcmask 785408   ;;  %v259_v0 = vmov 0.0   ;;  %vm260_vm1 = vmmov 0   ;;  %vm69_vm2 = vcmask 261120   ;;  %s338_s1 = inlined_call_operand.vmem [shape: bf16[32,96], index: 1, kind: input, shape index: {}]   ;;  %s339_s0 = inlined_call_operand.vmem [shape: bf16[48,32], index: 0, kind: input, shape index: {}]   ;;  %s340_s2 = inlined_call_operand.vmem [shape: f32[1,96], index: 2, kind: input, shape index: {}]   ;;  %s341_s3 = inlined_call_operand.vmem [shape: bf16[48,96], index: 3, kind: output, shape index: {}]  }
   0x1   :  { %248 = vmatprep.subr.bf16.mxu1 %v259_v0  ;;  %v254_v1 = vld [vmem:[%s338_s1 + $0x8] sm:$0xff]   ;;  %232 = vmatprep.subr.bf16.mxu0 %v259_v0  ;;  %22 = vst.msk [vmem:[#allocation2 + $0x10] sm:$0xff] %vm19_vm0, %v259_v0  ;;  %20 = vst.msk [vmem:[#allocation2] sm:$0xff] %vm19_vm0, %v259_v0  ;;  %v255_v2 = vld [vmem:[%s338_s1] sm:$0xff]   ;;  %vm195_vm3 = vcmask 781312  }
   0x2   :  { %21 = vst.msk [vmem:[#allocation2 + $0x8] sm:$0xff] %vm19_vm0, %v259_v0  ;;  %23 = vst.msk [vmem:[#allocation2 + $0x18] sm:$0xff] %vm19_vm0, %v259_v0  ;;  %240 = vmatprep.mubr.msk.bf16.mxu1 %vm260_vm1, %v259_v0  ;;  %236 = vmatprep.mubr.msk.bf16.mxu0 %vm260_vm1, %v259_v0  ;;  %v256_v3 = vld [vmem:[%s339_s0 + $0x8] sm:$0xff]   ;;  %v257_v4 = vld [vmem:[%s339_s0] sm:$0xff]  }
   0x3   :  { %24 = vst.msk [vmem:[#allocation2 + $0x20] sm:$0xff] %vm19_vm0, %v259_v0  ;;  %25 = vst.msk [vmem:[#allocation2 + $0x28] sm:$0xff] %vm19_vm0, %v259_v0  ;;  %250 = vmatpush3.bf16.msra.mxu1 %v254_v1  ;;  %233 = vmatpush3.bf16.msra.mxu0 %v254_v1  ;;  %v258_v5 = vld [vmem:[%s339_s0 + $0x10] sm:$0xff]   ;;  %v214_v23 = vld [vmem:[%s340_s2] ss:$0 sm:$0xff] }
   0x4   :  { %249 = vmatprep.subr.bf16.mxu1 %v259_v0  ;;  %234 = vmatprep.subr.bf16.mxu0 %v259_v0 }
   0x7   :  { %251 = vmatpush3.bf16.msra.mxu1 %v255_v2  ;;  %235 = vmatpush3.bf16.msra.mxu0 %v255_v2 }
   0x8   :  { %v28_v6 = vld [vmem:[#allocation2 + $0x10] sm:$0xff]  ;;  %v26_v7 = vld [vmem:[#allocation2] sm:$0xff] }
   0x9   :  { %v29_v14 = vld [vmem:[#allocation2 + $0x18] sm:$0xff]  ;;  %v27_v15 = vld [vmem:[#allocation2 + $0x8] sm:$0xff] }
   0xa   :  { %241 = vmatmul.mubr.msk.bf16.vlgmr.msra.gmra.mxu1 %vm69_vm2, %v256_v3  ;;  %237 = vmatmul.mubr.msk.bf16.vlgmr.msra.gmra.mxu0 %vm69_vm2, %v257_v4  ;;  %v30_v22 = vld [vmem:[#allocation2 + $0x20] sm:$0xff]  ;;  %v31_v29 = vld [vmem:[#allocation2 + $0x28] sm:$0xff] }
   0xb   :  { %244 = vmatprep.mubr.msk.bf16.mxu1 %vm260_vm1, %v259_v0 }
  0x12   :  { %245 = vmatmul.mubr.msk.bf16.gmra.mxu1 %vm69_vm2, %v258_v5 }
  0xca   :  { %v121_v8 = vpop.f32.mrf.mxu1  ;;  %v113_v9 = vpop.f32.mrf.mxu0 }
  0xcb   :  { %v138_v10 = vadd.f32 %v121_v8, %v28_v6  ;;  %v136_v11 = vadd.f32 %v113_v9, %v26_v7 }
  0xcc   :  { %v242_v12 = vpop.f32.mrf.mxu1  ;;  %v238_v13 = vpop.f32.mrf.mxu0 }
  0xcd   :  { %145 = vst.msk [vmem:[#allocation2 + $0x10] sm:$0xff] %vm19_vm0, %v138_v10  ;;  %143 = vst.msk [vmem:[#allocation2] sm:$0xff] %vm19_vm0, %v136_v11 }
  0xce   :  { %v124_v16 = vpop.f32.mrf.mxu1  ;;  %v116_v17 = vpop.f32.mrf.mxu0 }
  0xcf   :  { %v139_v18 = vadd.f32 %v124_v16, %v29_v14  ;;  %v137_v19 = vadd.f32 %v116_v17, %v27_v15 }
  0xd0   :  { %v243_v20 = vpop.f32.mrf.mxu1  ;;  %v239_v21 = vpop.f32.mrf.mxu0 }
  0xd1   :  { %146 = vst.msk [vmem:[#allocation2 + $0x18] sm:$0xff] %vm19_vm0, %v139_v18  ;;  %144 = vst.msk [vmem:[#allocation2 + $0x8] sm:$0xff] %vm19_vm0, %v137_v19 }
  0xd2   :  { %v129_v24 = vpop.f32.mrf.mxu1 }
  0xd3   :  { %v140_v25 = vadd.f32 %v129_v24, %v30_v22 }
  0xd4   :  { %v154_v26 = vld [vmem:[#allocation2 + $0x10] sm:$0xff]  ;;  %v152_v27 = vld [vmem:[#allocation2] sm:$0xff]  ;;  %v246_v28 = vpop.f32.mrf.mxu1 }
  0xd5   :  { %v167_v30 = vadd.f32 %v214_v23, %v154_v26  ;;  %v165_v31 = vadd.f32 %v214_v23, %v152_v27  ;;  %147 = vst.msk [vmem:[#allocation2 + $0x20] sm:$0xff] %vm19_vm0, %v140_v25 }
  0xd6   :  { %v132_v32 = vpop.f32.mrf.mxu1 }
  0xd7   :  { %v223_v33 = vpack.c.bf16 %v167_v30, %v167_v30  ;;  %v221_v34 = vpack.c.bf16 %v165_v31, %v165_v31  ;;  %v141_v35 = vadd.f32 %v132_v32, %v31_v29 }
  0xd8   :  { %v155_v36 = vld [vmem:[#allocation2 + $0x18] sm:$0xff]  ;;  %v153_v37 = vld [vmem:[#allocation2 + $0x8] sm:$0xff]  ;;  %v247_v38 = vpop.f32.mrf.mxu1 }
  0xd9   :  { %198 = vst.msk [vmem:[%s341_s3 + $0x8] sm:$0xf] %vm195_vm3, %v223_v33  ;;  %196 = vst.msk [vmem:[%s341_s3] sm:$0xf] %vm195_vm3, %v221_v34  ;;  %v168_v39 = vadd.f32 %v214_v23, %v155_v36  ;;  %v166_v40 = vadd.f32 %v214_v23, %v153_v37 }
  0xda   :  { %148 = vst.msk [vmem:[#allocation2 + $0x28] sm:$0xff] %vm19_vm0, %v141_v35 }
  0xdb   :  { %v224_v41 = vpack.c.bf16 %v168_v39, %v168_v39  ;;  %v222_v42 = vpack.c.bf16 %v166_v40, %v166_v40 }
  0xdc   :  { %v156_v43 = vld [vmem:[#allocation2 + $0x20] sm:$0xff] }
  0xdd   :  { %199 = vst.msk [vmem:[%s341_s3 + $0xc] sm:$0xf] %vm195_vm3, %v224_v41  ;;  %197 = vst.msk [vmem:[%s341_s3 + $0x4] sm:$0xf] %vm195_vm3, %v222_v42  ;;  %v169_v44 = vadd.f32 %v214_v23, %v156_v43 }
  0xdf   :  { %v225_v45 = vpack.c.bf16 %v169_v44, %v169_v44 }
  0xe1   :  { %v157_v46 = vld [vmem:[#allocation2 + $0x28] sm:$0xff]  ;;  %200 = vst.msk [vmem:[%s341_s3 + $0x10] sm:$0xf] %vm195_vm3, %v225_v45 }
  0xe2   :  { %v170_v47 = vadd.f32 %v214_v23, %v157_v46 }
  0xe4   :  { %v226_v48 = vpack.c.bf16 %v170_v47, %v170_v47 }
  0xe6   :  { %201 = vst.msk [vmem:[%s341_s3 + $0x14] sm:$0xf] %vm195_vm3, %v226_v48 }

// kernel: vit_forward.13
= control target key start
LH: loop header
LB: loop body
LE: loop exit
PB: predicated region body
PF: predicated region fallthrough
CT: control target
= control target key end

     0   :  { %vm19_vm0 = vcmask 261120   ;;  %v211_v1 = vmov 0.0   ;;  %vm66_vm1 = vcmask 392192   ;;  %vm165_vm2 = vcmask 257024   ;;  %s270_s1 = inlined_call_operand.vmem [shape: bf16[48,32], index: 1, kind: input, shape index: {}]   ;;  %s271_s0 = inlined_call_operand.vmem [shape: bf16[32,48], index: 0, kind: input, shape index: {}]   ;;  %s272_s2 = inlined_call_operand.vmem [shape: f32[1,32], index: 2, kind: input, shape index: {}]   ;;  %s273_s3 = inlined_call_operand.vmem [shape: bf16[32,32], index: 3, kind: output, shape index: {}]  }
   0x1   :  { %v206_v0 = vld [vmem:[%s270_s1 + $0x10] sm:$0xff]   ;;  %22 = vst.msk [vmem:[#allocation2 + $0x10] sm:$0xff] %vm19_vm0, %v211_v1  ;;  %20 = vst.msk [vmem:[#allocation2] sm:$0xff] %vm19_vm0, %v211_v1  ;;  %v207_v2 = vld [vmem:[%s270_s1 + $0x8] sm:$0xff]  }
   0x2   :  { %21 = vst.msk [vmem:[#allocation2 + $0x8] sm:$0xff] %vm19_vm0, %v211_v1  ;;  %23 = vst.msk [vmem:[#allocation2 + $0x18] sm:$0xff] %vm19_vm0, %v211_v1  ;;  %195 = vmatprep.subr.bf16.mxu0 %v206_v0  ;;  %v209_v3 = vld [vmem:[%s271_s0] sm:$0xff]   ;;  %v210_v5 = vld [vmem:[%s271_s0 + $0x8] sm:$0xff]  }
   0x3   :  { %196 = vmatpush3.bf16.msra.mxu0 %v206_v0  ;;  %v208_v4 = vld [vmem:[%s270_s1] sm:$0xff]   ;;  %201 = vmatprep.mubr.msk.bf16.mxu0 %vm66_vm1, %v209_v3 }
   0x4   :  { %197 = vmatprep.subr.bf16.mxu0 %v207_v2  ;;  %v181_v18 = vld [vmem:[%s272_s2] ss:$0 sm:$0xff] }
   0x7   :  { %198 = vmatpush3.bf16.msra.mxu0 %v207_v2 }
   0x8   :  { %199 = vmatprep.subr.bf16.mxu0 %v208_v4  ;;  %v26_v6 = vld [vmem:[#allocation2 + $0x10] sm:$0xff]  ;;  %v24_v8 = vld [vmem:[#allocation2] sm:$0xff] }
   0x9   :  { %v27_v11 = vld [vmem:[#allocation2 + $0x18] sm:$0xff]  ;;  %v25_v14 = vld [vmem:[#allocation2 + $0x8] sm:$0xff] }
   0xb   :  { %200 = vmatpush3.bf16.msra.mxu0 %v208_v4 }
   0xe   :  { %202 = vmatmul.mubr.msk.bf16.vlgmr.msra.gmra.mxu0 %vm66_vm1, %v210_v5 }
  0xce   :  { %v203_v7 = vpop.f32.mrf.mxu0 }
  0xcf   :  { %v124_v9 = vadd.f32 %v203_v7, %v26_v6 }
  0xd0   :  { %v107_v10 = vpop.f32.mrf.mxu0 }
  0xd1   :  { %129 = vst.msk [vmem:[#allocation2 + $0x10] sm:$0xff] %vm19_vm0, %v124_v9  ;;  %v122_v12 = vadd.f32 %v107_v10, %v24_v8 }
  0xd2   :  { %v204_v13 = vpop.f32.mrf.mxu0 }
  0xd3   :  { %127 = vst.msk [vmem:[#allocation2] sm:$0xff] %vm19_vm0, %v122_v12  ;;  %v125_v15 = vadd.f32 %v204_v13, %v27_v11 }
  0xd4   :  { %v110_v16 = vpop.f32.mrf.mxu0 }
  0xd5   :  { %130 = vst.msk [vmem:[#allocation2 + $0x18] sm:$0xff] %vm19_vm0, %v125_v15  ;;  %v123_v17 = vadd.f32 %v110_v16, %v25_v14 }
  0xd7   :  { %128 = vst.msk [vmem:[#allocation2 + $0x8] sm:$0xff] %vm19_vm0, %v123_v17 }
  0xd8   :  { %v136_v19 = vld [vmem:[#allocation2 + $0x10] sm:$0xff] }
  0xd9   :  { %v147_v20 = vadd.f32 %v181_v18, %v136_v19 }
  0xda   :  { %v134_v21 = vld [vmem:[#allocation2] sm:$0xff] }
  0xdb   :  { %v188_v22 = vpack.c.bf16 %v147_v20, %v147_v20  ;;  %v145_v23 = vadd.f32 %v181_v18, %v134_v21 }
  0xdc   :  { %v137_v24 = vld [vmem:[#allocation2 + $0x18] sm:$0xff] }
  0xdd   :  { %168 = vst.msk [vmem:[%s273_s3 + $0x8] sm:$0xf] %vm165_vm2, %v188_v22  ;;  %v186_v25 = vpack.c.bf16 %v145_v23, %v145_v23  ;;  %v148_v26 = vadd.f32 %v181_v18, %v137_v24 }
  0xde   :  { %v135_v27 = vld [vmem:[#allocation2 + $0x8] sm:$0xff] }
  0xdf   :  { %166 = vst.msk [vmem:[%s273_s3] sm:$0xf] %vm165_vm2, %v186_v25  ;;  %v189_v28 = vpack.c.bf16 %v148_v26, %v148_v26  ;;  %v146_v29 = vadd.f32 %v181_v18, %v135_v27 }
  0xe1   :  { %169 = vst.msk [vmem:[%s273_s3 + $0xc] sm:$0xf] %vm165_vm2, %v189_v28  ;;  %v187_v30 = vpack.c.bf16 %v146_v29, %v146_v29 }
  0xe3   :  { %167 = vst.msk [vmem:[%s273_s3 + $0x4] sm:$0xf] %vm165_vm2, %v187_v30 }

// kernel: vit_forward.15
= control target key start
LH: loop header
LB: loop body
LE: loop exit
PB: predicated region body
PF: predicated region fallthrough
CT: control target
= control target key end

     0   :  { %s1422_s12 = smov 0   ;;  %s1652_s0 = inlined_call_operand.vmem [shape: bf16[2,4,24,8], index: 0, kind: input, shape index: {}]   ;;  %s1653_s1 = inlined_call_operand.vmem [shape: bf16[2,4,24,8], index: 1, kind: input, shape index: {}]   ;;  %s1654_s2 = inlined_call_operand.vmem [shape: bf16[2,4,24,8], index: 2, kind: input, shape index: {}]   ;;  %s1655_s3 = inlined_call_operand.vmem [shape: bf16[2,4,24,8], index: 3, kind: output, shape index: {}]  }
   0x1 LB: > { %s1130_s13 = sadd.s32 4294967295, %s1400_s12   ;;  %p1134_p0 = scmp.ge.s32.totalorder %s1400_s12, 1  ;;  %s1400_s12 = sphi %s1422_s12, %s13_s12  }
   0x2   : > { %p157_p1 = scmp.lt.s32.totalorder %s1400_s12, 3 }
   0x4   : > { %p158_p2 = pnand %p1134_p0, %p157_p1 }
   0x5   : > { %p191_p3 = scmp.lt.s32.totalorder (!%p158_p2), %s1130_s13, 1 }
   0x6   : > { %161 = sbr.rel (%p158_p2) target bundleno = 622 (0x26e), region = 32 }
   0xb   : > { %s1657_s13 = smov (!%p191_p3, %s1130_s13), 1  ;;  %vm264_vm0 = vcmask 64512   ;;  %v565_v24 = vlaneseq  ;;  %vm580_vm2 = vcmask 195584   ;;  %vm712_vm3 = vcmask 1043456  }
   0xc   : > { %s1430_s14 = smul.u32 48, %s1657_s13  ;;  %vm1038_vm4 = vcmask 60416  }
   0xd   : > { %v1484_v25 = vand.u32 127, %v565_v24 }
   0xe   : > { %s1436_s17 = scalar_lea.vmem %s1653_s1, %s1430_s14  ;;  %s1444_s20 = scalar_lea.vmem %s1652_s0, %s1430_s14 }
   0xf   : > { %v1322_v0 = vld [vmem:[%s1436_s17 + $0x8] ss:$0 sps:$4 sm:$0xff]   ;;  %v1323_v1 = vld [vmem:[%s1436_s17 + $0x14] ss:$0 sps:$4 sm:$0xff]   ;;  %v1324_v3 = vld [vmem:[%s1436_s17] sm:$0xff]   ;;  %vm567_vm1 = vcmp.lt.s32.totalorder %v1484_v25, 17  ;;  %s1563_s23 = scalar_lea.vmem %s1654_s2, %s1430_s14  ;;  %s1623_s26 = scalar_lea.vmem %s1655_s3, %s1430_s14 }
  0x10   : > { %1301 = vmatprep.subr.msk.bf16.mxu0 %vm264_vm0, %v1322_v0  ;;  %v275_v2 = vsel %vm264_vm0, %v1322_v0, 0  ;;  %1303 = vmatprep.subr.msk.bf16.mxu1 %vm264_vm0, %v1323_v1  ;;  %v351_v4 = vsel %vm264_vm0, %v1323_v1, 0  ;;  %v1325_v5 = vld [vmem:[%s1436_s17 + $0xc] sm:$0xff]   ;;  %v1326_v6 = vld [vmem:[%s1444_s20] sm:$0xff]   ;;  %v272_v8 = vsel %vm264_vm0, %v1324_v3, 0  ;;  %v1332_v15 = vld [vmem:[%s1436_s17 + $0x18] sm:$0xff]  }
  0x11   : > { %1238 = vmatpush3.bf16.xpose.msra.mxu0 %v275_v2  ;;  %1246 = vmatpush3.bf16.xpose.msra.mxu1 %v351_v4  ;;  %v1327_v7 = vld [vmem:[%s1444_s20 + $0xc] sm:$0xff]   ;;  %v348_v9 = vsel %vm264_vm0, %v1325_v5, 0  ;;  %v1330_v10 = vld [vmem:[%s1436_s17 + $0x20] ss:$0 sps:$4 sm:$0xff]   ;;  %v1328_v12 = vld [vmem:[%s1444_s20 + $0x8] ss:$0 sps:$4 sm:$0xff]  }
  0x12   : > { %1302 = vmatprep.subr.msk.bf16.mxu0 %vm264_vm0, %v1324_v3  ;;  %1304 = vmatprep.subr.msk.bf16.mxu1 %vm264_vm0, %v1325_v5  ;;  %v1331_v11 = vld [vmem:[%s1436_s17 + $0x2c] ss:$0 sps:$4 sm:$0xff]   ;;  %v1329_v13 = vld [vmem:[%s1444_s20 + $0x14] ss:$0 sps:$4 sm:$0xff]   ;;  %v427_v14 = vsel %vm264_vm0, %v1330_v10, 0  ;;  %v1333_v17 = vld [vmem:[%s1436_s17 + $0x24] sm:$0xff]  }
  0x13   : > { %1241 = vmatprep.mubr.msk.bf16.mxu0 %vm264_vm0, %v1326_v6  ;;  %1249 = vmatprep.mubr.msk.bf16.mxu1 %vm264_vm0, %v1327_v7  ;;  %v503_v16 = vsel %vm264_vm0, %v1331_v11, 0  ;;  %v1334_v18 = vld [vmem:[%s1444_s20 + $0x18] sm:$0xff]   ;;  %v1335_v19 = vld [vmem:[%s1444_s20 + $0x24] sm:$0xff]   ;;  %v424_v20 = vsel %vm264_vm0, %v1332_v15, 0  ;;  %v500_v21 = vsel %vm264_vm0, %v1333_v17, 0 }
  0x14   : > { %v1336_v22 = vld [vmem:[%s1444_s20 + $0x20] ss:$0 sps:$4 sm:$0xff]   ;;  %v1337_v23 = vld [vmem:[%s1444_s20 + $0x2c] ss:$0 sps:$4 sm:$0xff]  }
  0x19   : > { %1240 = vmatpush3.bf16.xpose.msra.mxu0 %v272_v8  ;;  %1248 = vmatpush3.bf16.xpose.msra.mxu1 %v348_v9 }
  0x1a   : > { %1305 = vmatprep.subr.msk.bf16.mxu0 %vm264_vm0, %v1330_v10  ;;  %1307 = vmatprep.subr.msk.bf16.mxu1 %vm264_vm0, %v1331_v11 }
  0x20   : > { %1242 = vmatmul.mubr.msk.bf16.vlgmr.msra.gmra.mxu0 %vm264_vm0, %v1328_v12  ;;  %1250 = vmatmul.mubr.msk.bf16.vlgmr.msra.gmra.mxu1 %vm264_vm0, %v1329_v13 }
  0x21   : > { %1254 = vmatpush3.bf16.xpose.msra.mxu0 %v427_v14  ;;  %1262 = vmatpush3.bf16.xpose.msra.mxu1 %v503_v16  ;;  %v1338_v14 = vld [vmem:[%s1563_s23 + $0x8] ss:$0 sps:$4 sm:$0xff]  }
  0x22   : > { %1306 = vmatprep.subr.msk.bf16.mxu0 %vm264_vm0, %v1332_v15  ;;  %1308 = vmatprep.subr.msk.bf16.mxu1 %vm264_vm0, %v1333_v17  ;;  %v1339_v15 = vld [vmem:[%s1563_s23 + $0x14] ss:$0 sps:$4 sm:$0xff]   ;;  %v714_v16 = vsel %vm712_vm3, %v1338_v14, 0 }
  0x23   : > { %1257 = vmatprep.mubr.msk.bf16.mxu0 %vm264_vm0, %v1334_v18  ;;  %1265 = vmatprep.mubr.msk.bf16.mxu1 %vm264_vm0, %v1335_v19  ;;  %v780_v17 = vsel %vm712_vm3, %v1339_v15, 0  ;;  %v1340_v18 = vld [vmem:[%s1563_s23] sm:$0xff]   ;;  %v1341_v19 = vld [vmem:[%s1563_s23 + $0xc] sm:$0xff]  }
  0x29   : > { %1256 = vmatpush3.bf16.xpose.msra.mxu0 %v424_v20  ;;  %1264 = vmatpush3.bf16.xpose.msra.mxu1 %v500_v21  ;;  %v1342_v20 = vld [vmem:[%s1563_s23 + $0x20] ss:$0 sps:$4 sm:$0xff]   ;;  %v1343_v21 = vld [vmem:[%s1563_s23 + $0x2c] ss:$0 sps:$4 sm:$0xff]  }
  0x2a   : > { %1309 = vmatprep.subr.msk.bf16.mxu0 %vm712_vm3, %v1338_v14  ;;  %1310 = vmatprep.subr.msk.bf16.mxu1 %vm712_vm3, %v1339_v15 }
  0x30   : > { %1258 = vmatmul.mubr.msk.bf16.vlgmr.msra.gmra.mxu0 %vm264_vm0, %v1336_v22  ;;  %1266 = vmatmul.mubr.msk.bf16.vlgmr.msra.gmra.mxu1 %vm264_vm0, %v1337_v23  ;;  %v1577_v22 = vsel %vm712_vm3, %v1342_v20, 0  ;;  %v1581_v23 = vsel %vm712_vm3, %v1343_v21, 0 }
  0x31   : > { %1270 = vmatpush3.bf16.msra.mxu0 %v714_v16  ;;  %1278 = vmatpush3.bf16.msra.mxu1 %v780_v17 }
  0x32   : > { %1271 = vmatprep.subr.bf16.mxu0 %v1340_v18  ;;  %1279 = vmatprep.subr.bf16.mxu1 %v1341_v19 }
  0x35   : > { %1272 = vmatpush3.bf16.msra.mxu0 %v1340_v18  ;;  %1280 = vmatpush3.bf16.msra.mxu1 %v1341_v19 }
  0x36   : > { %1311 = vmatprep.subr.msk.bf16.mxu0 %vm712_vm3, %v1342_v20  ;;  %1312 = vmatprep.subr.msk.bf16.mxu1 %vm712_vm3, %v1343_v21 }
  0xe0   : > { %v1243_v26 = vpop.f32.mrf.mxu0  ;;  %v1251_v28 = vpop.f32.mrf.mxu1 }
  0xe1   : > { %v555_v27 = vmul.f32 0.35355338, %v1243_v26  ;;  %v558_v29 = vmul.f32 0.35355338, %v1251_v28 }
  0xe2   : > { %v311_v30 = vpop.f32.mrf.mxu0  ;;  %v387_v32 = vpop.f32.mrf.mxu1 }
  0xe3   : > { %v553_v31 = vmul.f32 0.35355338, %v311_v30  ;;  %v1489_v33 = vsel %vm567_vm1, %v555_v27, -1e+30  ;;  %v556_v34 = vmul.f32 0.35355338, %v387_v32 }
  0xe4   : > { %v1244_v35 = vpop.f32.mrf.mxu0  ;;  %v1493_v36 = vsel %vm567_vm1, %v558_v29, -1e+30  ;;  %v587_v37 = vsel %vm580_vm2, %v1489_v33, -inf  ;;  %v1252_v38 = vpop.f32.mrf.mxu1 }
  0xe5   : > { %v596_v39 = vsel %vm580_vm2, %v1493_v36, -inf  ;;  %588 = vmax.xlane.f32.xlu0 %v587_v37  ;;  %v1501_v40 = vsel %vm567_vm1, %v553_v31, -1e+30  ;;  %v1505_v42 = vsel %vm567_vm1, %v556_v34, -1e+30 }
  0xe6   : > { %597 = vmax.xlane.f32.xlu1 %v596_v39  ;;  %v314_v41 = vpop.f32.mrf.mxu0  ;;  %v390_v44 = vpop.f32.mrf.mxu1  ;;  %v590_v45 = vsel %vm580_vm2, %v1505_v42, -inf  ;;  %v581_v47 = vsel %vm580_vm2, %v1501_v40, -inf }
  0xe7   : > { %v554_v43 = vmul.f32 0.35355338, %v314_v41  ;;  %v557_v46 = vmul.f32 0.35355338, %v390_v44 }
  0xe9   : > { %582 = vmax.xlane.f32.xlu0 %v581_v47  ;;  %v1513_v48 = vsel %vm567_vm1, %v554_v43, -1e+30  ;;  %v1517_v49 = vsel %vm567_vm1, %v557_v46, -1e+30 }
  0xea   : > { %591 = vmax.xlane.f32.xlu1 %v590_v45  ;;  %v584_v50 = vsel %vm580_vm2, %v1513_v48, -inf  ;;  %v593_v51 = vsel %vm580_vm2, %v1517_v49, -inf }
  0xed   : > { %585 = vmax.xlane.f32.xlu0 %v584_v50 }
  0xee   : > { %594 = vmax.xlane.f32.xlu1 %v593_v51 }
  0xf0   : > { %v1259_v52 = vpop.f32.mrf.mxu0  ;;  %v1267_v53 = vpop.f32.mrf.mxu1 }
  0xf1   : > { %v561_v63 = vmul.f32 0.35355338, %v1259_v52  ;;  %v564_v7 = vmul.f32 0.35355338, %v1267_v53 }
  0xf2   : > { %v463_v54 = vpop.f32.mrf.mxu0  ;;  %v539_v56 = vpop.f32.mrf.mxu1 }
  0xf3   : > { %v559_v55 = vmul.f32 0.35355338, %v463_v54  ;;  %v562_v57 = vmul.f32 0.35355338, %v539_v56  ;;  %v1543_v8 = vsel %vm567_vm1, %v561_v63, -1e+30 }
  0xf4   : > { %v1260_v58 = vpop.f32.mrf.mxu0  ;;  %v1268_v59 = vpop.f32.mrf.mxu1  ;;  %v605_v10 = vsel %vm580_vm2, %v1543_v8, -inf  ;;  %v1555_v12 = vsel %vm567_vm1, %v564_v7, -1e+30 }
  0xf5   : > { %v1525_v60 = vsel %vm567_vm1, %v559_v55, -1e+30  ;;  %v1531_v2 = vsel %vm567_vm1, %v562_v57, -1e+30  ;;  %v614_v13 = vsel %vm580_vm2, %v1555_v12, -inf }
  0xf6   : > { %v466_v61 = vpop.f32.mrf.mxu0  ;;  %v599_v62 = vsel %vm580_vm2, %v1525_v60, -inf  ;;  %v542_v1 = vpop.f32.mrf.mxu1  ;;  %v608_v5 = vsel %vm580_vm2, %v1531_v2, -inf }
  0xf7   : > { %v560_v0 = vmul.f32 0.35355338, %v466_v61  ;;  %600 = vmax.xlane.f32.xlu0 %v599_v62  ;;  %v563_v3 = vmul.f32 0.35355338, %v542_v1 }
  0xf9   : > { %v1535_v4 = vsel %vm567_vm1, %v560_v0, -1e+30  ;;  %v1547_v9 = vsel %vm567_vm1, %v563_v3, -1e+30 }
  0xfa   : > { %v602_v6 = vsel %vm580_vm2, %v1535_v4, -inf  ;;  %v611_v11 = vsel %vm580_vm2, %v1547_v9, -inf }
  0xfb   : > { %609 = vmax.xlane.f32.xlu0 %v608_v5  ;;  %603 = vmax.xlane.f32.xlu1 %v602_v6 }
  0xff   : > { %606 = vmax.xlane.f32.xlu0 %v605_v10  ;;  %612 = vmax.xlane.f32.xlu1 %v611_v11  ;;  %v1344_v11 = vld [vmem:[%s1563_s23 + $0x18] sm:$0xff]  }
 0x103   : > { %615 = vmax.xlane.f32.xlu1 %v614_v13  ;;  %v1345_v13 = vld [vmem:[%s1563_s23 + $0x24] sm:$0xff]  }
 0x16e   : > { %v589_v24 = vpop.xlane.xlu0 %588 }
 0x16f   : > { %v598_v25 = vpop.xlane.xlu1 %597  ;;  %v619_v26 = vsub.f32 %v1489_v33, %v589_v24 }
 0x170   : > { %v622_v27 = vsub.f32 %v1493_v36, %v598_v25 }
 0x171   : > { %v633_v28 = vmul.f32 1.442695, %v619_v26 }
 0x172   : > { %v639_v29 = vmul.f32 1.442695, %v622_v27  ;;  %v583_v30 = vpop.xlane.xlu0 %582 }
 0x173   : > { %1346 = vpow2.f32 %v633_v28  ;;  %v592_v31 = vpop.xlane.xlu1 %591  ;;  %v617_v32 = vsub.f32 %v1501_v40, %v583_v30 }
 0x174   : > { %1348 = vpow2.f32 %v639_v29  ;;  %v620_v34 = vsub.f32 %v1505_v42, %v592_v31 }
 0x175   : > { %v629_v35 = vmul.f32 1.442695, %v617_v32 }
 0x176   : > { %v635_v37 = vmul.f32 1.442695, %v620_v34  ;;  %v586_v38 = vpop.xlane.xlu0 %585 }
 0x177   : > { %1350 = vpow2.f32 %v629_v35  ;;  %v595_v39 = vpop.xlane.xlu1 %594  ;;  %v618_v41 = vsub.f32 %v1513_v48, %v586_v38 }
 0x178   : > { %1352 = vpow2.f32 %v635_v37  ;;  %v621_v33 = vsub.f32 %v1517_v49, %v595_v39 }
 0x179   : > { %v631_v36 = vmul.f32 1.442695, %v618_v41 }
 0x17a   : > { %v637_v43 = vmul.f32 1.442695, %v621_v33 }
 0x17b   : > { %1354 = vpow2.f32 %v631_v36 }
 0x17c   : > { %1356 = vpow2.f32 %v637_v43 }
 0x180   : > { %v1347_v44 = vpop.eup %1346  ;;  %v601_v45 = vpop.xlane.xlu0 %600 }
 0x181   : > { %v1349_v40 = vpop.eup %1348  ;;  %v623_v46 = vsub.f32 %v1525_v60, %v601_v45  ;;  %v659_v42 = vsel %vm580_vm2, %v1347_v44, 0.0  ;;  %v690_v7 = vpack.c.bf16 %v1347_v44, %v1347_v44 }
 0x182   : > { %660 = vadd.xlane.f32.xlu0 %v659_v42  ;;  %v668_v47 = vsel %vm580_vm2, %v1349_v40, 0.0  ;;  %v692_v10 = vpack.c.bf16 %v1349_v40, %v1349_v40 }
 0x183   : > { %669 = vadd.xlane.f32.xlu1 %v668_v47  ;;  %v641_v48 = vmul.f32 1.442695, %v623_v46 }
 0x184   : > { %v1351_v50 = vpop.eup %1350  ;;  %v610_v51 = vpop.xlane.xlu0 %609 }
 0x185   : > { %v604_v52 = vpop.xlane.xlu1 %603  ;;  %v1353_v49 = vpop.eup %1352  ;;  %v626_v53 = vsub.f32 %v1531_v2, %v610_v51  ;;  %v653_v55 = vsel %vm580_vm2, %v1351_v50, 0.0  ;;  %1358 = vpow2.f32 %v641_v48 }
 0x186   : > { %v624_v54 = vsub.f32 %v1535_v4, %v604_v52  ;;  %654 = vadd.xlane.f32.xlu0 %v653_v55  ;;  %v662_v56 = vsel %vm580_vm2, %v1353_v49, 0.0 }
 0x187   : > { %v647_v57 = vmul.f32 1.442695, %v626_v53  ;;  %663 = vadd.xlane.f32.xlu1 %v662_v56 }
 0x188   : > { %v643_v58 = vmul.f32 1.442695, %v624_v54  ;;  %v1355_v59 = vpop.eup %1354  ;;  %v607_v60 = vpop.xlane.xlu0 %606 }
 0x189   : > { %v613_v61 = vpop.xlane.xlu1 %612  ;;  %v1357_v62 = vpop.eup %1356  ;;  %1360 = vpow2.f32 %v647_v57  ;;  %v625_v63 = vsub.f32 %v1543_v8, %v607_v60  ;;  %v656_v1 = vsel %vm580_vm2, %v1355_v59, 0.0  ;;  %v689_v3 = vpack.c.bf16 %v1355_v59, %v1351_v50 }
 0x18a   : > { %v627_v0 = vsub.f32 %v1547_v9, %v613_v61  ;;  %1362 = vpow2.f32 %v643_v58  ;;  %v665_v2 = vsel %vm580_vm2, %v1357_v62, 0.0  ;;  %v691_v4 = vpack.c.bf16 %v1357_v62, %v1353_v49 }
 0x18b   : > { %v645_v5 = vmul.f32 1.442695, %v625_v63  ;;  %666 = vadd.xlane.f32.xlu0 %v665_v2  ;;  %657 = vadd.xlane.f32.xlu1 %v656_v1 }
 0x18c   : > { %v649_v6 = vmul.f32 1.442695, %v627_v0  ;;  %1273 = vmatprep.mubr.msk.bf16.mxu0 %vm580_vm2, %v689_v3  ;;  %1281 = vmatprep.mubr.msk.bf16.mxu1 %vm580_vm2, %v691_v4 }
 0x18d   : > { %v616_v8 = vpop.xlane.xlu1 %615  ;;  %1364 = vpow2.f32 %v645_v5  ;;  %1274 = vmatmul.mubr.msk.bf16.vlgmr.msra.gmra.mxu0 %vm580_vm2, %v690_v7  ;;  %1282 = vmatmul.mubr.msk.bf16.vlgmr.msra.gmra.mxu1 %vm580_vm2, %v692_v10 }
 0x18e   : > { %v628_v9 = vsub.f32 %v1555_v12, %v616_v8  ;;  %1366 = vpow2.f32 %v649_v6  ;;  %1286 = vmatpush3.bf16.msra.mxu0 %v1577_v22  ;;  %1294 = vmatpush3.bf16.msra.mxu1 %v1581_v23 }
 0x18f   : > { %1287 = vmatprep.subr.bf16.mxu0 %v1344_v11  ;;  %1295 = vmatprep.subr.bf16.mxu1 %v1345_v13 }
 0x190   : > { %v651_v14 = vmul.f32 1.442695, %v628_v9 }
 0x192   : > { %1368 = vpow2.f32 %v651_v14  ;;  %1288 = vmatpush3.bf16.msra.mxu0 %v1344_v11  ;;  %1296 = vmatpush3.bf16.msra.mxu1 %v1345_v13  ;;  %v1359_v15 = vpop.eup %1358 }
 0x193   : > { %v671_v26 = vsel %vm580_vm2, %v1359_v15, 0.0 }
 0x196   : > { %v1361_v16 = vpop.eup %1360 }
 0x197   : > { %v1363_v17 = vpop.eup %1362  ;;  %v680_v18 = vsel %vm580_vm2, %v1361_v16, 0.0 }
 0x198   : > { %681 = vadd.xlane.f32.xlu1 %v680_v18  ;;  %v693_v19 = vpack.c.bf16 %v1363_v17, %v1359_v15  ;;  %v674_v22 = vsel %vm580_vm2, %v1363_v17, 0.0 }
 0x19a   : > { %v1365_v20 = vpop.eup %1364  ;;  %1289 = vmatprep.mubr.msk.bf16.mxu0 %vm580_vm2, %v693_v19 }
 0x19b   : > { %v1367_v12 = vpop.eup %1366  ;;  %v677_v21 = vsel %vm580_vm2, %v1365_v20, 0.0  ;;  %v694_v23 = vpack.c.bf16 %v1365_v20, %v1365_v20 }
 0x19c   : > { %678 = vadd.xlane.f32.xlu0 %v677_v21  ;;  %675 = vadd.xlane.f32.xlu1 %v674_v22  ;;  %v695_v24 = vpack.c.bf16 %v1367_v12, %v1361_v16  ;;  %v683_v29 = vsel %vm580_vm2, %v1367_v12, 0.0 }
 0x19d   : > { %1290 = vmatmul.mubr.msk.bf16.vlgmr.msra.gmra.mxu0 %vm580_vm2, %v694_v23 }
 0x19e   : > { %1297 = vmatprep.mubr.msk.bf16.mxu1 %vm580_vm2, %v695_v24 }
 0x19f   : > { %v1369_v25 = vpop.eup %1368 }
 0x1a0   : > { %v686_v27 = vsel %vm580_vm2, %v1369_v25, 0.0  ;;  %v696_v28 = vpack.c.bf16 %v1369_v25, %v1369_v25  ;;  %672 = vadd.xlane.f32.xlu0 %v671_v26 }
 0x1a1   : > { %687 = vadd.xlane.f32.xlu1 %v686_v27 }
 0x1a2   : > { %1298 = vmatmul.mubr.msk.bf16.vlgmr.msra.gmra.mxu1 %vm580_vm2, %v696_v28 }
 0x1a4   : > { %684 = vadd.xlane.f32.xlu0 %v683_v29 }
 0x20b   : > { %v661_v31 = vpop.xlane.xlu0 %660 }
 0x20c   : > { %v670_v30 = vpop.xlane.xlu1 %669  ;;  %1370 = vrcp.f32 %v661_v31 }
 0x20d   : > { %1372 = vrcp.f32 %v670_v30 }
 0x20f   : > { %v655_v34 = vpop.xlane.xlu0 %654 }
 0x210   : > { %v664_v32 = vpop.xlane.xlu1 %663  ;;  %1374 = vrcp.f32 %v655_v34 }
 0x211   : > { %1376 = vrcp.f32 %v664_v32 }
 0x214   : > { %v658_v35 = vpop.xlane.xlu1 %657  ;;  %v667_v37 = vpop.xlane.xlu0 %666 }
 0x215   : > { %1378 = vrcp.f32 %v667_v37 }
 0x216   : > { %1380 = vrcp.f32 %v658_v35 }
 0x219   : > { %v1371_v33 = vpop.eup %1370 }
 0x21a   : > { %v1373_v36 = vpop.eup %1372 }
 0x21d   : > { %v1375_v45 = vpop.eup %1374 }
 0x21e   : > { %v1377_v47 = vpop.eup %1376 }
 0x221   : > { %v682_v38 = vpop.xlane.xlu1 %681 }
 0x222   : > { %v1379_v57 = vpop.eup %1378 }
 0x223   : > { %v1381_v60 = vpop.eup %1380 }
 0x225   : > { %v679_v39 = vpop.xlane.xlu0 %678  ;;  %v676_v41 = vpop.xlane.xlu1 %675 }
 0x226   : > { %1382 = vrcp.f32 %v679_v39 }
 0x229   : > { %v673_v40 = vpop.xlane.xlu0 %672 }
 0x22a   : > { %v688_v51 = vpop.xlane.xlu1 %687  ;;  %1384 = vrcp.f32 %v673_v40 }
 0x22b   : > { %1386 = vrcp.f32 %v688_v51 }
 0x22c   : > { %1388 = vrcp.f32 %v682_v38 }
 0x22d   : > { %1390 = vrcp.f32 %v676_v41  ;;  %v685_v3 = vpop.xlane.xlu0 %684 }
 0x22e   : > { %1392 = vrcp.f32 %v685_v3 }
 0x233   : > { %v1383_v4 = vpop.eup %1382 }
 0x237   : > { %v1385_v7 = vpop.eup %1384 }
 0x238   : > { %v1387_v8 = vpop.eup %1386 }
 0x239   : > { %v1389_v15 = vpop.eup %1388 }
 0x23a   : > { %v1391_v18 = vpop.eup %1390 }
 0x23b   : > { %v1393_v26 = vpop.eup %1392 }
 0x24d   : > { %v1275_v43 = vpop.f32.mrf.mxu0  ;;  %v1283_v44 = vpop.f32.mrf.mxu1 }
 0x24e   : > { %v976_v46 = vmul.f32 %v1371_v33, %v1275_v43  ;;  %v979_v42 = vmul.f32 %v1373_v36, %v1283_v44 }
 0x24f   : > { %v750_v50 = vpop.f32.mrf.mxu0  ;;  %v816_v48 = vpop.f32.mrf.mxu1 }
 0x250   : > { %v1195_v52 = vpack.c.bf16 %v976_v46, %v976_v46  ;;  %v1198_v49 = vpack.c.bf16 %v979_v42, %v979_v42  ;;  %v974_v53 = vmul.f32 %v1375_v45, %v750_v50  ;;  %v977_v54 = vmul.f32 %v1377_v47, %v816_v48 }
 0x251   : > { %v1276_v55 = vpop.f32.mrf.mxu0  ;;  %v1284_v56 = vpop.f32.mrf.mxu1 }
 0x252   : > { %1041 = vst.msk [vmem:[%s1623_s26 + $0x8] sm:$0xf] %vm1038_vm4, %v1195_v52  ;;  %1044 = vst.msk [vmem:[%s1623_s26 + $0x14] sm:$0xf] %vm1038_vm4, %v1198_v49  ;;  %v1193_v58 = vpack.c.bf16 %v974_v53, %v974_v53  ;;  %v1196_v59 = vpack.c.bf16 %v977_v54, %v977_v54 }
 0x253   : > { %v753_v61 = vpop.f32.mrf.mxu0  ;;  %v819_v62 = vpop.f32.mrf.mxu1 }
 0x254   : > { %1039 = vst.msk [vmem:[%s1623_s26] sm:$0xf] %vm1038_vm4, %v1193_v58  ;;  %1042 = vst.msk [vmem:[%s1623_s26 + $0xc] sm:$0xf] %vm1038_vm4, %v1196_v59  ;;  %v975_v63 = vmul.f32 %v1381_v60, %v753_v61  ;;  %v978_v0 = vmul.f32 %v1379_v57, %v819_v62 }
 0x256   : > { %v1194_v1 = vpack.c.bf16 %v975_v63, %v975_v63  ;;  %v1197_v2 = vpack.c.bf16 %v978_v0, %v978_v0 }
 0x258   : > { %1040 = vst.msk [vmem:[%s1623_s26 + $0x4] sm:$0xf] %vm1038_vm4, %v1194_v1  ;;  %1043 = vst.msk [vmem:[%s1623_s26 + $0x10] sm:$0xf] %vm1038_vm4, %v1197_v2 }
 0x25d   : > { %v1291_v5 = vpop.f32.mrf.mxu0 }
 0x25e   : > { %v982_v6 = vmul.f32 %v1383_v4, %v1291_v5 }
 0x25f   : > { %v882_v10 = vpop.f32.mrf.mxu0 }
 0x260   : > { %v1201_v11 = vpack.c.bf16 %v982_v6, %v982_v6  ;;  %v980_v13 = vmul.f32 %v1385_v7, %v882_v10 }
 0x261   : > { %v1292_v9 = vpop.f32.mrf.mxu0 }
 0x262   : > { %v1299_v14 = vpop.f32.mrf.mxu1  ;;  %1047 = vst.msk [vmem:[%s1623_s26 + $0x20] sm:$0xf] %vm1038_vm4, %v1201_v11  ;;  %v1199_v16 = vpack.c.bf16 %v980_v13, %v980_v13 }
 0x263   : > { %v985_v17 = vmul.f32 %v1387_v8, %v1299_v14  ;;  %v885_v19 = vpop.f32.mrf.mxu0 }
 0x264   : > { %v948_v20 = vpop.f32.mrf.mxu1  ;;  %1045 = vst.msk [vmem:[%s1623_s26 + $0x18] sm:$0xf] %vm1038_vm4, %v1199_v16  ;;  %v981_v21 = vmul.f32 %v1391_v18, %v885_v19 }
 0x265   : > { %v1204_v12 = vpack.c.bf16 %v985_v17, %v985_v17  ;;  %v983_v22 = vmul.f32 %v1389_v15, %v948_v20 }
 0x266   : > { %v1300_v23 = vpop.f32.mrf.mxu1  ;;  %v1200_v24 = vpack.c.bf16 %v981_v21, %v981_v21 }
 0x267   : > { %1050 = vst.msk [vmem:[%s1623_s26 + $0x2c] sm:$0xf] %vm1038_vm4, %v1204_v12  ;;  %v1202_v25 = vpack.c.bf16 %v983_v22, %v983_v22 }
 0x268   : > { %v951_v27 = vpop.f32.mrf.mxu1  ;;  %1046 = vst.msk [vmem:[%s1623_s26 + $0x1c] sm:$0xf] %vm1038_vm4, %v1200_v24 }
 0x269   : > { %1048 = vst.msk [vmem:[%s1623_s26 + $0x24] sm:$0xf] %vm1038_vm4, %v1202_v25  ;;  %v984_v28 = vmul.f32 %v1393_v26, %v951_v27 }
 0x26b   : > { %v1203_v29 = vpack.c.bf16 %v984_v28, %v984_v28 }
 0x26d   : > { %1049 = vst.msk [vmem:[%s1623_s26 + $0x28] sm:$0xf] %vm1038_vm4, %v1203_v29 }
 0x26e PF: > { %s13_s12 = sadd.s32 1, %s1400_s12  }
 0x26f   : > { %p10_p4 = scmp.ge.s32.totalorder %s13_s12, 4  }
 0x271   :  { %12 = sbr.rel (!%p10_p4) target bundleno = 1 (0x1), region = 68 }

// kernel: vit_forward.16
= control target key start
LH: loop header
LB: loop body
LE: loop exit
PB: predicated region body
PF: predicated region fallthrough
CT: control target
= control target key end

     0   :  { %vm28_vm0 = vcmask 261120   ;;  %v418_v0 = vmov 0.0   ;;  %vm419_vm1 = vmmov 0   ;;  %vm326_vm2 = vcmask 257024   ;;  %s559_s1 = inlined_call_operand.vmem [shape: bf16[32,32], index: 1, kind: input, shape index: {}]   ;;  %s560_s0 = inlined_call_operand.vmem [shape: bf16[48,32], index: 0, kind: input, shape index: {}]   ;;  %s561_s3 = inlined_call_operand.vmem [shape: bf16[48,32], index: 3, kind: input, shape index: {}]   ;;  %s562_s2 = inlined_call_operand.vmem [shape: f32[1,32], index: 2, kind: input, shape index: {}]   ;;  %s563_s4 = inlined_call_operand.vmem [shape: f32[1,32], index: 4, kind: input, shape index: {}]   ;;  %s564_s5 = inlined_call_operand.vmem [shape: f32[1,32], index: 5, kind: input, shape index: {}]   ;;  %s565_s6 = inlined_call_operand.vmem [shape: bf16[48,32], index: 6, kind: output, shape index: {}]  }
   0x1   :  { %379 = vmatprep.subr.bf16.mxu0 %v418_v0  ;;  %395 = vmatprep.subr.bf16.mxu1 %v418_v0  ;;  %v401_v1 = vld [vmem:[%s559_s1 + $0x8] sm:$0xff]   ;;  %29 = vst.msk [vmem:[#allocation2] sm:$0xff] %vm28_vm0, %v418_v0  ;;  %30 = vst.msk [vmem:[#allocation2 + $0x8] sm:$0xff] %vm28_vm0, %v418_v0  ;;  %v402_v2 = vld [vmem:[%s559_s1] sm:$0xff]  }
   0x2   :  { %31 = vst.msk [vmem:[#allocation2 + $0x10] sm:$0xff] %vm28_vm0, %v418_v0  ;;  %32 = vst.msk [vmem:[#allocation2 + $0x18] sm:$0xff] %vm28_vm0, %v418_v0  ;;  %383 = vmatprep.mubr.msk.bf16.mxu0 %vm419_vm1, %v418_v0  ;;  %387 = vmatprep.mubr.msk.bf16.mxu1 %vm419_vm1, %v418_v0  ;;  %v403_v3 = vld [vmem:[%s560_s0] sm:$0xff]   ;;  %v404_v4 = vld [vmem:[%s560_s0 + $0x8] sm:$0xff]  }
   0x3   :  { %33 = vst.msk [vmem:[#allocation2 + $0x20] sm:$0xff] %vm28_vm0, %v418_v0  ;;  %34 = vst.msk [vmem:[#allocation2 + $0x28] sm:$0xff] %vm28_vm0, %v418_v0  ;;  %380 = vmatpush3.bf16.msra.mxu0 %v401_v1  ;;  %397 = vmatpush3.bf16.msra.mxu1 %v401_v1  ;;  %v405_v5 = vld [vmem:[%s560_s0 + $0x10] sm:$0xff]   ;;  %v372_v23 = vld [vmem:[%s561_s3 + $0x8] sm:$0xff]  }
   0x4   :  { %381 = vmatprep.subr.bf16.mxu0 %v418_v0  ;;  %396 = vmatprep.subr.bf16.mxu1 %v418_v0  ;;  %v361_v24 = vld [vmem:[%s561_s3] sm:$0xff]   ;;  %v366_v28 = vunpack.c.l.bf16 %v372_v23  ;;  %v367_v37 = vunpack.c.h.bf16 %v372_v23  ;;  %v373_v45 = vld [vmem:[%s561_s3 + $0x10] sm:$0xff]  }
   0x5   :  { %v345_v26 = vld [vmem:[%s562_s2] ss:$0 sm:$0xff]  ;;  %v362_v29 = vunpack.c.l.bf16 %v361_v24  ;;  %v363_v41 = vunpack.c.h.bf16 %v361_v24  ;;  %v370_v52 = vunpack.c.l.bf16 %v373_v45  ;;  %v371_v58 = vunpack.c.h.bf16 %v373_v45 }
   0x7   :  { %382 = vmatpush3.bf16.msra.mxu0 %v402_v2  ;;  %398 = vmatpush3.bf16.msra.mxu1 %v402_v2 }
   0x8   :  { %v35_v6 = vld [vmem:[#allocation2] sm:$0xff]  ;;  %v36_v14 = vld [vmem:[#allocation2 + $0x8] sm:$0xff] }
   0x9   :  { %v37_v7 = vld [vmem:[#allocation2 + $0x10] sm:$0xff]  ;;  %v38_v15 = vld [vmem:[#allocation2 + $0x18] sm:$0xff] }
   0xa   :  { %384 = vmatmul.mubr.msk.bf16.vlgmr.msra.gmra.mxu0 %vm28_vm0, %v403_v3  ;;  %388 = vmatmul.mubr.msk.bf16.vlgmr.msra.gmra.mxu1 %vm28_vm0, %v404_v4  ;;  %v39_v22 = vld [vmem:[#allocation2 + $0x20] sm:$0xff]  ;;  %v40_v31 = vld [vmem:[#allocation2 + $0x28] sm:$0xff] }
   0xb   :  { %391 = vmatprep.mubr.msk.bf16.mxu1 %vm419_vm1, %v418_v0 }
  0x12   :  { %392 = vmatmul.mubr.msk.bf16.gmra.mxu1 %vm28_vm0, %v405_v5 }
  0xca   :  { %v122_v8 = vpop.f32.mrf.mxu0  ;;  %v130_v9 = vpop.f32.mrf.mxu1 }
  0xcb   :  { %v145_v10 = vadd.f32 %v122_v8, %v35_v6  ;;  %v147_v11 = vadd.f32 %v130_v9, %v37_v7 }
  0xcc   :  { %v385_v12 = vpop.f32.mrf.mxu0  ;;  %v389_v13 = vpop.f32.mrf.mxu1 }
  0xcd   :  { %151 = vst.msk [vmem:[#allocation2] sm:$0xff] %vm28_vm0, %v145_v10  ;;  %153 = vst.msk [vmem:[#allocation2 + $0x10] sm:$0xff] %vm28_vm0, %v147_v11 }
  0xce   :  { %v125_v16 = vpop.f32.mrf.mxu0  ;;  %v133_v17 = vpop.f32.mrf.mxu1 }
  0xcf   :  { %v146_v18 = vadd.f32 %v125_v16, %v36_v14  ;;  %v148_v19 = vadd.f32 %v133_v17, %v38_v15 }
  0xd0   :  { %v386_v20 = vpop.f32.mrf.mxu0  ;;  %v390_v21 = vpop.f32.mrf.mxu1 }
  0xd1   :  { %152 = vst.msk [vmem:[#allocation2 + $0x8] sm:$0xff] %vm28_vm0, %v146_v18  ;;  %154 = vst.msk [vmem:[#allocation2 + $0x18] sm:$0xff] %vm28_vm0, %v148_v19 }
  0xd2   :  { %v138_v25 = vpop.f32.mrf.mxu1 }
  0xd3   :  { %v149_v27 = vadd.f32 %v138_v25, %v39_v22 }
  0xd4   :  { %v393_v30 = vpop.f32.mrf.mxu1  ;;  %v162_v32 = vld [vmem:[#allocation2 + $0x10] sm:$0xff]  ;;  %v160_v33 = vld [vmem:[#allocation2] sm:$0xff] }
  0xd5   :  { %155 = vst.msk [vmem:[#allocation2 + $0x20] sm:$0xff] %vm28_vm0, %v149_v27  ;;  %v175_v34 = vadd.f32 %v345_v26, %v162_v32  ;;  %v173_v35 = vadd.f32 %v345_v26, %v160_v33 }
  0xd6   :  { %v141_v36 = vpop.f32.mrf.mxu1 }
  0xd7   :  { %v150_v38 = vadd.f32 %v141_v36, %v40_v31  ;;  %v193_v39 = vadd.f32 %v366_v28, %v175_v34  ;;  %v191_v40 = vadd.f32 %v362_v29, %v173_v35 }
  0xd8   :  { %v394_v42 = vpop.f32.mrf.mxu1  ;;  %v163_v43 = vld [vmem:[#allocation2 + $0x18] sm:$0xff]  ;;  %v161_v44 = vld [vmem:[#allocation2 + $0x8] sm:$0xff] }
  0xd9   :  { %156 = vst.msk [vmem:[#allocation2 + $0x28] sm:$0xff] %vm28_vm0, %v150_v38  ;;  %v203_v46 = vsel %vm28_vm0, %v193_v39, 0.0  ;;  %v197_v47 = vsel %vm28_vm0, %v191_v40, 0.0  ;;  %v176_v48 = vadd.f32 %v345_v26, %v163_v43  ;;  %v174_v49 = vadd.f32 %v345_v26, %v161_v44 }
  0xda   :  { %204 = vadd.xlane.f32.xlu1 %v203_v46  ;;  %198 = vadd.xlane.f32.xlu0 %v197_v47 }
  0xdb   :  { %v194_v50 = vadd.f32 %v367_v37, %v176_v48  ;;  %v192_v51 = vadd.f32 %v363_v41, %v174_v49  ;;  %v346_v49 = vld [vmem:[%s563_s4] ss:$0 sm:$0xff] }
  0xdc   :  { %v164_v53 = vld [vmem:[#allocation2 + $0x20] sm:$0xff] }
  0xdd   :  { %v206_v54 = vsel %vm28_vm0, %v194_v50, 0.0  ;;  %v200_v55 = vsel %vm28_vm0, %v192_v51, 0.0  ;;  %v177_v56 = vadd.f32 %v345_v26, %v164_v53 }
  0xde   :  { %207 = vadd.xlane.f32.xlu1 %v206_v54  ;;  %201 = vadd.xlane.f32.xlu0 %v200_v55 }
  0xdf   :  { %v195_v57 = vadd.f32 %v370_v52, %v177_v56 }
  0xe0   :  { %v165_v59 = vld [vmem:[#allocation2 + $0x28] sm:$0xff] }
  0xe1   :  { %v209_v60 = vsel %vm28_vm0, %v195_v57, 0.0  ;;  %v178_v61 = vadd.f32 %v345_v26, %v165_v59 }
  0xe2   :  { %210 = vadd.xlane.f32.xlu0 %v209_v60 }
  0xe3   :  { %v196_v62 = vadd.f32 %v371_v58, %v178_v61 }
  0xe5   :  { %v212_v63 = vsel %vm28_vm0, %v196_v62, 0.0 }
  0xe6   :  { %213 = vadd.xlane.f32.xlu1 %v212_v63 }
 0x163   :  { %v205_v0 = vpop.xlane.xlu1 %204  ;;  %v199_v1 = vpop.xlane.xlu0 %198 }
 0x164   :  { %v218_v2 = vmul.f32 0.03125, %v205_v0  ;;  %v216_v3 = vmul.f32 0.03125, %v199_v1 }
 0x166   :  { %v503_v4 = vsub.f32 %v193_v39, %v218_v2  ;;  %v222_v5 = vsub.f32 %v191_v40, %v216_v3 }
 0x167   :  { %v208_v6 = vpop.xlane.xlu1 %207  ;;  %v202_v7 = vpop.xlane.xlu0 %201 }
 0x168   :  { %v219_v8 = vmul.f32 0.03125, %v208_v6  ;;  %v217_v9 = vmul.f32 0.03125, %v202_v7  ;;  %v228_v10 = vmul.f32 %v222_v5, %v222_v5  ;;  %v230_v14 = vmul.f32 %v503_v4, %v503_v4 }
 0x16a   :  { %v505_v11 = vsub.f32 %v194_v50, %v219_v8  ;;  %v223_v12 = vsub.f32 %v192_v51, %v217_v9  ;;  %v234_v13 = vsel %vm28_vm0, %v228_v10, 0.0  ;;  %v240_v19 = vsel %vm28_vm0, %v230_v14, 0.0  ;;  %v347_v51 = vld [vmem:[%s564_s5] ss:$0 sm:$0xff] }
 0x16b   :  { %235 = vadd.xlane.f32.xlu0 %v234_v13  ;;  %v211_v15 = vpop.xlane.xlu0 %210 }
 0x16c   :  { %v220_v16 = vmul.f32 0.03125, %v211_v15  ;;  %v229_v17 = vmul.f32 %v223_v12, %v223_v12  ;;  %v231_v21 = vmul.f32 %v505_v11, %v505_v11 }
 0x16e   :  { %v510_v18 = vsub.f32 %v195_v57, %v220_v16  ;;  %v237_v20 = vsel %vm28_vm0, %v229_v17, 0.0  ;;  %v243_v26 = vsel %vm28_vm0, %v231_v21, 0.0 }
 0x16f   :  { %v214_v22 = vpop.xlane.xlu1 %213  ;;  %241 = vadd.xlane.f32.xlu0 %v240_v19  ;;  %238 = vadd.xlane.f32.xlu1 %v237_v20 }
 0x170   :  { %v221_v23 = vmul.f32 0.03125, %v214_v22  ;;  %v232_v24 = vmul.f32 %v510_v18, %v510_v18 }
 0x172   :  { %v518_v25 = vsub.f32 %v196_v62, %v221_v23  ;;  %v246_v27 = vsel %vm28_vm0, %v232_v24, 0.0 }
 0x173   :  { %244 = vadd.xlane.f32.xlu1 %v243_v26  ;;  %247 = vadd.xlane.f32.xlu0 %v246_v27 }
 0x174   :  { %v233_v28 = vmul.f32 %v518_v25, %v518_v25 }
 0x176   :  { %v249_v29 = vsel %vm28_vm0, %v233_v28, 0.0 }
 0x177   :  { %250 = vadd.xlane.f32.xlu1 %v249_v29 }
 0x1f4   :  { %v236_v30 = vpop.xlane.xlu0 %235 }
 0x1f5   :  { %v252_v31 = vmul.f32 0.03125, %v236_v30 }
 0x1f7   :  { %v258_v32 = vadd.f32 1e-05, %v252_v31 }
 0x1f8   :  { %v239_v33 = vpop.xlane.xlu1 %238  ;;  %v242_v34 = vpop.xlane.xlu0 %241 }
 0x1f9   :  { %406 = vrsqrt.f32 %v258_v32  ;;  %v253_v35 = vmul.f32 0.03125, %v239_v33  ;;  %v254_v36 = vmul.f32 0.03125, %v242_v34 }
 0x1fb   :  { %v259_v37 = vadd.f32 1e-05, %v253_v35  ;;  %v260_v38 = vadd.f32 1e-05, %v254_v36 }
 0x1fc   :  { %v245_v39 = vpop.xlane.xlu1 %244  ;;  %v248_v40 = vpop.xlane.xlu0 %247 }
 0x1fd   :  { %408 = vrsqrt.f32 %v259_v37  ;;  %v255_v41 = vmul.f32 0.03125, %v245_v39  ;;  %v256_v42 = vmul.f32 0.03125, %v248_v40 }
 0x1fe   :  { %410 = vrsqrt.f32 %v260_v38 }
 0x1ff   :  { %v261_v43 = vadd.f32 1e-05, %v255_v41  ;;  %v262_v44 = vadd.f32 1e-05, %v256_v42 }
 0x200   :  { %v251_v45 = vpop.xlane.xlu1 %250 }
 0x201   :  { %412 = vrsqrt.f32 %v261_v43  ;;  %v257_v46 = vmul.f32 0.03125, %v251_v45 }
 0x202   :  { %414 = vrsqrt.f32 %v262_v44 }
 0x203   :  { %v263_v47 = vadd.f32 1e-05, %v257_v46 }
 0x205   :  { %416 = vrsqrt.f32 %v263_v47 }
 0x206   :  { %v407_v48 = vpop.eup %406 }
 0x207   :  { %v270_v50 = vmul.f32 %v407_v48, %v222_v5 }
 0x209   :  { %v283_v52 = vmul.f32 %v346_v49, %v270_v50 }
 0x20a   :  { %v409_v53 = vpop.eup %408 }
 0x20b   :  { %v411_v54 = vpop.eup %410  ;;  %v296_v55 = vadd.f32 %v347_v51, %v283_v52  ;;  %v271_v56 = vmul.f32 %v409_v53, %v223_v12 }
 0x20c   :  { %v272_v57 = vmul.f32 %v411_v54, %v503_v4 }
 0x20d   :  { %v354_v58 = vpack.c.bf16 %v296_v55, %v296_v55  ;;  %v284_v59 = vmul.f32 %v346_v49, %v271_v56 }
 0x20e   :  { %v413_v60 = vpop.eup %412  ;;  %v285_v61 = vmul.f32 %v346_v49, %v272_v57 }
 0x20f   :  { %v415_v62 = vpop.eup %414  ;;  %327 = vst.msk [vmem:[%s565_s6] sm:$0xf] %vm326_vm2, %v354_v58  ;;  %v297_v63 = vadd.f32 %v347_v51, %v284_v59  ;;  %v273_v0 = vmul.f32 %v413_v60, %v505_v11 }
 0x210   :  { %v298_v1 = vadd.f32 %v347_v51, %v285_v61  ;;  %v274_v2 = vmul.f32 %v415_v62, %v510_v18 }
 0x211   :  { %v355_v3 = vpack.c.bf16 %v297_v63, %v297_v63  ;;  %v286_v5 = vmul.f32 %v346_v49, %v273_v0 }
 0x212   :  { %v417_v6 = vpop.eup %416  ;;  %v356_v4 = vpack.c.bf16 %v298_v1, %v298_v1  ;;  %v287_v7 = vmul.f32 %v346_v49, %v274_v2 }
 0x213   :  { %328 = vst.msk [vmem:[%s565_s6 + $0x4] sm:$0xf] %vm326_vm2, %v355_v3  ;;  %v299_v8 = vadd.f32 %v347_v51, %v286_v5  ;;  %v275_v9 = vmul.f32 %v417_v6, %v518_v25 }
 0x214   :  { %329 = vst.msk [vmem:[%s565_s6 + $0x8] sm:$0xf] %vm326_vm2, %v356_v4  ;;  %v300_v10 = vadd.f32 %v347_v51, %v287_v7 }
 0x215   :  { %v357_v11 = vpack.c.bf16 %v299_v8, %v299_v8  ;;  %v288_v12 = vmul.f32 %v346_v49, %v275_v9 }
 0x216   :  { %v358_v13 = vpack.c.bf16 %v300_v10, %v300_v10 }
 0x217   :  { %330 = vst.msk [vmem:[%s565_s6 + $0xc] sm:$0xf] %vm326_vm2, %v357_v11  ;;  %v301_v14 = vadd.f32 %v347_v51, %v288_v12 }
 0x218   :  { %331 = vst.msk [vmem:[%s565_s6 + $0x10] sm:$0xf] %vm326_vm2, %v358_v13 }
 0x219   :  { %v359_v15 = vpack.c.bf16 %v301_v14, %v301_v14 }
 0x21b   :  { %332 = vst.msk [vmem:[%s565_s6 + $0x14] sm:$0xf] %vm326_vm2, %v359_v15 }

// kernel: vit_forward.17
= control target key start
LH: loop header
LB: loop body
LE: loop exit
PB: predicated region body
PF: predicated region fallthrough
CT: control target
= control target key end

     0   :  { %s1097_s12 = smov 0   ;;  %s1099_s13 = smov 0   ;;  %s1244_s0 = inlined_call_operand.vmem [shape: bf16[48,32], index: 0, kind: input, shape index: {}]   ;;  %s1245_s1 = inlined_call_operand.vmem [shape: bf16[32,1024], index: 1, kind: input, shape index: {}]   ;;  %s1246_s2 = inlined_call_operand.vmem [shape: f32[1,1024], index: 2, kind: input, shape index: {}]   ;;  %s1247_s3 = inlined_call_operand.vmem [shape: bf16[48,1024], index: 3, kind: output, shape index: {}]  }
   0x1   :  { %s1101_s14 = smov 0   ;;  %s1103_s15 = smov 0  }
   0x2   :  { %s1105_s16 = smov 0  }
   0x3 LB: > { %s28_s17 = sadd.s32 1, %s1070_s15  ;;  %s921_s18 = sadd.s32 4294967295, %s1074_s16   ;;  %s1074_s16 = sphi %s1105_s16, %s13_s16   ;;  %s1070_s15 = sphi %s1103_s15, %s1252_s15   ;;  %s1066_s14 = sphi %s1101_s14, %s1251_s14   ;;  %s1062_s13 = sphi %s1099_s13, %s1250_s13   ;;  %s1058_s12 = sphi %s1097_s12, %s1249_s12  }
   0x4   : > { %p30_p0 = scmp.ge.s32.totalorder %s28_s17, 2  ;;  %p76_p1 = scmp.ne.s32.totalorder %s1062_s13, %s1058_s12 }
   0x5   : > { %p77_p2 = scmp.eq.s32.totalorder %s1074_s16, 0  ;;  %p134_p4 = scmp.eq.s32.totalorder %s921_s18, 1 }
   0x6   : > { %s1254_s17 = smov (%p30_p0, %s28_s17), 0  ;;  %s69_s20 = sadd.s32 1, %s1062_s13 }
   0x7   : > { %p78_p3 = por %p77_p2, %p76_p1  ;;  %s65_s19 = ssub.s32 %s1070_s15, %s1254_s17 }
   0x8   : > { %p67_p5 = scmp.eq.s32.totalorder %s65_s19, 0  ;;  %p1132_p6 = por %p134_p4, %p76_p1 }
   0x9   : > { %p925_p7 = scmp.ge.s32.totalorder %s1074_s16, 2 }
   0xa   : > { %s1137_s22 = scalar_select %p67_p5, %s1062_s13, %s69_s20  }
   0xb   : > { %168 = sbr.rel (%p925_p7) target bundleno = 24 (0x18), region = 20 }
  0x10   : > { %171 = sbr.rel (!%p78_p3) target bundleno = 24 (0x18), region = 24  ;;  %s173_s23 = sand.u32 (%p78_p3), 1, %s1062_s13  }
  0x11   : > { %s965_s24 = sshll.u32 (%p78_p3), %s1070_s15, 4  ;;  %s926_s25 = sshll.u32 (%p78_p3), %s173_s23, 6 }
  0x12   : > { %s181_s28 = scalar_lea.vmem (%p78_p3), %s1245_s1, %s965_s24  ;;  %s175_s29 = scalar_lea.vmem (%p78_p3), [#allocation3], %s926_s25 }
  0x13   : > { %v194_v0 = vld [vmem:[%s181_s28] sm:$0xff] (%p78_p3)  ;;  %v196_v1 = vld [vmem:[%s181_s28 + $0x8] sm:$0xff] (%p78_p3) }
  0x14   : > { %v198_v2 = vld [vmem:[%s181_s28 + $0x20] sm:$0xff] (%p78_p3)  ;;  %195 = vst [vmem:[%s175_s29] sm:$0xff] (%p78_p3), %v194_v0  ;;  %197 = vst [vmem:[%s175_s29 + $0x8] sm:$0xff] (%p78_p3), %v196_v1  ;;  %v200_v3 = vld [vmem:[%s181_s28 + $0x28] sm:$0xff] (%p78_p3) }
  0x15   : > { %199 = vst [vmem:[%s175_s29 + $0x10] sm:$0xff] %v198_v2  ;;  %v202_v4 = vld [vmem:[%s181_s28 + $0x40] sm:$0xff]  ;;  %v204_v5 = vld [vmem:[%s181_s28 + $0x48] sm:$0xff]  ;;  %201 = vst [vmem:[%s175_s29 + $0x18] sm:$0xff] %v200_v3 }
  0x16   : > { %203 = vst [vmem:[%s175_s29 + $0x20] sm:$0xff] %v202_v4  ;;  %205 = vst [vmem:[%s175_s29 + $0x28] sm:$0xff] %v204_v5  ;;  %v206_v6 = vld [vmem:[%s181_s28 + $0x60] sm:$0xff]  ;;  %v208_v7 = vld [vmem:[%s181_s28 + $0x68] sm:$0xff] }
  0x17   : > { %207 = vst [vmem:[%s175_s29 + $0x30] sm:$0xff] %v206_v6  ;;  %209 = vst [vmem:[%s175_s29 + $0x38] sm:$0xff] %v208_v7 }
  0x18 PF: > { %p929_p8 = scmp.ge.s32.totalorder %s1074_s16, 1  ;;  %p222_p9 = scmp.lt.s32.totalorder %s1074_s16, 3 }
  0x1a   : > { %p223_p10 = pnand %p929_p8, %p222_p9 }
  0x1b   : > { %s229_s30 = sand.u32 (!%p223_p10), 1, %s1058_s12   ;;  %s931_s18 = sshll.u32 (!%p223_p10), %s1066_s14, 2 }
  0x1c   : > { %226 = sbr.rel (%p223_p10) target bundleno = 273 (0x111), region = 51  ;;  %s930_s4 = sshll.u32 (!%p223_p10), %s229_s30, 6 }
  0x1d   : > { %s231_s5 = scalar_lea.vmem (!%p223_p10), [#allocation3], %s930_s4  ;;  %p275_p11 = scmp.lt.s32.totalorder (!%p223_p10), %s931_s18, 7 }
  0x1e   : > { %s979_s24 = smul.u32 (!%p223_p10), 96, %s229_s30 }
  0x20   : > { %s1181_s12 = scalar_lea.vmem (!%p223_p10), [#allocation4], %s979_s24 }
  0x21   : > { %v1076_v8 = vmov 0   ;;  %v1021_v9 = vld [vmem:[%s231_s5 + $0x24] ss:$16 sps:$4 sm:$0xff]   ;;  %v1023_v10 = vld [vmem:[%s231_s5 + $0x2c] ss:$16 sps:$4 sm:$0xff]   ;;  %vm403_vm0 = vcmask 261120   ;;  %v616_v20 = vlaneseq }
  0x22   : > { %445 = vmatprep.mubr.bf16.mxu0 %v1076_v8  ;;  %508 = vmatprep.mubr.bf16.mxu1 %v1076_v8  ;;  %v1025_v11 = vld [vmem:[%s231_s5 + $0x20] ss:$16 sps:$4 sm:$0xff]   ;;  %v1026_v12 = vld [vmem:[%s231_s5 + $0x28] ss:$16 sps:$4 sm:$0xff]   ;;  %v1027_v13 = vld [vmem:[%s231_s5 + $0x4] ss:$16 sps:$4 sm:$0xff]  }
  0x23   : > { %425 = vmatprep.subr.bf16.mxu0 %v1021_v9  ;;  %488 = vmatprep.subr.bf16.mxu1 %v1023_v10  ;;  %v1029_v14 = vld [vmem:[%s231_s5 + $0xc] ss:$16 sps:$4 sm:$0xff]   ;;  %v1031_v15 = vld [vmem:[%s231_s5] ss:$16 sps:$4 sm:$0xff]   ;;  %v1032_v16 = vld [vmem:[%s231_s5 + $0x8] ss:$16 sps:$4 sm:$0xff]  }
  0x24   : > { %426 = vmatpush1.bf16.msra.mxu0 %v1025_v11  ;;  %489 = vmatpush1.bf16.msra.mxu1 %v1026_v12  ;;  %v1033_v17 = vld [vmem:[%s1244_s0] sm:$0xff]   ;;  %v1034_v18 = vld [vmem:[%s1244_s0 + $0x8] sm:$0xff]   ;;  %v1035_v19 = vld [vmem:[%s1244_s0 + $0x10] sm:$0xff]   ;;  %s1256_s18 = smov (!%p275_p11, %s931_s18), 7  ;;  %v617_v21 = vshrl.u32 %v616_v20, 7  ;;  %s978_s25 = sshll.u32 (%p1132_p6), %s1066_s14, 4 }
  0x25   : > { %427 = vmatprep.subr.bf16.mxu0 %v1027_v13  ;;  %490 = vmatprep.subr.bf16.mxu1 %v1029_v14  ;;  %s277_s23 = scalar_lea.vmem %s1246_s2, %s1256_s18  ;;  %s780_s28 = scalar_lea.vmem (%p1132_p6), %s1247_s3, %s978_s25 }
  0x26   : > { %v618_v22 = vsub.s32 0, %v617_v21  ;;  %v626_v23 = vsub.s32 2, %v617_v21  ;;  %v614_v24 = vld [vmem:[%s277_s23] sm:$0xf]  ;;  %v622_v25 = vsub.s32 1, %v617_v21  ;;  %v630_v26 = vsub.s32 3, %v617_v21 }
  0x28   : > { %428 = vmatpush1.bf16.msra.mxu0 %v1031_v15  ;;  %491 = vmatpush1.bf16.msra.mxu1 %v1032_v16  ;;  %v1163_v27 = vrot.slane %v614_v24, %v618_v22  ;;  %v1165_v28 = vrot.slane %v614_v24, %v626_v23  ;;  %v1167_v29 = vrot.slane %v614_v24, %v622_v25 }
  0x29   : > { %v1169_v30 = vrot.slane %v614_v24, %v630_v26 }
  0x2b   : > { %943 = vmatmul.mubr.msk.bf16.vlgmr.msra.gmra.mxu0 %vm403_vm0, %v1033_v17  ;;  %946 = vmatmul.mubr.msk.bf16.vlgmr.msra.gmra.mxu1 %vm403_vm0, %v1033_v17 }
  0x2c   : > { %455 = vmatprep.mubr.bf16.mxu0 %v1076_v8  ;;  %518 = vmatprep.mubr.bf16.mxu1 %v1076_v8 }
  0x33   : > { %944 = vmatmul.mubr.msk.bf16.gmra.mxu0 %vm403_vm0, %v1034_v18  ;;  %947 = vmatmul.mubr.msk.bf16.gmra.mxu1 %vm403_vm0, %v1034_v18 }
  0x34   : > { %465 = vmatprep.mubr.bf16.mxu0 %v1076_v8  ;;  %528 = vmatprep.mubr.bf16.mxu1 %v1076_v8 }
  0x3b   : > { %945 = vmatmul.mubr.msk.bf16.gmra.mxu0 %vm403_vm0, %v1035_v19  ;;  %948 = vmatmul.mubr.msk.bf16.gmra.mxu1 %vm403_vm0, %v1035_v19 }
  0xeb   : > { %v447_v31 = vpop.f32.mrf.mxu0  ;;  %v510_v32 = vpop.f32.mrf.mxu1 }
  0xec   : > { %v636_v33 = vadd.f32 %v1163_v27, %v447_v31  ;;  %v638_v34 = vadd.f32 %v1165_v28, %v510_v32 }
  0xed   : > { %v449_v35 = vpop.f32.mrf.mxu0  ;;  %v512_v36 = vpop.f32.mrf.mxu1 }
  0xee   : > { %v637_v37 = vadd.f32 %v1167_v29, %v449_v35  ;;  %v639_v38 = vadd.f32 %v1169_v30, %v512_v36  ;;  %v660_v41 = vmax.f32 %v636_v33, 0.0  ;;  %v662_v42 = vmax.f32 %v638_v34, 0.0 }
  0xef   : > { %v451_v39 = vpop.f32.mrf.mxu0  ;;  %v514_v40 = vpop.f32.mrf.mxu1 }
  0xf0   : > { %v661_v43 = vmax.f32 %v637_v37, 0.0  ;;  %v663_v44 = vmax.f32 %v639_v38, 0.0  ;;  %v640_v45 = vadd.f32 %v1163_v27, %v451_v39  ;;  %v642_v46 = vadd.f32 %v1165_v28, %v514_v40 }
  0xf1   : > { %v453_v47 = vpop.f32.mrf.mxu0  ;;  %v516_v48 = vpop.f32.mrf.mxu1 }
  0xf2   : > { %v966_v49 = vpack.c.bf16 %v661_v43, %v660_v41  ;;  %v967_v50 = vpack.c.bf16 %v663_v44, %v662_v42  ;;  %v641_v51 = vadd.f32 %v1167_v29, %v453_v47  ;;  %v643_v52 = vadd.f32 %v1169_v30, %v516_v48 }
  0xf3   : > { %v457_v53 = vpop.f32.mrf.mxu0  ;;  %v520_v54 = vpop.f32.mrf.mxu1  ;;  %v664_v57 = vmax.f32 %v640_v45, 0.0  ;;  %v666_v58 = vmax.f32 %v642_v46, 0.0 }
  0xf4   : > { %756 = vst [vmem:[%s1181_s12] sm:$0xff] %v966_v49  ;;  %757 = vst [vmem:[%s1181_s12 + $0x8] sm:$0xff] %v967_v50  ;;  %v644_v55 = vadd.f32 %v1163_v27, %v457_v53  ;;  %v646_v56 = vadd.f32 %v1165_v28, %v520_v54  ;;  %v665_v59 = vmax.f32 %v641_v51, 0.0  ;;  %v667_v60 = vmax.f32 %v643_v52, 0.0 }
  0xf5   : > { %v459_v61 = vpop.f32.mrf.mxu0  ;;  %v522_v62 = vpop.f32.mrf.mxu1 }
  0xf6   : > { %v645_v63 = vadd.f32 %v1167_v29, %v459_v61  ;;  %v647_v0 = vadd.f32 %v1169_v30, %v522_v62  ;;  %v968_v1 = vpack.c.bf16 %v665_v59, %v664_v57  ;;  %v969_v2 = vpack.c.bf16 %v667_v60, %v666_v58 }
  0xf7   : > { %v461_v3 = vpop.f32.mrf.mxu0  ;;  %v524_v4 = vpop.f32.mrf.mxu1  ;;  %v668_v5 = vmax.f32 %v644_v55, 0.0  ;;  %v670_v6 = vmax.f32 %v646_v56, 0.0 }
  0xf8   : > { %v669_v7 = vmax.f32 %v645_v63, 0.0  ;;  %v671_v8 = vmax.f32 %v647_v0, 0.0  ;;  %758 = vst [vmem:[%s1181_s12 + $0x10] sm:$0xff] %v968_v1  ;;  %759 = vst [vmem:[%s1181_s12 + $0x18] sm:$0xff] %v969_v2  ;;  %v648_v9 = vadd.f32 %v1163_v27, %v461_v3  ;;  %v650_v10 = vadd.f32 %v1165_v28, %v524_v4 }
  0xf9   : > { %v463_v11 = vpop.f32.mrf.mxu0  ;;  %v526_v12 = vpop.f32.mrf.mxu1 }
  0xfa   : > { %v970_v13 = vpack.c.bf16 %v669_v7, %v668_v5  ;;  %v971_v14 = vpack.c.bf16 %v671_v8, %v670_v6  ;;  %v649_v15 = vadd.f32 %v1167_v29, %v463_v11  ;;  %v651_v16 = vadd.f32 %v1169_v30, %v526_v12 }
  0xfb   : > { %v467_v17 = vpop.f32.mrf.mxu0  ;;  %v530_v18 = vpop.f32.mrf.mxu1  ;;  %v672_v21 = vmax.f32 %v648_v9, 0.0  ;;  %v674_v22 = vmax.f32 %v650_v10, 0.0 }
  0xfc   : > { %760 = vst [vmem:[%s1181_s12 + $0x20] sm:$0xff] %v970_v13  ;;  %761 = vst [vmem:[%s1181_s12 + $0x28] sm:$0xff] %v971_v14  ;;  %v652_v19 = vadd.f32 %v1163_v27, %v467_v17  ;;  %v654_v20 = vadd.f32 %v1165_v28, %v530_v18  ;;  %v673_v23 = vmax.f32 %v649_v15, 0.0  ;;  %v675_v24 = vmax.f32 %v651_v16, 0.0 }
  0xfd   : > { %v469_v25 = vpop.f32.mrf.mxu0  ;;  %v532_v26 = vpop.f32.mrf.mxu1 }
  0xfe   : > { %v653_v31 = vadd.f32 %v1167_v29, %v469_v25  ;;  %v655_v32 = vadd.f32 %v1169_v30, %v532_v26  ;;  %v972_v33 = vpack.c.bf16 %v673_v23, %v672_v21  ;;  %v973_v34 = vpack.c.bf16 %v675_v24, %v674_v22 }
  0xff   : > { %v471_v35 = vpop.f32.mrf.mxu0  ;;  %v534_v36 = vpop.f32.mrf.mxu1  ;;  %v676_v37 = vmax.f32 %v652_v19, 0.0  ;;  %v678_v38 = vmax.f32 %v654_v20, 0.0  ;;  %v799_v54 = vld [vmem:[%s1181_s12 + $0x18] sm:$0xff] (%p1132_p6) }
 0x100   : > { %v677_v39 = vmax.f32 %v653_v31, 0.0  ;;  %v679_v40 = vmax.f32 %v655_v32, 0.0  ;;  %762 = vst [vmem:[%s1181_s12 + $0x30] sm:$0xff] %v972_v33  ;;  %763 = vst [vmem:[%s1181_s12 + $0x38] sm:$0xff] %v973_v34  ;;  %v656_v41 = vadd.f32 %v1163_v27, %v471_v35  ;;  %v658_v42 = vadd.f32 %v1165_v28, %v534_v36  ;;  %v793_v28 = vld [vmem:[%s1181_s12] sm:$0xff] (%p1132_p6) }
 0x101   : > { %v473_v43 = vpop.f32.mrf.mxu0  ;;  %v536_v44 = vpop.f32.mrf.mxu1  ;;  %794 = vst [vmem:[%s780_s28] sm:$0xff] (%p1132_p6), %v793_v28  ;;  %800 = vst [vmem:[%s780_s28 + $0x28] sm:$0xff] (%p1132_p6), %v799_v54 }
 0x102   : > { %v974_v45 = vpack.c.bf16 %v677_v39, %v676_v37  ;;  %v975_v46 = vpack.c.bf16 %v679_v40, %v678_v38  ;;  %v657_v47 = vadd.f32 %v1167_v29, %v473_v43  ;;  %v659_v48 = vadd.f32 %v1169_v30, %v536_v44  ;;  %v795_v29 = vld [vmem:[%s1181_s12 + $0x8] sm:$0xff] (%p1132_p6)  ;;  %v797_v30 = vld [vmem:[%s1181_s12 + $0x10] sm:$0xff] (%p1132_p6) }
 0x103   : > { %v680_v49 = vmax.f32 %v656_v41, 0.0  ;;  %v682_v50 = vmax.f32 %v658_v42, 0.0  ;;  %v801_v55 = vld [vmem:[%s1181_s12 + $0x20] sm:$0xff] (%p1132_p6)  ;;  %v803_v56 = vld [vmem:[%s1181_s12 + $0x28] sm:$0xff] (%p1132_p6)  ;;  %796 = vst [vmem:[%s780_s28 + $0x8] sm:$0xff] (%p1132_p6), %v795_v29  ;;  %798 = vst [vmem:[%s780_s28 + $0x20] sm:$0xff] (%p1132_p6), %v797_v30 }
 0x104   : > { %764 = vst [vmem:[%s1181_s12 + $0x40] sm:$0xff] %v974_v45  ;;  %765 = vst [vmem:[%s1181_s12 + $0x48] sm:$0xff] %v975_v46  ;;  %v681_v51 = vmax.f32 %v657_v47, 0.0  ;;  %v683_v52 = vmax.f32 %v659_v48, 0.0  ;;  %774 = sbr.rel (!%p1132_p6) target bundleno = 273 (0x111), region = 67 }
 0x105   : > { %802 = vst [vmem:[%s780_s28 + $0x40] sm:$0xff] (%p1132_p6), %v801_v55  ;;  %804 = vst [vmem:[%s780_s28 + $0x48] sm:$0xff] (%p1132_p6), %v803_v56 }
 0x106   : > { %v976_v53 = vpack.c.bf16 %v681_v51, %v680_v49  ;;  %v977_v27 = vpack.c.bf16 %v683_v52, %v682_v50 }
 0x107   : > { %v805_v57 = vld [vmem:[%s1181_s12 + $0x30] sm:$0xff] (%p1132_p6)  ;;  %v807_v58 = vld [vmem:[%s1181_s12 + $0x38] sm:$0xff] (%p1132_p6) }
 0x108   : > { %766 = vst [vmem:[%s1181_s12 + $0x50] sm:$0xff] %v976_v53  ;;  %767 = vst [vmem:[%s1181_s12 + $0x58] sm:$0xff] %v977_v27 }
 0x109   : > { %806 = vst [vmem:[%s780_s28 + $0x60] sm:$0xff] %v805_v57  ;;  %808 = vst [vmem:[%s780_s28 + $0x68] sm:$0xff] %v807_v58 }
 0x10b   : > { %v809_v59 = vld [vmem:[%s1181_s12 + $0x40] sm:$0xff]  ;;  %v811_v60 = vld [vmem:[%s1181_s12 + $0x48] sm:$0xff] }
 0x10c   : > { %810 = vst [vmem:[%s780_s28 + $0x80] sm:$0xff] %v809_v59  ;;  %812 = vst [vmem:[%s780_s28 + $0x88] sm:$0xff] %v811_v60 }
 0x10f   : > { %v813_v61 = vld [vmem:[%s1181_s12 + $0x50] sm:$0xff]  ;;  %v815_v62 = vld [vmem:[%s1181_s12 + $0x58] sm:$0xff] }
 0x110   : > { %814 = vst [vmem:[%s780_s28 + $0xa0] sm:$0xff] %v813_v61  ;;  %816 = vst [vmem:[%s780_s28 + $0xa8] sm:$0xff] %v815_v62 }
 0x111 PF: > { %s13_s16 = sadd.s32 1, %s1074_s16   ;;  %s1249_s12 = smov %s1062_s13 }
 0x112   : > { %p10_p12 = scmp.ge.s32.totalorder %s13_s16, 4   ;;  %s1250_s13 = smov %s1137_s22 }
 0x113   : > { %s1251_s14 = smov %s1070_s15  ;;  %s1252_s15 = smov %s1254_s17 }
 0x114   :  { %12 = sbr.rel (!%p10_p12) target bundleno = 3 (0x3), region = 127 }

// kernel: vit_forward.18
= control target key start
LH: loop header
LB: loop body
LE: loop exit
PB: predicated region body
PF: predicated region fallthrough
CT: control target
= control target key end

     0   :  { %s1444_s21 = smov 0   ;;  %s1446_s22 = smov 0   ;;  %s1634_s0 = inlined_call_operand.vmem [shape: bf16[48,1024], index: 0, kind: input, shape index: {}]   ;;  %s1635_s1 = inlined_call_operand.vmem [shape: bf16[1024,32], index: 1, kind: input, shape index: {}]   ;;  %s1636_s2 = inlined_call_operand.vmem [shape: f32[1,32], index: 2, kind: input, shape index: {}]   ;;  %s1637_s3 = inlined_call_operand.vmem [shape: bf16[48,32], index: 3, kind: input, shape index: {}]   ;;  %s1638_s4 = inlined_call_operand.vmem [shape: f32[1,32], index: 4, kind: input, shape index: {}]   ;;  %s1639_s5 = inlined_call_operand.vmem [shape: f32[1,32], index: 5, kind: input, shape index: {}]   ;;  %s1640_s6 = inlined_call_operand.vmem [shape: bf16[48,32], index: 6, kind: output, shape index: {}]  }
   0x1   :  { %s1448_s23 = smov 0   ;;  %s1450_s24 = smov 0  }
   0x2   :  { %s1452_s25 = smov 0  }
   0x3 LB: > { %s25_s26 = sadd.s32 1, %s1402_s24  ;;  %p44_p1 = scmp.ne.s32.totalorder %s1394_s22, %s1390_s21  ;;  %s1406_s25 = sphi %s1452_s25, %s16_s25   ;;  %s1402_s24 = sphi %s1450_s24, %s1644_s24   ;;  %s1398_s23 = sphi %s1448_s23, %s1643_s23   ;;  %s1394_s22 = sphi %s1446_s22, %s1642_s22   ;;  %s1390_s21 = sphi %s1444_s21, %s1641_s21  }
   0x4   : > { %p26_p0 = scmp.ge.s32.totalorder %s25_s26, 2  ;;  %p45_p2 = scmp.eq.s32.totalorder %s1406_s25, 0 }
   0x5   : > { %s37_s28 = sadd.s32 1, %s1394_s22  ;;  %p1109_p5 = scmp.ge.s32.totalorder %s1406_s25, 2 }
   0x6   : > { %s1646_s26 = smov (%p26_p0, %s25_s26), 0  ;;  %p46_p3 = por %p45_p2, %p44_p1 }
   0x7   : > { %s33_s27 = ssub.s32 %s1402_s24, %s1646_s26  ;;  %229 = sbr.rel (%p1109_p5) target bundleno = 22 (0x16), region = 32 }
   0x8   : > { %p35_p4 = scmp.eq.s32.totalorder %s33_s27, 0 }
   0xa   : > { %s1479_s29 = scalar_select %p35_p4, %s1394_s22, %s37_s28  }
   0xc   : > { %232 = sbr.rel (!%p46_p3) target bundleno = 22 (0x16), region = 36  ;;  %s234_s30 = sand.u32 (%p46_p3), 1, %s1394_s22  }
   0xd   : > { %s1174_s7 = sshll.u32 (%p46_p3), %s1402_s24, 4  ;;  %s1263_s8 = smul.u32 (%p46_p3), 96, %s234_s30 }
   0xe   : > { %s242_s11 = scalar_lea.vmem (%p46_p3), %s1634_s0, %s1174_s7 }
   0xf   : > { %v255_v0 = vld [vmem:[%s242_s11] sm:$0xff] (%p46_p3)  ;;  %v257_v1 = vld [vmem:[%s242_s11 + $0x8] sm:$0xff] (%p46_p3)  ;;  %s236_s12 = scalar_lea.vmem (%p46_p3), [#allocation3], %s1263_s8 }
  0x10   : > { %v259_v2 = vld [vmem:[%s242_s11 + $0x20] sm:$0xff] (%p46_p3)  ;;  %v261_v3 = vld [vmem:[%s242_s11 + $0x28] sm:$0xff] (%p46_p3)  ;;  %256 = vst [vmem:[%s236_s12] sm:$0xff] (%p46_p3), %v255_v0  ;;  %258 = vst [vmem:[%s236_s12 + $0x8] sm:$0xff] (%p46_p3), %v257_v1 }
  0x11   : > { %v263_v4 = vld [vmem:[%s242_s11 + $0x40] sm:$0xff]  ;;  %v265_v5 = vld [vmem:[%s242_s11 + $0x48] sm:$0xff]  ;;  %260 = vst [vmem:[%s236_s12 + $0x10] sm:$0xff] %v259_v2  ;;  %262 = vst [vmem:[%s236_s12 + $0x18] sm:$0xff] %v261_v3 }
  0x12   : > { %264 = vst [vmem:[%s236_s12 + $0x20] sm:$0xff] %v263_v4  ;;  %266 = vst [vmem:[%s236_s12 + $0x28] sm:$0xff] %v265_v5  ;;  %v267_v6 = vld [vmem:[%s242_s11 + $0x60] sm:$0xff]  ;;  %v269_v7 = vld [vmem:[%s242_s11 + $0x68] sm:$0xff] }
  0x13   : > { %v271_v8 = vld [vmem:[%s242_s11 + $0x80] sm:$0xff]  ;;  %268 = vst [vmem:[%s236_s12 + $0x30] sm:$0xff] %v267_v6  ;;  %270 = vst [vmem:[%s236_s12 + $0x38] sm:$0xff] %v269_v7  ;;  %v273_v9 = vld [vmem:[%s242_s11 + $0x88] sm:$0xff] }
  0x14   : > { %272 = vst [vmem:[%s236_s12 + $0x40] sm:$0xff] %v271_v8  ;;  %v275_v10 = vld [vmem:[%s242_s11 + $0xa0] sm:$0xff]  ;;  %v277_v11 = vld [vmem:[%s242_s11 + $0xa8] sm:$0xff]  ;;  %274 = vst [vmem:[%s236_s12 + $0x48] sm:$0xff] %v273_v9 }
  0x15   : > { %276 = vst [vmem:[%s236_s12 + $0x50] sm:$0xff] %v275_v10  ;;  %278 = vst [vmem:[%s236_s12 + $0x58] sm:$0xff] %v277_v11 }
  0x16 PF: > { %p1112_p6 = scmp.ge.s32.totalorder %s1406_s25, 1  ;;  %p292_p7 = scmp.lt.s32.totalorder %s1406_s25, 3 }
  0x18   : > { %p293_p8 = pnand %p1112_p6, %p292_p7 }
  0x19   : > { %s299_s13 = sand.u32 (!%p293_p8), 1, %s1390_s21   ;;  %s1113_s14 = sshll.u32 (!%p293_p8), %s1398_s23, 6 }
  0x1a   : > { %296 = sbr.rel (%p293_p8) target bundleno = 627 (0x273), region = 63  ;;  %p341_p9 = scmp.lt.s32.totalorder (!%p293_p8), %s1113_s14, 127 }
  0x1b   : > { %s1264_s15 = smul.u32 (!%p293_p8), 96, %s299_s13  ;;  %p1115_p10 = scmp.ne.s32.totalorder (!%p293_p8), %s1398_s23, 0 }
  0x1d   : > { %s1496_s20 = scalar_lea.vmem (!%p293_p8), [#allocation3], %s1264_s15 }
  0x1f   : > { %s1648_s14 = smov (!%p341_p9, %s1113_s14), 127  ;;  %362 = sbr.rel (%p1115_p10) target bundleno = 40 (0x28), region = 71 }
  0x20   : > { %s1114_s16 = sshll.u32 %s1648_s14, 2 }
  0x21   : > { %s1494_s19 = scalar_lea.vmem %s1635_s1, %s1114_s16 }
  0x24   : > { %vm363_vm0 = vcmask 261120   ;;  %v1408_v12 = vmov 0.0  }
  0x25   : > { %364 = vst.msk [vmem:[#allocation2] sm:$0xff] %vm363_vm0, %v1408_v12  ;;  %365 = vst.msk [vmem:[#allocation2 + $0x8] sm:$0xff] %vm363_vm0, %v1408_v12 }
  0x26   : > { %366 = vst.msk [vmem:[#allocation2 + $0x10] sm:$0xff] %vm363_vm0, %v1408_v12  ;;  %367 = vst.msk [vmem:[#allocation2 + $0x18] sm:$0xff] %vm363_vm0, %v1408_v12 }
  0x27   : > { %368 = vst.msk [vmem:[#allocation2 + $0x20] sm:$0xff] %vm363_vm0, %v1408_v12  ;;  %369 = vst.msk [vmem:[#allocation2 + $0x28] sm:$0xff] %vm363_vm0, %v1408_v12 }
  0x28 PF: > { %v1306_v13 = vld [vmem:[%s1494_s19 + $0x78] sm:$0xff]   ;;  %v1310_v17 = vld [vmem:[%s1494_s19 + $0x70] sm:$0xff]   ;;  %v1314_v21 = vld [vmem:[%s1494_s19 + $0x68] sm:$0xff]   ;;  %vm824_vm1 = vcmask 261120   ;;  %p1160_p11 = scmp.ne.s32.totalorder %s1398_s23, 1 }
  0x29   : > { %v1307_v14 = vld [vmem:[%s1494_s19 + $0xf8] sm:$0xff]   ;;  %1195 = vmatprep.subr.bf16.mxu0 %v1306_v13  ;;  %v1311_v18 = vld [vmem:[%s1494_s19 + $0xf0] sm:$0xff]   ;;  %v1315_v22 = vld [vmem:[%s1494_s19 + $0xe8] sm:$0xff]  }
  0x2a   : > { %v1308_v15 = vld [vmem:[%s1494_s19 + $0x38] sm:$0xff]   ;;  %1229 = vmatprep.subr.bf16.mxu1 %v1307_v14  ;;  %v1312_v19 = vld [vmem:[%s1494_s19 + $0x30] sm:$0xff]   ;;  %v1316_v23 = vld [vmem:[%s1494_s19 + $0x28] sm:$0xff]  }
  0x2b   : > { %v1309_v16 = vld [vmem:[%s1494_s19 + $0xb8] sm:$0xff]   ;;  %1196 = vmatpush3.bf16.msra.mxu0 %v1308_v15  ;;  %v1313_v20 = vld [vmem:[%s1494_s19 + $0xb0] sm:$0xff]   ;;  %v1317_v24 = vld [vmem:[%s1494_s19 + $0xa8] sm:$0xff]  }
  0x2c   : > { %1230 = vmatpush3.bf16.msra.mxu1 %v1309_v16  ;;  %1197 = vmatprep.subr.bf16.mxu0 %v1310_v17  ;;  %v1318_v25 = vld [vmem:[%s1494_s19 + $0x60] sm:$0xff]   ;;  %v1322_v29 = vld [vmem:[%s1494_s19 + $0x58] sm:$0xff]   ;;  %v1326_v33 = vld [vmem:[%s1494_s19 + $0x50] sm:$0xff]  }
  0x2d   : > { %1231 = vmatprep.subr.bf16.mxu1 %v1311_v18  ;;  %v1319_v26 = vld [vmem:[%s1494_s19 + $0xe0] sm:$0xff]   ;;  %v1323_v30 = vld [vmem:[%s1494_s19 + $0xd8] sm:$0xff]   ;;  %v1327_v34 = vld [vmem:[%s1494_s19 + $0xd0] sm:$0xff]  }
  0x2e   : > { %v1320_v27 = vld [vmem:[%s1494_s19 + $0x20] sm:$0xff]   ;;  %v1324_v31 = vld [vmem:[%s1494_s19 + $0x18] sm:$0xff]   ;;  %v1328_v35 = vld [vmem:[%s1494_s19 + $0x10] sm:$0xff]  }
  0x2f   : > { %1198 = vmatpush3.bf16.msra.mxu0 %v1312_v19  ;;  %v1321_v28 = vld [vmem:[%s1494_s19 + $0xa0] sm:$0xff]   ;;  %v1325_v32 = vld [vmem:[%s1494_s19 + $0x98] sm:$0xff]   ;;  %v1329_v36 = vld [vmem:[%s1494_s19 + $0x90] sm:$0xff]  }
  0x30   : > { %1232 = vmatpush3.bf16.msra.mxu1 %v1313_v20  ;;  %1199 = vmatprep.subr.bf16.mxu0 %v1314_v21  ;;  %v1330_v37 = vld [vmem:[%s1494_s19 + $0x48] sm:$0xff]   ;;  %v1334_v41 = vld [vmem:[%s1494_s19 + $0x40] sm:$0xff]   ;;  %v372_v18 = vld [vmem:[#allocation2 + $0x10] sm:$0xff] }
  0x31   : > { %1233 = vmatprep.subr.bf16.mxu1 %v1315_v22  ;;  %v1331_v38 = vld [vmem:[%s1494_s19 + $0xc8] sm:$0xff]   ;;  %v1335_v42 = vld [vmem:[%s1494_s19 + $0xc0] sm:$0xff]  }
  0x32   : > { %v1332_v39 = vld [vmem:[%s1494_s19 + $0x8] sm:$0xff]   ;;  %v1336_v43 = vld [vmem:[%s1494_s19] sm:$0xff]  }
  0x33   : > { %1200 = vmatpush3.bf16.msra.mxu0 %v1316_v23  ;;  %v1333_v40 = vld [vmem:[%s1494_s19 + $0x88] sm:$0xff]   ;;  %v1337_v44 = vld [vmem:[%s1494_s19 + $0x80] sm:$0xff]  }
  0x34   : > { %1234 = vmatpush3.bf16.msra.mxu1 %v1317_v24  ;;  %1201 = vmatprep.subr.bf16.mxu0 %v1318_v25  ;;  %v1338_v45 = vld [vmem:[%s1496_s20] ss:$16 sps:$4 sm:$0xff]   ;;  %v1340_v46 = vld [vmem:[%s1496_s20 + $0x4] ss:$16 sps:$4 sm:$0xff]   ;;  %v1341_v47 = vld [vmem:[%s1496_s20 + $0x8] ss:$16 sps:$4 sm:$0xff]  }
  0x35   : > { %1235 = vmatprep.subr.bf16.mxu1 %v1319_v26  ;;  %v1343_v48 = vld [vmem:[%s1496_s20 + $0xc] ss:$16 sps:$4 sm:$0xff]   ;;  %736 = vmatprep.mubr.bf16.mxu0 %v1340_v46  ;;  %v1344_v49 = vld [vmem:[%s1496_s20 + $0x24] ss:$16 sps:$4 sm:$0xff]   ;;  %v1348_v51 = vld [vmem:[%s1496_s20 + $0x20] ss:$16 sps:$4 sm:$0xff]  }
  0x36   : > { %793 = vmatprep.mubr.bf16.mxu1 %v1343_v48  ;;  %v1346_v50 = vld [vmem:[%s1496_s20 + $0x2c] ss:$16 sps:$4 sm:$0xff]   ;;  %v1349_v52 = vld [vmem:[%s1496_s20 + $0x28] ss:$16 sps:$4 sm:$0xff]   ;;  %v1350_v53 = vld [vmem:[%s1496_s20 + $0x44] ss:$16 sps:$4 sm:$0xff]  }
  0x37   : > { %1202 = vmatpush3.bf16.msra.mxu0 %v1320_v27  ;;  %v1352_v54 = vld [vmem:[%s1496_s20 + $0x4c] ss:$16 sps:$4 sm:$0xff]   ;;  %v1354_v55 = vld [vmem:[%s1496_s20 + $0x40] ss:$16 sps:$4 sm:$0xff]   ;;  %v1355_v56 = vld [vmem:[%s1496_s20 + $0x48] ss:$16 sps:$4 sm:$0xff]  }
  0x38   : > { %1236 = vmatpush3.bf16.msra.mxu1 %v1321_v28  ;;  %1203 = vmatprep.subr.bf16.mxu0 %v1322_v29  ;;  %v370_v0 = vld [vmem:[#allocation2] sm:$0xff]  ;;  %v371_v9 = vld [vmem:[#allocation2 + $0x8] sm:$0xff]  ;;  %v373_v27 = vld [vmem:[#allocation2 + $0x18] sm:$0xff] }
  0x39   : > { %1237 = vmatprep.subr.bf16.mxu1 %v1323_v30 }
  0x3b   : > { %1204 = vmatpush3.bf16.msra.mxu0 %v1324_v31 }
  0x3c   : > { %1238 = vmatpush3.bf16.msra.mxu1 %v1325_v32  ;;  %1205 = vmatprep.subr.bf16.mxu0 %v1326_v33 }
  0x3d   : > { %1239 = vmatprep.subr.bf16.mxu1 %v1327_v34 }
  0x3f   : > { %1206 = vmatpush3.bf16.msra.mxu0 %v1328_v35 }
  0x40   : > { %1240 = vmatpush3.bf16.msra.mxu1 %v1329_v36  ;;  %1207 = vmatprep.subr.bf16.mxu0 %v1330_v37  ;;  %v374_v36 = vld [vmem:[#allocation2 + $0x20] sm:$0xff] }
  0x41   : > { %1241 = vmatprep.subr.bf16.mxu1 %v1331_v38 }
  0x43   : > { %1208 = vmatpush3.bf16.msra.mxu0 %v1332_v39 }
  0x44   : > { %1242 = vmatpush3.bf16.msra.mxu1 %v1333_v40  ;;  %1209 = vmatprep.subr.bf16.mxu0 %v1334_v41 }
  0x45   : > { %1243 = vmatprep.subr.bf16.mxu1 %v1335_v42 }
  0x47   : > { %1210 = vmatpush3.bf16.msra.mxu0 %v1336_v43 }
  0x48   : > { %1244 = vmatpush3.bf16.msra.mxu1 %v1337_v44  ;;  %v375_v44 = vld [vmem:[#allocation2 + $0x28] sm:$0xff] }
  0x4a   : > { %737 = vmatmul.mubr.bf16.vlgmr.msra.gmra.mxu0 %v1338_v45 }
  0x4b   : > { %794 = vmatmul.mubr.bf16.vlgmr.msra.gmra.mxu1 %v1341_v47  ;;  %744 = vmatprep.mubr.bf16.mxu0 %v1344_v49 }
  0x4c   : > { %801 = vmatprep.mubr.bf16.mxu1 %v1346_v50 }
  0x52   : > { %745 = vmatmul.mubr.bf16.gmra.mxu0 %v1348_v51 }
  0x53   : > { %802 = vmatmul.mubr.bf16.gmra.mxu1 %v1349_v52  ;;  %752 = vmatprep.mubr.bf16.mxu0 %v1350_v53 }
  0x54   : > { %809 = vmatprep.mubr.bf16.mxu1 %v1352_v54 }
  0x5a   : > { %753 = vmatmul.mubr.bf16.gmra.mxu0 %v1354_v55 }
  0x5b   : > { %810 = vmatmul.mubr.bf16.gmra.mxu1 %v1355_v56 }
 0x10a   : > { %v1211_v57 = vpop.f32.mrf.mxu0 }
 0x10b   : > { %v1245_v58 = vpop.f32.mrf.mxu1 }
 0x10c   : > { %v1212_v59 = vpop.f32.mrf.mxu0 }
 0x10d   : > { %v1213_v60 = vadd.f32 %v1212_v59, %v1211_v57  ;;  %v1246_v61 = vpop.f32.mrf.mxu1 }
 0x10e   : > { %v1247_v62 = vadd.f32 %v1246_v61, %v1245_v58  ;;  %v1214_v63 = vpop.f32.mrf.mxu0 }
 0x10f   : > { %v1248_v1 = vpop.f32.mrf.mxu1 }
 0x110   : > { %v796_v2 = vadd.f32 %v1247_v62, %v1213_v60  ;;  %v1215_v3 = vpop.f32.mrf.mxu0 }
 0x111   : > { %v1216_v4 = vadd.f32 %v1215_v3, %v1214_v63  ;;  %v1249_v5 = vpop.f32.mrf.mxu1 }
 0x112   : > { %v818_v6 = vadd.f32 %v796_v2, %v370_v0  ;;  %v1250_v7 = vadd.f32 %v1249_v5, %v1248_v1  ;;  %v1217_v8 = vpop.f32.mrf.mxu0 }
 0x113   : > { %v1251_v10 = vpop.f32.mrf.mxu1 }
 0x114   : > { %825 = vst.msk [vmem:[#allocation2] sm:$0xff] %vm824_vm1, %v818_v6  ;;  %v799_v11 = vadd.f32 %v1250_v7, %v1216_v4  ;;  %v1218_v12 = vpop.f32.mrf.mxu0 }
 0x115   : > { %v1219_v13 = vadd.f32 %v1218_v12, %v1217_v8  ;;  %v1252_v14 = vpop.f32.mrf.mxu1 }
 0x116   : > { %v819_v15 = vadd.f32 %v799_v11, %v371_v9  ;;  %v1253_v16 = vadd.f32 %v1252_v14, %v1251_v10  ;;  %v1220_v17 = vpop.f32.mrf.mxu0 }
 0x117   : > { %v1254_v19 = vpop.f32.mrf.mxu1 }
 0x118   : > { %826 = vst.msk [vmem:[#allocation2 + $0x8] sm:$0xff] %vm824_vm1, %v819_v15  ;;  %v804_v20 = vadd.f32 %v1253_v16, %v1219_v13  ;;  %v1221_v21 = vpop.f32.mrf.mxu0 }
 0x119   : > { %v1222_v22 = vadd.f32 %v1221_v21, %v1220_v17  ;;  %v1255_v23 = vpop.f32.mrf.mxu1 }
 0x11a   : > { %v820_v24 = vadd.f32 %v804_v20, %v372_v18  ;;  %v1256_v25 = vadd.f32 %v1255_v23, %v1254_v19  ;;  %v1223_v26 = vpop.f32.mrf.mxu0 }
 0x11b   : > { %v1257_v28 = vpop.f32.mrf.mxu1 }
 0x11c   : > { %827 = vst.msk [vmem:[#allocation2 + $0x10] sm:$0xff] %vm824_vm1, %v820_v24  ;;  %v807_v29 = vadd.f32 %v1256_v25, %v1222_v22  ;;  %v1224_v30 = vpop.f32.mrf.mxu0 }
 0x11d   : > { %v1225_v31 = vadd.f32 %v1224_v30, %v1223_v26  ;;  %v1258_v32 = vpop.f32.mrf.mxu1 }
 0x11e   : > { %v821_v33 = vadd.f32 %v807_v29, %v373_v27  ;;  %v1259_v34 = vadd.f32 %v1258_v32, %v1257_v28  ;;  %v1226_v35 = vpop.f32.mrf.mxu0 }
 0x11f   : > { %v1260_v37 = vpop.f32.mrf.mxu1 }
 0x120   : > { %828 = vst.msk [vmem:[#allocation2 + $0x18] sm:$0xff] %vm824_vm1, %v821_v33  ;;  %v812_v38 = vadd.f32 %v1259_v34, %v1225_v31  ;;  %v1227_v39 = vpop.f32.mrf.mxu0 }
 0x121   : > { %v1228_v40 = vadd.f32 %v1227_v39, %v1226_v35  ;;  %v1261_v41 = vpop.f32.mrf.mxu1 }
 0x122   : > { %v822_v42 = vadd.f32 %v812_v38, %v374_v36  ;;  %v1262_v43 = vadd.f32 %v1261_v41, %v1260_v37 }
 0x124   : > { %829 = vst.msk [vmem:[#allocation2 + $0x20] sm:$0xff] %vm824_vm1, %v822_v42  ;;  %v815_v45 = vadd.f32 %v1262_v43, %v1228_v40  ;;  %834 = sbr.rel (%p1160_p11) target bundleno = 627 (0x273), region = 75 }
 0x126   : > { %v823_v46 = vadd.f32 %v815_v45, %v375_v44 }
 0x128   : > { %830 = vst.msk [vmem:[#allocation2 + $0x28] sm:$0xff] %vm824_vm1, %v823_v46 }
 0x129   : > { %v835_v47 = vld [vmem:[#allocation2] sm:$0xff]  ;;  %v837_v52 = vld [vmem:[#allocation2 + $0x10] sm:$0xff]  ;;  %v1193_v53 = vld [vmem:[%s1637_s3 + $0x8] sm:$0xff]   ;;  %vm1001_vm2 = vcmask 257024  }
 0x12a   : > { %v1161_v48 = vld [vmem:[%s1636_s2] ss:$0 sm:$0xff]  ;;  %v836_v54 = vld [vmem:[#allocation2 + $0x8] sm:$0xff]  ;;  %v1187_v57 = vunpack.c.l.bf16 %v1193_v53  ;;  %v838_v59 = vld [vmem:[#allocation2 + $0x18] sm:$0xff]  ;;  %v1188_v60 = vunpack.c.h.bf16 %v1193_v53 }
 0x12b   : > { %v1182_v49 = vld [vmem:[%s1637_s3] sm:$0xff]   ;;  %v848_v50 = vadd.f32 %v1161_v48, %v835_v47  ;;  %v850_v56 = vadd.f32 %v1161_v48, %v837_v52  ;;  %v849_v58 = vadd.f32 %v1161_v48, %v836_v54  ;;  %v1194_v62 = vld [vmem:[%s1637_s3 + $0x10] sm:$0xff]   ;;  %v851_v0 = vadd.f32 %v1161_v48, %v838_v59 }
 0x12c   : > { %v1183_v51 = vunpack.c.l.bf16 %v1182_v49  ;;  %v1184_v55 = vunpack.c.h.bf16 %v1182_v49  ;;  %v839_v61 = vld [vmem:[#allocation2 + $0x20] sm:$0xff]  ;;  %v1191_v2 = vunpack.c.l.bf16 %v1194_v62  ;;  %v1192_v7 = vunpack.c.h.bf16 %v1194_v62 }
 0x12d   : > { %v852_v1 = vadd.f32 %v1161_v48, %v839_v61  ;;  %v868_v4 = vadd.f32 %v1187_v57, %v850_v56  ;;  %v869_v9 = vadd.f32 %v1188_v60, %v851_v0 }
 0x12e   : > { %v866_v63 = vadd.f32 %v1183_v51, %v848_v50  ;;  %v867_v5 = vadd.f32 %v1184_v55, %v849_v58 }
 0x12f   : > { %v840_v3 = vld [vmem:[#allocation2 + $0x28] sm:$0xff]  ;;  %v878_v10 = vsel %vm824_vm1, %v868_v4, 0.0  ;;  %v870_v12 = vadd.f32 %v1191_v2, %v852_v1  ;;  %v881_v13 = vsel %vm824_vm1, %v869_v9, 0.0  ;;  %v1162_v2 = vld [vmem:[%s1638_s4] ss:$0 sm:$0xff] }
 0x130   : > { %v853_v6 = vadd.f32 %v1161_v48, %v840_v3  ;;  %v872_v8 = vsel %vm824_vm1, %v866_v63, 0.0  ;;  %879 = vadd.xlane.f32.xlu1 %v878_v10  ;;  %v875_v11 = vsel %vm824_vm1, %v867_v5, 0.0 }
 0x131   : > { %873 = vadd.xlane.f32.xlu0 %v872_v8  ;;  %v884_v15 = vsel %vm824_vm1, %v870_v12, 0.0 }
 0x132   : > { %v871_v14 = vadd.f32 %v1192_v7, %v853_v6 }
 0x134   : > { %882 = vadd.xlane.f32.xlu1 %v881_v13  ;;  %v887_v16 = vsel %vm824_vm1, %v871_v14, 0.0 }
 0x135   : > { %876 = vadd.xlane.f32.xlu0 %v875_v11 }
 0x138   : > { %888 = vadd.xlane.f32.xlu1 %v887_v16 }
 0x139   : > { %885 = vadd.xlane.f32.xlu0 %v884_v15 }
 0x1b9   : > { %v880_v19 = vpop.xlane.xlu1 %879 }
 0x1ba   : > { %v874_v17 = vpop.xlane.xlu0 %873  ;;  %v893_v20 = vmul.f32 0.03125, %v880_v19 }
 0x1bb   : > { %v891_v18 = vmul.f32 0.03125, %v874_v17 }
 0x1bc   : > { %v1568_v22 = vsub.f32 %v868_v4, %v893_v20  ;;  %v1163_v4 = vld [vmem:[%s1639_s5] ss:$0 sm:$0xff] }
 0x1bd   : > { %v897_v21 = vsub.f32 %v866_v63, %v891_v18  ;;  %v883_v25 = vpop.xlane.xlu1 %882 }
 0x1be   : > { %v877_v23 = vpop.xlane.xlu0 %876  ;;  %v894_v27 = vmul.f32 0.03125, %v883_v25  ;;  %v905_v28 = vmul.f32 %v1568_v22, %v1568_v22 }
 0x1bf   : > { %v892_v24 = vmul.f32 0.03125, %v877_v23  ;;  %v903_v26 = vmul.f32 %v897_v21, %v897_v21 }
 0x1c0   : > { %v1573_v31 = vsub.f32 %v869_v9, %v894_v27  ;;  %v915_v35 = vsel %vm824_vm1, %v905_v28, 0.0 }
 0x1c1   : > { %v898_v29 = vsub.f32 %v867_v5, %v892_v24  ;;  %v909_v30 = vsel %vm824_vm1, %v903_v26, 0.0  ;;  %v889_v34 = vpop.xlane.xlu1 %888 }
 0x1c2   : > { %910 = vadd.xlane.f32.xlu0 %v909_v30  ;;  %v886_v32 = vpop.xlane.xlu0 %885  ;;  %v896_v37 = vmul.f32 0.03125, %v889_v34  ;;  %v906_v38 = vmul.f32 %v1573_v31, %v1573_v31 }
 0x1c3   : > { %v895_v33 = vmul.f32 0.03125, %v886_v32  ;;  %v904_v36 = vmul.f32 %v898_v29, %v898_v29 }
 0x1c4   : > { %v1579_v41 = vsub.f32 %v871_v14, %v896_v37  ;;  %v918_v42 = vsel %vm824_vm1, %v906_v38, 0.0 }
 0x1c5   : > { %v901_v39 = vsub.f32 %v870_v12, %v895_v33  ;;  %v912_v40 = vsel %vm824_vm1, %v904_v36, 0.0 }
 0x1c6   : > { %916 = vadd.xlane.f32.xlu0 %v915_v35  ;;  %913 = vadd.xlane.f32.xlu1 %v912_v40  ;;  %v908_v44 = vmul.f32 %v1579_v41, %v1579_v41 }
 0x1c7   : > { %v907_v43 = vmul.f32 %v901_v39, %v901_v39 }
 0x1c8   : > { %v924_v46 = vsel %vm824_vm1, %v908_v44, 0.0 }
 0x1c9   : > { %v921_v45 = vsel %vm824_vm1, %v907_v43, 0.0 }
 0x1ca   : > { %919 = vadd.xlane.f32.xlu1 %v918_v42  ;;  %922 = vadd.xlane.f32.xlu0 %v921_v45 }
 0x1ce   : > { %925 = vadd.xlane.f32.xlu1 %v924_v46 }
 0x24b   : > { %v911_v47 = vpop.xlane.xlu0 %910 }
 0x24c   : > { %v927_v48 = vmul.f32 0.03125, %v911_v47 }
 0x24e   : > { %v933_v49 = vadd.f32 1e-05, %v927_v48 }
 0x24f   : > { %v914_v50 = vpop.xlane.xlu1 %913  ;;  %v917_v51 = vpop.xlane.xlu0 %916 }
 0x250   : > { %1356 = vrsqrt.f32 %v933_v49  ;;  %v928_v52 = vmul.f32 0.03125, %v914_v50  ;;  %v929_v53 = vmul.f32 0.03125, %v917_v51 }
 0x252   : > { %v934_v54 = vadd.f32 1e-05, %v928_v52  ;;  %v935_v55 = vadd.f32 1e-05, %v929_v53 }
 0x253   : > { %v920_v56 = vpop.xlane.xlu1 %919  ;;  %v923_v57 = vpop.xlane.xlu0 %922 }
 0x254   : > { %1358 = vrsqrt.f32 %v934_v54  ;;  %v930_v58 = vmul.f32 0.03125, %v920_v56  ;;  %v931_v59 = vmul.f32 0.03125, %v923_v57 }
 0x255   : > { %1360 = vrsqrt.f32 %v935_v55 }
 0x256   : > { %v936_v60 = vadd.f32 1e-05, %v930_v58  ;;  %v937_v61 = vadd.f32 1e-05, %v931_v59 }
 0x257   : > { %v926_v62 = vpop.xlane.xlu1 %925 }
 0x258   : > { %1362 = vrsqrt.f32 %v936_v60  ;;  %v932_v63 = vmul.f32 0.03125, %v926_v62 }
 0x259   : > { %1364 = vrsqrt.f32 %v937_v61 }
 0x25a   : > { %v938_v0 = vadd.f32 1e-05, %v932_v63 }
 0x25c   : > { %1366 = vrsqrt.f32 %v938_v0 }
 0x25d   : > { %v1357_v1 = vpop.eup %1356 }
 0x25e   : > { %v945_v3 = vmul.f32 %v1357_v1, %v897_v21 }
 0x260   : > { %v958_v5 = vmul.f32 %v1162_v2, %v945_v3 }
 0x261   : > { %v1359_v6 = vpop.eup %1358 }
 0x262   : > { %v1361_v7 = vpop.eup %1360  ;;  %v971_v8 = vadd.f32 %v1163_v4, %v958_v5  ;;  %v946_v9 = vmul.f32 %v1359_v6, %v898_v29 }
 0x263   : > { %v947_v10 = vmul.f32 %v1361_v7, %v1568_v22 }
 0x264   : > { %v1175_v11 = vpack.c.bf16 %v971_v8, %v971_v8  ;;  %v959_v12 = vmul.f32 %v1162_v2, %v946_v9 }
 0x265   : > { %v1363_v13 = vpop.eup %1362  ;;  %v960_v14 = vmul.f32 %v1162_v2, %v947_v10 }
 0x266   : > { %v1365_v15 = vpop.eup %1364  ;;  %1002 = vst.msk [vmem:[%s1640_s6] sm:$0xf] %vm1001_vm2, %v1175_v11  ;;  %v972_v16 = vadd.f32 %v1163_v4, %v959_v12  ;;  %v948_v17 = vmul.f32 %v1363_v13, %v1573_v31 }
 0x267   : > { %v973_v18 = vadd.f32 %v1163_v4, %v960_v14  ;;  %v949_v19 = vmul.f32 %v1365_v15, %v901_v39 }
 0x268   : > { %v1176_v20 = vpack.c.bf16 %v972_v16, %v972_v16  ;;  %v961_v21 = vmul.f32 %v1162_v2, %v948_v17 }
 0x269   : > { %v1367_v23 = vpop.eup %1366  ;;  %v1177_v24 = vpack.c.bf16 %v973_v18, %v973_v18  ;;  %v962_v22 = vmul.f32 %v1162_v2, %v949_v19 }
 0x26a   : > { %1003 = vst.msk [vmem:[%s1640_s6 + $0x4] sm:$0xf] %vm1001_vm2, %v1176_v20  ;;  %v974_v25 = vadd.f32 %v1163_v4, %v961_v21  ;;  %v950_v26 = vmul.f32 %v1367_v23, %v1579_v41 }
 0x26b   : > { %1004 = vst.msk [vmem:[%s1640_s6 + $0x8] sm:$0xf] %vm1001_vm2, %v1177_v24  ;;  %v975_v27 = vadd.f32 %v1163_v4, %v962_v22 }
 0x26c   : > { %v1178_v28 = vpack.c.bf16 %v974_v25, %v974_v25  ;;  %v963_v29 = vmul.f32 %v1162_v2, %v950_v26 }
 0x26d   : > { %v1179_v30 = vpack.c.bf16 %v975_v27, %v975_v27 }
 0x26e   : > { %1005 = vst.msk [vmem:[%s1640_s6 + $0xc] sm:$0xf] %vm1001_vm2, %v1178_v28  ;;  %v976_v31 = vadd.f32 %v1163_v4, %v963_v29 }
 0x26f   : > { %1006 = vst.msk [vmem:[%s1640_s6 + $0x10] sm:$0xf] %vm1001_vm2, %v1179_v30 }
 0x270   : > { %v1180_v32 = vpack.c.bf16 %v976_v31, %v976_v31 }
 0x272   : > { %1007 = vst.msk [vmem:[%s1640_s6 + $0x14] sm:$0xf] %vm1001_vm2, %v1180_v32 }
 0x273 PF: > { %s16_s25 = sadd.s32 1, %s1406_s25   ;;  %s1641_s21 = smov %s1394_s22 }
 0x274   : > { %p13_p12 = scmp.ge.s32.totalorder %s16_s25, 4   ;;  %s1642_s22 = smov %s1479_s29 }
 0x275   : > { %s1643_s23 = smov %s1402_s24  ;;  %s1644_s24 = smov %s1646_s26 }
 0x276   :  { %15 = sbr.rel (!%p13_p12) target bundleno = 3 (0x3), region = 116 }

// kernel: vit_forward.24
= control target key start
LH: loop header
LB: loop body
LE: loop exit
PB: predicated region body
PF: predicated region fallthrough
CT: control target
= control target key end

     0   :  { %s824_s18 = smov 0   ;;  %s826_s19 = smov 0   ;;  %s909_s0 = inlined_call_operand.vmem [shape: bf16[8,32], index: 0, kind: input, shape index: {}]   ;;  %s910_s1 = inlined_call_operand.vmem [shape: f32[1,32], index: 1, kind: input, shape index: {}]   ;;  %s911_s2 = inlined_call_operand.vmem [shape: f32[1,32], index: 2, kind: input, shape index: {}]   ;;  %s912_s3 = inlined_call_operand.vmem [shape: bf16[32,1024], index: 3, kind: input, shape index: {}]   ;;  %s913_s4 = inlined_call_operand.vmem [shape: f32[1,1024], index: 4, kind: input, shape index: {}]   ;;  %s914_s5 = inlined_call_operand.vmem [shape: bf16[8,1024], index: 5, kind: output, shape index: {}]  }
   0x1   :  { %s828_s20 = smov 0   ;;  %s830_s21 = smov 0  }
   0x2   :  { %s832_s22 = smov 0  }
   0x3 LB: > { %s24_s23 = sadd.s32 1, %s787_s21  ;;  %p109_p1 = scmp.ne.s32.totalorder %s779_s19, %s775_s18  ;;  %s791_s22 = sphi %s832_s22, %s15_s22   ;;  %s787_s21 = sphi %s830_s21, %s918_s21   ;;  %s783_s20 = sphi %s828_s20, %s917_s20   ;;  %s779_s19 = sphi %s826_s19, %s916_s19   ;;  %s775_s18 = sphi %s824_s18, %s915_s18  }
   0x4   : > { %p25_p0 = scmp.ge.s32.totalorder %s24_s23, 2  ;;  %p110_p2 = scmp.eq.s32.totalorder %s791_s22, 0 }
   0x5   : > { %s102_s25 = sadd.s32 1, %s779_s19  ;;  %p662_p5 = scmp.ge.s32.totalorder %s791_s22, 2 }
   0x6   : > { %s920_s23 = smov (%p25_p0, %s24_s23), 0  ;;  %p111_p3 = por %p110_p2, %p109_p1 }
   0x7   : > { %s99_s24 = ssub.s32 %s787_s21, %s920_s23  ;;  %202 = sbr.rel (%p662_p5) target bundleno = 20 (0x14), region = 28 }
   0x8   : > { %p100_p4 = scmp.eq.s32.totalorder %s99_s24, 0 }
   0xa   : > { %s859_s26 = scalar_select %p100_p4, %s779_s19, %s102_s25  }
   0xc   : > { %205 = sbr.rel (!%p111_p3) target bundleno = 20 (0x14), region = 32  ;;  %s207_s27 = sand.u32 (%p111_p3), 1, %s779_s19  }
   0xd   : > { %s687_s28 = sshll.u32 (%p111_p3), %s787_s21, 4  ;;  %s663_s29 = sshll.u32 (%p111_p3), %s207_s27, 6 }
   0xe   : > { %s212_s7 = scalar_lea.vmem (%p111_p3), %s912_s3, %s687_s28  ;;  %s209_s8 = scalar_lea.vmem (%p111_p3), [#allocation2], %s663_s29 }
   0xf   : > { %v225_v0 = vld [vmem:[%s212_s7] sm:$0xff] (%p111_p3)  ;;  %v227_v1 = vld [vmem:[%s212_s7 + $0x8] sm:$0xff] (%p111_p3) }
  0x10   : > { %v229_v2 = vld [vmem:[%s212_s7 + $0x20] sm:$0xff] (%p111_p3)  ;;  %226 = vst [vmem:[%s209_s8] sm:$0xff] (%p111_p3), %v225_v0  ;;  %228 = vst [vmem:[%s209_s8 + $0x8] sm:$0xff] (%p111_p3), %v227_v1  ;;  %v231_v3 = vld [vmem:[%s212_s7 + $0x28] sm:$0xff] (%p111_p3) }
  0x11   : > { %230 = vst [vmem:[%s209_s8 + $0x10] sm:$0xff] %v229_v2  ;;  %v233_v4 = vld [vmem:[%s212_s7 + $0x40] sm:$0xff]  ;;  %v235_v5 = vld [vmem:[%s212_s7 + $0x48] sm:$0xff]  ;;  %232 = vst [vmem:[%s209_s8 + $0x18] sm:$0xff] %v231_v3 }
  0x12   : > { %234 = vst [vmem:[%s209_s8 + $0x20] sm:$0xff] %v233_v4  ;;  %236 = vst [vmem:[%s209_s8 + $0x28] sm:$0xff] %v235_v5  ;;  %v237_v6 = vld [vmem:[%s212_s7 + $0x60] sm:$0xff]  ;;  %v239_v7 = vld [vmem:[%s212_s7 + $0x68] sm:$0xff] }
  0x13   : > { %238 = vst [vmem:[%s209_s8 + $0x30] sm:$0xff] %v237_v6  ;;  %240 = vst [vmem:[%s209_s8 + $0x38] sm:$0xff] %v239_v7 }
  0x14 PF: > { %p666_p6 = scmp.ge.s32.totalorder %s791_s22, 1  ;;  %p253_p7 = scmp.lt.s32.totalorder %s791_s22, 3 }
  0x16   : > { %p254_p8 = pnand %p666_p6, %p253_p7 }
  0x17   : > { %s260_s11 = sand.u32 (!%p254_p8), 1, %s775_s18   ;;  %s668_s18 = sshll.u32 (!%p254_p8), %s783_s20, 2 }
  0x18   : > { %257 = sbr.rel (%p254_p8) target bundleno = 563 (0x233), region = 59  ;;  %s667_s12 = sshll.u32 (!%p254_p8), %s260_s11, 6 }
  0x19   : > { %s262_s13 = scalar_lea.vmem (!%p254_p8), [#allocation2], %s667_s12  ;;  %p305_p9 = scmp.lt.s32.totalorder (!%p254_p8), %s668_s18, 7 }
  0x1d   : > { %v320_v8 = vld [vmem:[%s909_s0] sm:$0xf]  ;;  %vm322_vm0 = vcmask 261120   ;;  %v793_v16 = vmov 0   ;;  %v731_v17 = vld [vmem:[%s262_s13 + $0x24] ss:$16 sps:$4 sm:$0xff]   ;;  %v364_v35 = vlaneseq }
  0x1e   : > { %v321_v9 = vunpack.c.l.bf16 %v320_v8  ;;  %459 = vmatprep.mubr.bf16.mxu0 %v793_v16  ;;  %500 = vmatprep.mubr.bf16.mxu1 %v793_v16  ;;  %v733_v18 = vld [vmem:[%s262_s13 + $0x2c] ss:$16 sps:$4 sm:$0xff]   ;;  %v735_v19 = vld [vmem:[%s262_s13 + $0x20] ss:$16 sps:$4 sm:$0xff]   ;;  %v736_v20 = vld [vmem:[%s262_s13 + $0x28] ss:$16 sps:$4 sm:$0xff]  }
  0x1f   : > { %439 = vmatprep.subr.bf16.mxu0 %v731_v17  ;;  %480 = vmatprep.subr.bf16.mxu1 %v733_v18  ;;  %v737_v21 = vld [vmem:[%s262_s13 + $0x4] ss:$16 sps:$4 sm:$0xff]   ;;  %v739_v22 = vld [vmem:[%s262_s13 + $0xc] ss:$16 sps:$4 sm:$0xff]   ;;  %v741_v23 = vld [vmem:[%s262_s13] ss:$16 sps:$4 sm:$0xff]  }
  0x20   : > { %v323_v10 = vsel %vm322_vm0, %v321_v9, 0.0  ;;  %440 = vmatpush1.bf16.msra.mxu0 %v735_v19  ;;  %481 = vmatpush1.bf16.msra.mxu1 %v736_v20  ;;  %v742_v24 = vld [vmem:[%s262_s13 + $0x8] ss:$16 sps:$4 sm:$0xff]   ;;  %v671_v29 = vld [vmem:[%s910_s1] ss:$0 sm:$0xff]  ;;  %s922_s18 = smov (!%p305_p9, %s668_s18), 7 }
  0x21   : > { %324 = vadd.xlane.f32.xlu0 %v323_v10  ;;  %441 = vmatprep.subr.bf16.mxu0 %v737_v21  ;;  %v672_v31 = vld [vmem:[%s911_s2] ss:$0 sm:$0xff]  ;;  %v365_v36 = vshrl.u32 %v364_v35, 7  ;;  %s307_s27 = scalar_lea.vmem %s913_s4, %s922_s18  ;;  %s670_s20 = sshll.u32 %s922_s18, 2 }
  0x22   : > { %482 = vmatprep.subr.bf16.mxu1 %v739_v22  ;;  %v362_v39 = vld [vmem:[%s307_s27] sm:$0xf]  ;;  %s317_s30 = scalar_lea.vmem %s914_s5, %s670_s20 }
  0x23   : > { %v366_v37 = vsub.s32 0, %v365_v36  ;;  %v374_v38 = vsub.s32 2, %v365_v36  ;;  %v370_v40 = vsub.s32 1, %v365_v36  ;;  %v378_v41 = vsub.s32 3, %v365_v36 }
  0x24   : > { %442 = vmatpush1.bf16.msra.mxu0 %v741_v23  ;;  %483 = vmatpush1.bf16.msra.mxu1 %v742_v24 }
  0x25   : > { %v367_v42 = vrot.slane %v362_v39, %v366_v37  ;;  %v375_v43 = vrot.slane %v362_v39, %v374_v38  ;;  %v371_v46 = vrot.slane %v362_v39, %v370_v40  ;;  %v379_v47 = vrot.slane %v362_v39, %v378_v41 }
  0xaa   : > { %v325_v11 = vpop.xlane.xlu0 %324 }
  0xab   : > { %v327_v12 = vmul.f32 0.03125, %v325_v11 }
  0xad   : > { %v328_v13 = vsub.f32 %v321_v9, %v327_v12 }
  0xaf   : > { %v329_v14 = vmul.f32 %v328_v13, %v328_v13 }
  0xb1   : > { %v330_v15 = vsel %vm322_vm0, %v329_v14, 0.0 }
  0xb2   : > { %331 = vadd.xlane.f32.xlu0 %v330_v15 }
 0x13b   : > { %v332_v25 = vpop.xlane.xlu0 %331 }
 0x13c   : > { %v333_v26 = vmul.f32 0.03125, %v332_v25 }
 0x13e   : > { %v334_v27 = vadd.f32 1e-05, %v333_v26 }
 0x140   : > { %743 = vrsqrt.f32 %v334_v27 }
 0x14d   : > { %v744_v28 = vpop.eup %743 }
 0x14e   : > { %v336_v30 = vmul.f32 %v744_v28, %v328_v13 }
 0x150   : > { %v344_v32 = vmul.f32 %v671_v29, %v336_v30 }
 0x152   : > { %v352_v33 = vadd.f32 %v672_v31, %v344_v32 }
 0x154   : > { %v353_v34 = vpack.c.bf16 %v352_v33, %v352_v33 }
 0x156   : > { %681 = vmatmul.mubr.msk.bf16.vlgmr.msra.gmra.mxu0 %vm322_vm0, %v353_v34  ;;  %682 = vmatmul.mubr.msk.bf16.vlgmr.msra.gmra.mxu1 %vm322_vm0, %v353_v34 }
 0x216   : > { %v461_v44 = vpop.f32.mrf.mxu0  ;;  %v502_v45 = vpop.f32.mrf.mxu1 }
 0x217   : > { %v462_v48 = vadd.f32 %v461_v44, %v367_v42  ;;  %v503_v49 = vadd.f32 %v502_v45, %v375_v43 }
 0x218   : > { %v463_v50 = vpop.f32.mrf.mxu0  ;;  %v504_v51 = vpop.f32.mrf.mxu1 }
 0x219   : > { %v513_v52 = vmul.f32 0.70710677, %v462_v48  ;;  %v515_v53 = vmul.f32 0.70710677, %v503_v49  ;;  %v464_v54 = vadd.f32 %v463_v50, %v371_v46  ;;  %v505_v55 = vadd.f32 %v504_v51, %v379_v47 }
 0x21a   : > { %v465_v56 = vpop.f32.mrf.mxu0  ;;  %v506_v57 = vpop.f32.mrf.mxu1  ;;  %v509_v4 = vmul.f32 0.5, %v462_v48  ;;  %v511_v7 = vmul.f32 0.5, %v503_v49 }
 0x21b   : > { %745 = verf.f32 %v513_v52  ;;  %v514_v58 = vmul.f32 0.70710677, %v464_v54  ;;  %v516_v61 = vmul.f32 0.70710677, %v505_v55  ;;  %v510_v5 = vmul.f32 0.5, %v464_v54 }
 0x21c   : > { %747 = verf.f32 %v515_v53  ;;  %v466_v59 = vpop.f32.mrf.mxu0  ;;  %v507_v60 = vpop.f32.mrf.mxu1  ;;  %v512_v8 = vmul.f32 0.5, %v505_v55 }
 0x21d   : > { %749 = verf.f32 %v514_v58 }
 0x21e   : > { %751 = verf.f32 %v516_v61 }
 0x228   : > { %v746_v62 = vpop.eup %745 }
 0x229   : > { %v748_v63 = vpop.eup %747  ;;  %v521_v0 = vadd.f32 1.0, %v746_v62 }
 0x22a   : > { %v750_v1 = vpop.eup %749  ;;  %v523_v2 = vadd.f32 1.0, %v748_v63 }
 0x22b   : > { %v752_v3 = vpop.eup %751  ;;  %v522_v6 = vadd.f32 1.0, %v750_v1  ;;  %v525_v10 = vmul.f32 %v521_v0, %v509_v4 }
 0x22c   : > { %v524_v9 = vadd.f32 1.0, %v752_v3  ;;  %v527_v12 = vmul.f32 %v523_v2, %v511_v7 }
 0x22d   : > { %v526_v11 = vmul.f32 %v522_v6, %v510_v5 }
 0x22e   : > { %v528_v13 = vmul.f32 %v524_v9, %v512_v8 }
 0x22f   : > { %v688_v14 = vpack.c.bf16 %v526_v11, %v525_v10 }
 0x230   : > { %v689_v15 = vpack.c.bf16 %v528_v13, %v527_v12 }
 0x231   : > { %545 = vst [vmem:[%s317_s30] sm:$0xff] %v688_v14 }
 0x232   : > { %546 = vst [vmem:[%s317_s30 + $0x8] sm:$0xff] %v689_v15 }
 0x233 PF: > { %s15_s22 = sadd.s32 1, %s791_s22   ;;  %s915_s18 = smov %s779_s19 }
 0x234   : > { %p12_p10 = scmp.ge.s32.totalorder %s15_s22, 4   ;;  %s916_s19 = smov %s859_s26 }
 0x235   : > { %s917_s20 = smov %s787_s21  ;;  %s918_s21 = smov %s920_s23 }
 0x236   :  { %14 = sbr.rel (!%p12_p10) target bundleno = 3 (0x3), region = 104 }

// kernel: vit_forward.25
= control target key start
LH: loop header
LB: loop body
LE: loop exit
PB: predicated region body
PF: predicated region fallthrough
CT: control target
= control target key end

     0   :  { %s940_s12 = smov 0   ;;  %s942_s13 = smov 0   ;;  %s1023_s0 = inlined_call_operand.vmem [shape: bf16[8,1024], index: 0, kind: input, shape index: {}]   ;;  %s1024_s1 = inlined_call_operand.vmem [shape: bf16[1024,128], index: 1, kind: input, shape index: {}]   ;;  %s1025_s2 = inlined_call_operand.vmem [shape: f32[1,128], index: 2, kind: input, shape index: {}]   ;;  %s1026_s3 = inlined_call_operand.vmem [shape: f32[8,128], index: 3, kind: output, shape index: {}]  }
   0x1   :  { %s944_s14 = smov 0  }
   0x2 LB: > { %s25_s15 = sadd.s32 1, %s913_s13  ;;  %p743_p0 = scmp.ge.s32.totalorder %s917_s14, 1  ;;  %s917_s14 = sphi %s944_s14, %s13_s14   ;;  %s913_s13 = sphi %s942_s13, %s1028_s13   ;;  %s909_s12 = sphi %s940_s12, %s1027_s12  }
   0x3   : > { %p26_p1 = scmp.ge.s32.totalorder %s25_s15, 2  ;;  %p189_p2 = scmp.lt.s32.totalorder %s917_s14, 3 }
   0x5   : > { %s1030_s15 = smov (%p26_p1, %s25_s15), 0  ;;  %p190_p3 = pnand %p743_p0, %p189_p2 }
   0x6   : > { %s744_s16 = sshll.u32 (!%p190_p3), %s909_s12, 2  ;;  %s746_s17 = sshll.u32 (!%p190_p3), %s909_s12, 6 }
   0x7   : > { %193 = sbr.rel (%p190_p3) target bundleno = 269 (0x10d), region = 32  ;;  %p233_p4 = scmp.lt.s32.totalorder (!%p190_p3), %s744_s16, 7 }
   0x8   : > { %p241_p5 = scmp.lt.s32.totalorder (!%p190_p3), %s746_s17, 127  ;;  %p748_p6 = scmp.ne.s32.totalorder (!%p190_p3), %s909_s12, 0 }
   0xc   : > { %s1032_s16 = smov (!%p233_p4, %s744_s16), 7  ;;  %s1034_s17 = smov (!%p241_p5, %s746_s17), 127 }
   0xd   : > { %s745_s18 = sshll.u32 %s1032_s16, 2  ;;  %s747_s22 = sshll.u32 %s1034_s17, 2 }
   0xe   : > { %s965_s21 = scalar_lea.vmem %s1023_s0, %s745_s18  ;;  %s970_s25 = scalar_lea.vmem %s1024_s1, %s747_s22 }
   0xf   : > { %263 = sbr.rel (%p748_p6) target bundleno = 22 (0x16), region = 36 }
  0x14   : > { %v919_v0 = vmov 0.0  }
  0x15   : > { %264 = vst [vmem:[#allocation2] sm:$0xff] %v919_v0 }
  0x16 PF: > { %v859_v1 = vld [vmem:[%s970_s25 + $0x78] sm:$0xff]   ;;  %v863_v5 = vld [vmem:[%s970_s25 + $0x70] sm:$0xff]   ;;  %v867_v9 = vld [vmem:[%s970_s25 + $0x68] sm:$0xff]   ;;  %p785_p7 = scmp.ne.s32.totalorder %s909_s12, 1 }
  0x17   : > { %v860_v2 = vld [vmem:[%s970_s25 + $0xf8] sm:$0xff]   ;;  %790 = vmatprep.subr.bf16.mxu0 %v859_v1  ;;  %v864_v6 = vld [vmem:[%s970_s25 + $0xf0] sm:$0xff]   ;;  %v868_v10 = vld [vmem:[%s970_s25 + $0xe8] sm:$0xff]  }
  0x18   : > { %v861_v3 = vld [vmem:[%s970_s25 + $0x38] sm:$0xff]   ;;  %812 = vmatprep.subr.bf16.mxu1 %v860_v2  ;;  %v865_v7 = vld [vmem:[%s970_s25 + $0x30] sm:$0xff]   ;;  %v869_v11 = vld [vmem:[%s970_s25 + $0x28] sm:$0xff]  }
  0x19   : > { %v862_v4 = vld [vmem:[%s970_s25 + $0xb8] sm:$0xff]   ;;  %791 = vmatpush3.bf16.msra.mxu0 %v861_v3  ;;  %v866_v8 = vld [vmem:[%s970_s25 + $0xb0] sm:$0xff]   ;;  %v870_v12 = vld [vmem:[%s970_s25 + $0xa8] sm:$0xff]  }
  0x1a   : > { %813 = vmatpush3.bf16.msra.mxu1 %v862_v4  ;;  %792 = vmatprep.subr.bf16.mxu0 %v863_v5  ;;  %v871_v13 = vld [vmem:[%s970_s25 + $0x60] sm:$0xff]   ;;  %v875_v17 = vld [vmem:[%s970_s25 + $0x58] sm:$0xff]   ;;  %v879_v21 = vld [vmem:[%s970_s25 + $0x50] sm:$0xff]  }
  0x1b   : > { %814 = vmatprep.subr.bf16.mxu1 %v864_v6  ;;  %v872_v14 = vld [vmem:[%s970_s25 + $0xe0] sm:$0xff]   ;;  %v876_v18 = vld [vmem:[%s970_s25 + $0xd8] sm:$0xff]   ;;  %v880_v22 = vld [vmem:[%s970_s25 + $0xd0] sm:$0xff]  }
  0x1c   : > { %v873_v15 = vld [vmem:[%s970_s25 + $0x20] sm:$0xff]   ;;  %v877_v19 = vld [vmem:[%s970_s25 + $0x18] sm:$0xff]   ;;  %v881_v23 = vld [vmem:[%s970_s25 + $0x10] sm:$0xff]  }
  0x1d   : > { %793 = vmatpush3.bf16.msra.mxu0 %v865_v7  ;;  %v874_v16 = vld [vmem:[%s970_s25 + $0xa0] sm:$0xff]   ;;  %v878_v20 = vld [vmem:[%s970_s25 + $0x98] sm:$0xff]   ;;  %v882_v24 = vld [vmem:[%s970_s25 + $0x90] sm:$0xff]  }
  0x1e   : > { %815 = vmatpush3.bf16.msra.mxu1 %v866_v8  ;;  %794 = vmatprep.subr.bf16.mxu0 %v867_v9  ;;  %v883_v25 = vld [vmem:[%s970_s25 + $0x48] sm:$0xff]   ;;  %v887_v29 = vld [vmem:[%s970_s25 + $0x40] sm:$0xff]  }
  0x1f   : > { %816 = vmatprep.subr.bf16.mxu1 %v868_v10  ;;  %v884_v26 = vld [vmem:[%s970_s25 + $0xc8] sm:$0xff]   ;;  %v888_v30 = vld [vmem:[%s970_s25 + $0xc0] sm:$0xff]  }
  0x20   : > { %v885_v27 = vld [vmem:[%s970_s25 + $0x8] sm:$0xff]   ;;  %v889_v31 = vld [vmem:[%s970_s25] sm:$0xff]  }
  0x21   : > { %795 = vmatpush3.bf16.msra.mxu0 %v869_v11  ;;  %v886_v28 = vld [vmem:[%s970_s25 + $0x88] sm:$0xff]   ;;  %v890_v32 = vld [vmem:[%s970_s25 + $0x80] sm:$0xff]  }
  0x22   : > { %817 = vmatpush3.bf16.msra.mxu1 %v870_v12  ;;  %796 = vmatprep.subr.bf16.mxu0 %v871_v13  ;;  %v266_v33 = vld [vmem:[%s965_s21] sm:$0xff]  ;;  %v267_v34 = vld [vmem:[%s965_s21 + $0x8] sm:$0xff] }
  0x23   : > { %818 = vmatprep.subr.bf16.mxu1 %v872_v14  ;;  %v749_v35 = vcombine.low %v266_v33, %v266_v33  ;;  %v750_v36 = vcombine.high %v266_v33, %v266_v33  ;;  %v751_v37 = vcombine.low %v267_v34, %v267_v34  ;;  %v752_v38 = vcombine.high %v267_v34, %v267_v34  ;;  %v265_v45 = vld [vmem:[#allocation2] sm:$0xff] }
  0x25   : > { %797 = vmatpush3.bf16.msra.mxu0 %v873_v15  ;;  %570 = vmatprep.mubr.bf16.mxu0 %v750_v36 }
  0x26   : > { %819 = vmatpush3.bf16.msra.mxu1 %v874_v16  ;;  %798 = vmatprep.subr.bf16.mxu0 %v875_v17 }
  0x27   : > { %820 = vmatprep.subr.bf16.mxu1 %v876_v18  ;;  %610 = vmatprep.mubr.bf16.mxu1 %v752_v38 }
  0x29   : > { %799 = vmatpush3.bf16.msra.mxu0 %v877_v19 }
  0x2a   : > { %821 = vmatpush3.bf16.msra.mxu1 %v878_v20  ;;  %800 = vmatprep.subr.bf16.mxu0 %v879_v21 }
  0x2b   : > { %822 = vmatprep.subr.bf16.mxu1 %v880_v22 }
  0x2d   : > { %801 = vmatpush3.bf16.msra.mxu0 %v881_v23 }
  0x2e   : > { %823 = vmatpush3.bf16.msra.mxu1 %v882_v24  ;;  %802 = vmatprep.subr.bf16.mxu0 %v883_v25 }
  0x2f   : > { %824 = vmatprep.subr.bf16.mxu1 %v884_v26 }
  0x31   : > { %803 = vmatpush3.bf16.msra.mxu0 %v885_v27 }
  0x32   : > { %825 = vmatpush3.bf16.msra.mxu1 %v886_v28  ;;  %804 = vmatprep.subr.bf16.mxu0 %v887_v29 }
  0x33   : > { %826 = vmatprep.subr.bf16.mxu1 %v888_v30 }
  0x35   : > { %805 = vmatpush3.bf16.msra.mxu0 %v889_v31 }
  0x36   : > { %827 = vmatpush3.bf16.msra.mxu1 %v890_v32 }
  0x38   : > { %571 = vmatmul.mubr.bf16.vlgmr.msra.gmra.mxu0 %v749_v35 }
  0x39   : > { %611 = vmatmul.mubr.bf16.vlgmr.msra.gmra.mxu1 %v751_v37 }
  0xf8   : > { %v806_v39 = vpop.f32.mrf.mxu0 }
  0xf9   : > { %v828_v40 = vpop.f32.mrf.mxu1 }
  0xfa   : > { %v807_v41 = vpop.f32.mrf.mxu0 }
  0xfb   : > { %v829_v42 = vpop.f32.mrf.mxu1  ;;  %v808_v43 = vadd.f32 %v807_v41, %v806_v39 }
  0xfc   : > { %v830_v44 = vadd.f32 %v829_v42, %v828_v40  ;;  %v809_v46 = vpop.f32.mrf.mxu0 }
  0xfd   : > { %v831_v47 = vpop.f32.mrf.mxu1 }
  0xfe   : > { %v613_v48 = vadd.f32 %v830_v44, %v808_v43  ;;  %v810_v49 = vpop.f32.mrf.mxu0  ;;  %623 = sbr.rel (%p785_p7) target bundleno = 269 (0x10d), region = 40 }
  0xff   : > { %v832_v50 = vpop.f32.mrf.mxu1 }
 0x100   : > { %v618_v51 = vadd.f32 %v613_v48, %v265_v45 }
 0x102   : > { %619 = vst [vmem:[#allocation2] sm:$0xff] %v618_v51 }
 0x103   : > { %v786_v53 = vld [vmem:[%s1025_s2] ss:$0 sm:$0xff] }
 0x109   : > { %v624_v52 = vld [vmem:[#allocation2] sm:$0xff] }
 0x10a   : > { %v632_v54 = vadd.f32 %v786_v53, %v624_v52 }
 0x10c   : > { %633 = vst [vmem:[%s1026_s3] sm:$0xff] %v632_v54 }
 0x10d PF: > { %s13_s14 = sadd.s32 1, %s917_s14   ;;  %s1027_s12 = smov %s913_s13 }
 0x10e   : > { %p10_p8 = scmp.ge.s32.totalorder %s13_s14, 4   ;;  %s1028_s13 = smov %s1030_s15 }
 0x110   :  { %12 = sbr.rel (!%p10_p8) target bundleno = 2 (0x2), region = 76 }

</bundles_post_ra>
